<compile_context>
chip_gen: v5e
topology: v5e:2x2
jax: 0.10.0
libtpu: 0.0.40
codegen_flags: <defaults>
</compile_context>

<pallas_src>
import jax
import jax.numpy as jnp
import numpy as np
from jax.experimental import pallas as pl
from jax.experimental.pallas import tpu as pltpu


# --------------------------------------------------------------------------------------
# Kernel
# --------------------------------------------------------------------------------------
def _rel_kernel(heads_ref, deps_ref, wrhs_ref, whb_ref, wd_ref, out_ref, rhs_ref):
    """One batch of B sentences per grid step.

    score[x, y, r] = sum_d deps[y, x, d] * (heads[y] @ Wb_r + bb_r)[d]      (bilinear core)
                   + sum_d deps[x, y, d] * W_dep[r, d]                      (dep bias)
                   + sum_d heads[x, d]   * W_head[r, d]                     (head bias)
                   + (b_dep[r] + b_head[r] + rel_bias[r])                   (folded constants)
    followed by log_softmax over r.  Output layout: (B, R, Lp, Lp) = [b, r, x, y].
    """
    B = heads_ref.shape[0]
    Lp = heads_ref.shape[1]
    D = deps_ref.shape[3]
    R = whb_ref.shape[1]

    # Constant W_dep rows of the fused RHS: staged once per GRID STEP (not per sentence).
    # Not gated on program_id()==0 so the kernel stays correct when the "parallel" axis is
    # sharded across TensorCores (each core owns its own scratch and a disjoint step range).
    rhs_ref[:, R:, :] = jnp.broadcast_to(wd_ref[...], (Lp, R, D))

    wrhs = wrhs_ref[...]          # (D+1, R*D)  VMEM-resident across the whole grid
    whb = whb_ref[...]            # (D+1, R)

    for b in range(B):            # static sentence batch per step (B chosen per bucket)
        heads = heads_ref[b]      # (Lp, D+1)  last feature is the constant 1.0
        deps = deps_ref[b]        # (Lp, Lp, D)

        # ONE matmul produces every relation's bilinear transform of heads, bias included
        # (the trailing ones column picks up b_bil).  Replaces R tiny per-relation matmuls.
        hb = jnp.dot(heads, wrhs, preferred_element_type=jnp.float32)      # (Lp, R*D)
        for r in range(R):
            rhs_ref[:, r:r + 1, :] = hb[:, r * D:(r + 1) * D][:, None, :]

        # Head bias for all relations in one matmul; b_dep + b_head + rel_bias are folded
        # into the ones-column row of whb.
        hbias = jnp.dot(heads, whb, preferred_element_type=jnp.float32)    # (Lp, R)

        # Single MXU sweep of deps (deps is read exactly once):
        #   big[i, r,     j] = sum_d (heads[i] @ Wb_r + bb_r)[d] * deps[i, j, d]   (i plays y)
        #   big[i, R + r, j] = sum_d W_dep[r, d]                 * deps[i, j, d]   (i plays x)
        big = jnp.einsum("icd,ijd->icj", rhs_ref[...], deps,
                         preferred_element_type=jnp.float32)               # (Lp, 2R, Lp)

        planes = []
        for r in range(R):
            core_p = big[:, r, :]        # [y, x] -> transpose to [x, y]
            depb_p = big[:, R + r, :]    # already [x, y]
            planes.append(core_p.T + depb_p + hbias[:, r:r + 1])

        # log_softmax over the relation axis (R small & static -> pure VPU/EUP work).
        m = planes[0]
        for p in planes[1:]:
            m = jnp.maximum(m, p)
        den = jnp.exp(planes[0] - m)
        for p in planes[1:]:
            den = den + jnp.exp(p - m)
        logden = jnp.log(den)

        for r in range(R):
            out_ref[b, r] = (planes[r] - m - logden).astype(out_ref.dtype)


# --------------------------------------------------------------------------------------
# pallas_call wrapper
# --------------------------------------------------------------------------------------
_BUCKETS = (16, 32, 64, 128, 256, 512)


def _len_bucket(n):
    for b in _BUCKETS:
        if n <= b:
            return b
    return int(128 * ((n + 127) // 128))


def _sentence_batch(S, Lp, D):
    """Sentences per grid step, sized so the double-buffered deps window fits ~8 MiB."""
    lane_d = ((max(D, 1) + 127) // 128) * 128
    sub_lp = ((Lp + 7) // 8) * 8
    deps_bytes = Lp * sub_lp * lane_d * 4            # one sentence's lane-padded f32 deps
    B = max(1, (8 << 20) // (2 * deps_bytes))
    B = min(B, 8, S)                                 # bound the statically unrolled body
    if S > 1:
        B = min(B, (S + 1) // 2)                     # keep >= 2 grid steps (v7x: 2 TensorCores)
    return max(1, int(B))


def _vmem_limit(B, Lp, Dp, D, R):
    def pad(x, m):
        return ((x + m - 1) // m) * m
    heads_blk = B * pad(Lp, 8) * pad(Dp, 128) * 4
    deps_blk = B * Lp * pad(Lp, 8) * pad(D, 128) * 4
    out_blk = B * R * pad(Lp, 8) * pad(Lp, 128) * 4
    weights = pad(Dp, 8) * (pad(R * D, 128) + 128) * 4 + pad(R, 8) * pad(D, 128) * 4
    scratch = Lp * pad(2 * R, 8) * pad(D, 128) * 4
    est = 2 * (heads_blk + deps_blk + out_blk) + weights + scratch + (8 << 20)
    return int(min(64 << 20, max(32 << 20, est)))


def _rel_forward_padded(heads_aug, deps_b, wrhs, whb, wd, B):
    """heads_aug: (S, Lp, D+1), deps_b: (S, Lp, Lp, D) -> (S, R, Lp, Lp) log-softmax scores."""
    S_pad, Lp, Dp = heads_aug.shape
    D = deps_b.shape[-1]
    R = whb.shape[1]
    grid = (S_pad // B,)

    grid_spec = pltpu.PrefetchScalarGridSpec(
        num_scalar_prefetch=0,
        grid=grid,
        in_specs=[
            pl.BlockSpec((B, Lp, Dp), lambda s: (s, 0, 0)),         # heads (+const feature)
            pl.BlockSpec((B, Lp, Lp, D), lambda s: (s, 0, 0, 0)),   # deps  (per-step batch)
            pl.BlockSpec((Dp, R * D), lambda s: (0, 0)),            # fused bilinear weight (resident)
            pl.BlockSpec((Dp, R), lambda s: (0, 0)),                # head-bias weight (+folded biases)
            pl.BlockSpec((R, D), lambda s: (0, 0)),                 # W_dep rows (resident)
        ],
        out_specs=pl.BlockSpec((B, R, Lp, Lp), lambda s: (s, 0, 0, 0)),
        scratch_shapes=[pltpu.VMEM((Lp, 2 * R, D), jnp.float32)],
    )
    return pl.pallas_call(
        _rel_kernel,
        out_shape=jax.ShapeDtypeStruct((S_pad, R, Lp, Lp), jnp.float32),
        grid_spec=grid_spec,
        compiler_params=pltpu.CompilerParams(
            dimension_semantics=("parallel",),
            vmem_limit_bytes=_vmem_limit(B, Lp, Dp, D, R)),
    )(heads_aug, deps_b, wrhs, whb, wd)


def prepack_params(params):
    """Reorganize the torch-Linear weights once (hoisted out of the hot path)."""
    W_bil = jnp.asarray(params["W_bil"], jnp.float32)           # (D*R, D), row o = d*R + r
    R = int(params["rel_bias"].shape[0])
    D = int(W_bil.shape[1])
    # wb2[e, r*D + d] = W_bil[d*R + r, e]
    wb2 = jnp.transpose(W_bil.reshape(D, R, D), (2, 1, 0)).reshape(D, R * D)
    # bb2[r*D + d] = b_bil[d*R + r]  -> picked up by the constant-1 heads feature
    bb2 = jnp.asarray(params["b_bil"], jnp.float32).reshape(D, R).T.reshape(1, R * D)
    wrhs = jnp.concatenate([wb2, bb2], axis=0)                  # (D+1, R*D)
    # Head-bias weight with (b_dep + b_head + rel_bias) folded into the constant row.
    cb = (params["b_dep"] + params["b_head"] + params["rel_bias"]).astype(jnp.float32)
    whb = jnp.concatenate([jnp.asarray(params["W_head"], jnp.float32).T,
                           cb.reshape(1, R)], axis=0)           # (D+1, R)
    wd = jnp.asarray(params["W_dep"], jnp.float32)              # (R, D)
    return dict(wrhs=wrhs, whb=whb, wd=wd, n_rel=R, rel_dim=D)


def rel_classifier_bilinear_forward(heads_list, deps_list, packed):
    """Batched forward for the packed-sequence loop of bilinearForParallel.

    heads_list[i]: (l_i, D), deps_list[i]: (l_i, l_i, D).
    Returns a list of (l_i*l_i, R) log-softmax scores (row index = x*l_i + y).
    NOTE: the MyPackedSequence/MyDoublePackedSequence plumbing of the original module is
    emulated by this list-of-arrays wrapper; dropout is an inference-mode identity.
    """
    R = int(packed["n_rel"])
    D = int(packed["rel_dim"])
    lengths = [int(h.shape[0]) for h in heads_list]
    S = len(lengths)
    Lp = _len_bucket(max(lengths))
    B = _sentence_batch(S, Lp, D)
    S_pad = ((S + B - 1) // B) * B

    heads_b = jnp.stack([jnp.pad(jnp.asarray(h, jnp.float32),
                                 ((0, Lp - h.shape[0]), (0, 0)))
                         for h in heads_list])                               # (S, Lp, D)
    deps_b = jnp.stack([jnp.pad(jnp.asarray(d, jnp.float32),
                                ((0, Lp - d.shape[0]), (0, Lp - d.shape[1]), (0, 0)))
                        for d in deps_list])                                 # (S, Lp, Lp, D)
    if S_pad > S:  # dummy zero sentences: grid/out_shape only depend on (S, Lp) buckets
        heads_b = jnp.pad(heads_b, ((0, S_pad - S), (0, 0), (0, 0)))
        deps_b = jnp.pad(deps_b, ((0, S_pad - S), (0, 0), (0, 0), (0, 0)))
    # Constant-1 feature that routes b_bil and the folded scalar biases through the matmuls.
    heads_aug = jnp.concatenate(
        [heads_b, jnp.ones((S_pad, Lp, 1), jnp.float32)], axis=-1)           # (S_pad, Lp, D+1)

    out_b = _rel_forward_padded(heads_aug, deps_b,
                                packed["wrhs"], packed["whb"], packed["wd"], B)

    outs = []
    for i, l in enumerate(lengths):
        score = jnp.transpose(out_b[i, :, :l, :l], (1, 2, 0)).reshape(l * l, R)
        outs.append(score)
    return outs


# --------------------------------------------------------------------------------------
# Pure-JAX reference (replicates the PyTorch forward for one sentence) and params
# --------------------------------------------------------------------------------------
def reference_forward(heads, deps, params):
    L, D = heads.shape
    R = params["rel_bias"].shape[0]
    hb = heads @ params["W_bil"].T + params["b_bil"]            # (L, D*R)
    hb3 = hb.reshape(L, D, R)                                   # view(l, -1, n_rel)
    core_t = jnp.einsum("yxd,ydr->yxr", deps, hb3)              # bmm
    core = jnp.transpose(core_t, (1, 0, 2))                     # .transpose(0, 1)
    depb = deps @ params["W_dep"].T + params["b_dep"]           # (L, L, R)
    hbias = heads @ params["W_head"].T + params["b_head"]       # (L, R)
    score = core + depb + hbias[:, None, :] + params["rel_bias"][None, None, :]
    return jax.nn.log_softmax(score.reshape(L * L, R), axis=-1)


def init_params(key, D, R):
    ks = jax.random.split(key, 7)
    s = 0.1
    return dict(
        W_bil=jax.random.normal(ks[0], (D * R, D), jnp.float32) * s,
        b_bil=jax.random.normal(ks[1], (D * R,), jnp.float32) * s,
        W_head=jax.random.normal(ks[2], (R, D), jnp.float32) * s,
        b_head=jax.random.normal(ks[3], (R,), jnp.float32) * s,
        W_dep=jax.random.normal(ks[4], (R, D), jnp.float32) * s,
        b_dep=jax.random.normal(ks[5], (R,), jnp.float32) * s,
        rel_bias=jax.random.normal(ks[6], (R,), jnp.float32),   # torch.normal(zeros(n_rel))
    )


if __name__ == "__main__":
    D = 32                      # opt.rel_dim
    R = 5                       # n_rel
    lengths = [8, 6, 11, 4]     # packed batch of 4 "sentences" -> one bucket (Lp=16), B=2, grid=2

    key = jax.random.PRNGKey(0)
    pkey, dkey = jax.random.split(key)
    params = init_params(pkey, D, R)
    packed_params = prepack_params(params)          # hoisted: computed once

    data_keys = jax.random.split(dkey, 2 * len(lengths))
    heads_list, deps_list = [], []
    for i, L in enumerate(lengths):
        heads_list.append(jax.random.normal(data_keys[2 * i], (L, D), jnp.float32))
        deps_list.append(jax.random.normal(data_keys[2 * i + 1], (L, L, D), jnp.float32))

    outs = rel_classifier_bilinear_forward(heads_list, deps_list, packed_params)
    outs = [jax.block_until_ready(o) for o in outs]

    for h, d, o in zip(heads_list, deps_list, outs):
        ref = reference_forward(h, d, params)
        np.testing.assert_allclose(np.asarray(o), np.asarray(ref), rtol=5e-4, atol=5e-4)

    # mypack(output, [l**2 for l in ls]) -> concatenated (sum l_i^2, n_rel)
    packed_scores = jnp.concatenate(outs, axis=0)
    jax.block_until_ready(packed_scores)
    print("KERNEL_OK")
</pallas_src>

<mosaic_0001>
module attributes {stable_mosaic.version = 11 : i64} {
  func.func @_rel_kernel(%arg0: i32, %arg1: memref<2x16x33xf32, #tpu.memory_space<vmem>>, %arg2: memref<2x16x16x32xf32, #tpu.memory_space<vmem>>, %arg3: memref<33x160xf32, #tpu.memory_space<vmem>>, %arg4: memref<33x5xf32, #tpu.memory_space<vmem>>, %arg5: memref<5x32xf32, #tpu.memory_space<vmem>>, %arg6: memref<2x5x16x16xf32, #tpu.memory_space<vmem>>, %arg7: memref<16x10x32xf32, #tpu.memory_space<vmem>>) attributes {dimension_semantics = [#tpu.dimension_semantics<parallel>], iteration_bounds = array<i64: 2>, scalar_prefetch = 0 : i64, scratch_operands = 1 : i64, tpu.core_type = #tpu.core_type<tc>, window_params = [{transform_indices = @transform_0, window_bounds = array<i64: 2, 16, 33>}, {transform_indices = @transform_1, window_bounds = array<i64: 2, 16, 16, 32>}, {pipeline_mode = #tpu.pipeline_mode<synchronous>, transform_indices = @transform_2, window_bounds = array<i64: 33, 160>}, {pipeline_mode = #tpu.pipeline_mode<synchronous>, transform_indices = @transform_3, window_bounds = array<i64: 33, 5>}, {pipeline_mode = #tpu.pipeline_mode<synchronous>, transform_indices = @transform_4, window_bounds = array<i64: 5, 32>}, {transform_indices = @transform_5, window_bounds = array<i64: 2, 5, 16, 16>}]} {
    %c0 = arith.constant 0 : index
    %c0_0 = arith.constant 0 : index
    %0 = vector.load %arg5[%c0, %c0_0] : memref<5x32xf32, #tpu.memory_space<vmem>>, vector<5x32xf32>
    %1 = vector.shape_cast %0 : vector<5x32xf32> to vector<1x5x32xf32>
    %2 = vector.broadcast %1 : vector<1x5x32xf32> to vector<16x5x32xf32>
    %c0_1 = arith.constant 0 : index
    %c5 = arith.constant 5 : index
    %c0_2 = arith.constant 0 : index
    %3 = vector.load %arg7[%c0_1, %c5, %c0_2] : memref<16x10x32xf32, #tpu.memory_space<vmem>>, vector<16x5x32xf32>
    tpu.vector_store %arg7[%c0_1, %c5, %c0_2], %2 {strides = array<i32>} : memref<16x10x32xf32, #tpu.memory_space<vmem>>, vector<16x5x32xf32>,
    %c0_3 = arith.constant 0 : index
    %c0_4 = arith.constant 0 : index
    %4 = vector.load %arg3[%c0_3, %c0_4] : memref<33x160xf32, #tpu.memory_space<vmem>>, vector<33x160xf32>
    %c0_5 = arith.constant 0 : index
    %c0_6 = arith.constant 0 : index
    %5 = vector.load %arg4[%c0_5, %c0_6] : memref<33x5xf32, #tpu.memory_space<vmem>>, vector<33x5xf32>
    %c0_7 = arith.constant 0 : index
    %c0_8 = arith.constant 0 : index
    %c0_9 = arith.constant 0 : index
    %6 = vector.load %arg1[%c0_7, %c0_8, %c0_9] : memref<2x16x33xf32, #tpu.memory_space<vmem>>, vector<1x16x33xf32>
    %7 = vector.shape_cast %6 : vector<1x16x33xf32> to vector<16x33xf32>
    %c0_10 = arith.constant 0 : index
    %c0_11 = arith.constant 0 : index
    %c0_12 = arith.constant 0 : index
    %c0_13 = arith.constant 0 : index
    %8 = vector.load %arg2[%c0_10, %c0_11, %c0_12, %c0_13] : memref<2x16x16x32xf32, #tpu.memory_space<vmem>>, vector<1x16x16x32xf32>
    %9 = vector.shape_cast %8 : vector<1x16x16x32xf32> to vector<16x16x32xf32>
    %cst = arith.constant dense<0.000000e+00> : vector<16x160xf32>
    %10 = tpu.matmul %7, %4, %cst {dimension_numbers = #tpu.dot_dimension_numbers<[1], [0], [0], [1], [0, 0, 1, 1], [], []>} : vector<16x33xf32>, vector<33x160xf32>, vector<16x160xf32> -> vector<16x160xf32>
    %11 = vector.extract_strided_slice %10 {offsets = [0, 0], sizes = [16, 32], strides = [1, 1]} : vector<16x160xf32> to vector<16x32xf32>
    %12 = vector.shape_cast %11 : vector<16x32xf32> to vector<16x1x32xf32>
    %c0_14 = arith.constant 0 : index
    %c0_15 = arith.constant 0 : index
    %c0_16 = arith.constant 0 : index
    %13 = vector.load %arg7[%c0_14, %c0_15, %c0_16] : memref<16x10x32xf32, #tpu.memory_space<vmem>>, vector<16x1x32xf32>
    tpu.vector_store %arg7[%c0_14, %c0_15, %c0_16], %12 {strides = array<i32>} : memref<16x10x32xf32, #tpu.memory_space<vmem>>, vector<16x1x32xf32>,
    %14 = vector.extract_strided_slice %10 {offsets = [0, 32], sizes = [16, 32], strides = [1, 1]} : vector<16x160xf32> to vector<16x32xf32>
    %15 = vector.shape_cast %14 : vector<16x32xf32> to vector<16x1x32xf32>
    %c0_17 = arith.constant 0 : index
    %c1 = arith.constant 1 : index
    %c0_18 = arith.constant 0 : index
    %16 = vector.load %arg7[%c0_17, %c1, %c0_18] : memref<16x10x32xf32, #tpu.memory_space<vmem>>, vector<16x1x32xf32>
    tpu.vector_store %arg7[%c0_17, %c1, %c0_18], %15 {strides = array<i32>} : memref<16x10x32xf32, #tpu.memory_space<vmem>>, vector<16x1x32xf32>,
    %17 = vector.extract_strided_slice %10 {offsets = [0, 64], sizes = [16, 32], strides = [1, 1]} : vector<16x160xf32> to vector<16x32xf32>
    %18 = vector.shape_cast %17 : vector<16x32xf32> to vector<16x1x32xf32>
    %c0_19 = arith.constant 0 : index
    %c2 = arith.constant 2 : index
    %c0_20 = arith.constant 0 : index
    %19 = vector.load %arg7[%c0_19, %c2, %c0_20] : memref<16x10x32xf32, #tpu.memory_space<vmem>>, vector<16x1x32xf32>
    tpu.vector_store %arg7[%c0_19, %c2, %c0_20], %18 {strides = array<i32>} : memref<16x10x32xf32, #tpu.memory_space<vmem>>, vector<16x1x32xf32>,
    %20 = vector.extract_strided_slice %10 {offsets = [0, 96], sizes = [16, 32], strides = [1, 1]} : vector<16x160xf32> to vector<16x32xf32>
    %21 = vector.shape_cast %20 : vector<16x32xf32> to vector<16x1x32xf32>
    %c0_21 = arith.constant 0 : index
    %c3 = arith.constant 3 : index
    %c0_22 = arith.constant 0 : index
    %22 = vector.load %arg7[%c0_21, %c3, %c0_22] : memref<16x10x32xf32, #tpu.memory_space<vmem>>, vector<16x1x32xf32>
    tpu.vector_store %arg7[%c0_21, %c3, %c0_22], %21 {strides = array<i32>} : memref<16x10x32xf32, #tpu.memory_space<vmem>>, vector<16x1x32xf32>,
    %23 = vector.extract_strided_slice %10 {offsets = [0, 128], sizes = [16, 32], strides = [1, 1]} : vector<16x160xf32> to vector<16x32xf32>
    %24 = vector.shape_cast %23 : vector<16x32xf32> to vector<16x1x32xf32>
    %c0_23 = arith.constant 0 : index
    %c4 = arith.constant 4 : index
    %c0_24 = arith.constant 0 : index
    %25 = vector.load %arg7[%c0_23, %c4, %c0_24] : memref<16x10x32xf32, #tpu.memory_space<vmem>>, vector<16x1x32xf32>
    tpu.vector_store %arg7[%c0_23, %c4, %c0_24], %24 {strides = array<i32>} : memref<16x10x32xf32, #tpu.memory_space<vmem>>, vector<16x1x32xf32>,
    %cst_25 = arith.constant dense<0.000000e+00> : vector<16x5xf32>
    %26 = tpu.matmul %7, %5, %cst_25 {dimension_numbers = #tpu.dot_dimension_numbers<[1], [0], [0], [1], [0, 0, 1, 1], [], []>} : vector<16x33xf32>, vector<33x5xf32>, vector<16x5xf32> -> vector<16x5xf32>
    %c0_26 = arith.constant 0 : index
    %c0_27 = arith.constant 0 : index
    %c0_28 = arith.constant 0 : index
    %27 = vector.load %arg7[%c0_26, %c0_27, %c0_28] : memref<16x10x32xf32, #tpu.memory_space<vmem>>, vector<16x10x32xf32>
    "tpu.trace_start"() <{level = 10 : i32, message = "icd,ijd->icj"}> : () -> ()
    %cst_29 = arith.constant dense<0.000000e+00> : vector<16x10x16xf32>
    %28 = tpu.matmul %27, %9, %cst_29 {dimension_numbers = #tpu.dot_dimension_numbers<[2], [2], [1], [1], [0, 0, 0, 1, 1, 1], [0], [0]>} : vector<16x10x32xf32>, vector<16x16x32xf32>, vector<16x10x16xf32> -> vector<16x10x16xf32>
    "tpu.trace_stop"() : () -> ()
    %29 = vector.extract_strided_slice %28 {offsets = [0, 0, 0], sizes = [16, 1, 16], strides = [1, 1, 1]} : vector<16x10x16xf32> to vector<16x1x16xf32>
    %30 = vector.shape_cast %29 : vector<16x1x16xf32> to vector<16x16xf32>
    %31 = vector.extract_strided_slice %28 {offsets = [0, 5, 0], sizes = [16, 1, 16], strides = [1, 1, 1]} : vector<16x10x16xf32> to vector<16x1x16xf32>
    %32 = vector.shape_cast %31 : vector<16x1x16xf32> to vector<16x16xf32>
    %33 = tpu.transpose %30, [1, 0] : vector<16x16xf32> -> vector<16x16xf32>
    %34 = arith.addf %33, %32 : vector<16x16xf32>
    %35 = vector.extract_strided_slice %26 {offsets = [0, 0], sizes = [16, 1], strides = [1, 1]} : vector<16x5xf32> to vector<16x1xf32>
    %36 = vector.broadcast %35 : vector<16x1xf32> to vector<16x16xf32>
    %37 = arith.addf %34, %36 : vector<16x16xf32>
    %38 = vector.extract_strided_slice %28 {offsets = [0, 1, 0], sizes = [16, 1, 16], strides = [1, 1, 1]} : vector<16x10x16xf32> to vector<16x1x16xf32>
    %39 = vector.shape_cast %38 : vector<16x1x16xf32> to vector<16x16xf32>
    %40 = vector.extract_strided_slice %28 {offsets = [0, 6, 0], sizes = [16, 1, 16], strides = [1, 1, 1]} : vector<16x10x16xf32> to vector<16x1x16xf32>
    %41 = vector.shape_cast %40 : vector<16x1x16xf32> to vector<16x16xf32>
    %42 = tpu.transpose %39, [1, 0] : vector<16x16xf32> -> vector<16x16xf32>
    %43 = arith.addf %42, %41 : vector<16x16xf32>
    %44 = vector.extract_strided_slice %26 {offsets = [0, 1], sizes = [16, 1], strides = [1, 1]} : vector<16x5xf32> to vector<16x1xf32>
    %45 = vector.broadcast %44 : vector<16x1xf32> to vector<16x16xf32>
    %46 = arith.addf %43, %45 : vector<16x16xf32>
    %47 = vector.extract_strided_slice %28 {offsets = [0, 2, 0], sizes = [16, 1, 16], strides = [1, 1, 1]} : vector<16x10x16xf32> to vector<16x1x16xf32>
    %48 = vector.shape_cast %47 : vector<16x1x16xf32> to vector<16x16xf32>
    %49 = vector.extract_strided_slice %28 {offsets = [0, 7, 0], sizes = [16, 1, 16], strides = [1, 1, 1]} : vector<16x10x16xf32> to vector<16x1x16xf32>
    %50 = vector.shape_cast %49 : vector<16x1x16xf32> to vector<16x16xf32>
    %51 = tpu.transpose %48, [1, 0] : vector<16x16xf32> -> vector<16x16xf32>
    %52 = arith.addf %51, %50 : vector<16x16xf32>
    %53 = vector.extract_strided_slice %26 {offsets = [0, 2], sizes = [16, 1], strides = [1, 1]} : vector<16x5xf32> to vector<16x1xf32>
    %54 = vector.broadcast %53 : vector<16x1xf32> to vector<16x16xf32>
    %55 = arith.addf %52, %54 : vector<16x16xf32>
    %56 = vector.extract_strided_slice %28 {offsets = [0, 3, 0], sizes = [16, 1, 16], strides = [1, 1, 1]} : vector<16x10x16xf32> to vector<16x1x16xf32>
    %57 = vector.shape_cast %56 : vector<16x1x16xf32> to vector<16x16xf32>
    %58 = vector.extract_strided_slice %28 {offsets = [0, 8, 0], sizes = [16, 1, 16], strides = [1, 1, 1]} : vector<16x10x16xf32> to vector<16x1x16xf32>
    %59 = vector.shape_cast %58 : vector<16x1x16xf32> to vector<16x16xf32>
    %60 = tpu.transpose %57, [1, 0] : vector<16x16xf32> -> vector<16x16xf32>
    %61 = arith.addf %60, %59 : vector<16x16xf32>
    %62 = vector.extract_strided_slice %26 {offsets = [0, 3], sizes = [16, 1], strides = [1, 1]} : vector<16x5xf32> to vector<16x1xf32>
    %63 = vector.broadcast %62 : vector<16x1xf32> to vector<16x16xf32>
    %64 = arith.addf %61, %63 : vector<16x16xf32>
    %65 = vector.extract_strided_slice %28 {offsets = [0, 4, 0], sizes = [16, 1, 16], strides = [1, 1, 1]} : vector<16x10x16xf32> to vector<16x1x16xf32>
    %66 = vector.shape_cast %65 : vector<16x1x16xf32> to vector<16x16xf32>
    %67 = vector.extract_strided_slice %28 {offsets = [0, 9, 0], sizes = [16, 1, 16], strides = [1, 1, 1]} : vector<16x10x16xf32> to vector<16x1x16xf32>
    %68 = vector.shape_cast %67 : vector<16x1x16xf32> to vector<16x16xf32>
    %69 = tpu.transpose %66, [1, 0] : vector<16x16xf32> -> vector<16x16xf32>
    %70 = arith.addf %69, %68 : vector<16x16xf32>
    %71 = vector.extract_strided_slice %26 {offsets = [0, 4], sizes = [16, 1], strides = [1, 1]} : vector<16x5xf32> to vector<16x1xf32>
    %72 = vector.broadcast %71 : vector<16x1xf32> to vector<16x16xf32>
    %73 = arith.addf %70, %72 : vector<16x16xf32>
    %74 = arith.maximumf %37, %46 : vector<16x16xf32>
    %75 = arith.maximumf %74, %55 : vector<16x16xf32>
    %76 = arith.maximumf %75, %64 : vector<16x16xf32>
    %77 = arith.maximumf %76, %73 : vector<16x16xf32>
    %78 = arith.subf %37, %77 : vector<16x16xf32>
    %79 = math.exp %78 : vector<16x16xf32>
    %80 = arith.subf %46, %77 : vector<16x16xf32>
    %81 = math.exp %80 : vector<16x16xf32>
    %82 = arith.addf %79, %81 : vector<16x16xf32>
    %83 = arith.subf %55, %77 : vector<16x16xf32>
    %84 = math.exp %83 : vector<16x16xf32>
    %85 = arith.addf %82, %84 : vector<16x16xf32>
    %86 = arith.subf %64, %77 : vector<16x16xf32>
    %87 = math.exp %86 : vector<16x16xf32>
    %88 = arith.addf %85, %87 : vector<16x16xf32>
    %89 = arith.subf %73, %77 : vector<16x16xf32>
    %90 = math.exp %89 : vector<16x16xf32>
    %91 = arith.addf %88, %90 : vector<16x16xf32>
    %92 = math.log %91 : vector<16x16xf32>
    %93 = arith.subf %37, %77 : vector<16x16xf32>
    %94 = arith.subf %93, %92 : vector<16x16xf32>
    %c0_30 = arith.constant 0 : index
    %c0_31 = arith.constant 0 : index
    %c0_32 = arith.constant 0 : index
    %c0_33 = arith.constant 0 : index
    %95 = vector.load %arg6[%c0_30, %c0_31, %c0_32, %c0_33] : memref<2x5x16x16xf32, #tpu.memory_space<vmem>>, vector<1x1x16x16xf32>
    %96 = vector.shape_cast %95 : vector<1x1x16x16xf32> to vector<16x16xf32>
    %97 = vector.shape_cast %94 : vector<16x16xf32> to vector<1x1x16x16xf32>
    tpu.vector_store %arg6[%c0_30, %c0_31, %c0_32, %c0_33], %97 {strides = array<i32>} : memref<2x5x16x16xf32, #tpu.memory_space<vmem>>, vector<1x1x16x16xf32>,
    %98 = arith.subf %46, %77 : vector<16x16xf32>
    %99 = arith.subf %98, %92 : vector<16x16xf32>
    %c0_34 = arith.constant 0 : index
    %c1_35 = arith.constant 1 : index
    %c0_36 = arith.constant 0 : index
    %c0_37 = arith.constant 0 : index
    %100 = vector.load %arg6[%c0_34, %c1_35, %c0_36, %c0_37] : memref<2x5x16x16xf32, #tpu.memory_space<vmem>>, vector<1x1x16x16xf32>
    %101 = vector.shape_cast %100 : vector<1x1x16x16xf32> to vector<16x16xf32>
    %102 = vector.shape_cast %99 : vector<16x16xf32> to vector<1x1x16x16xf32>
    tpu.vector_store %arg6[%c0_34, %c1_35, %c0_36, %c0_37], %102 {strides = array<i32>} : memref<2x5x16x16xf32, #tpu.memory_space<vmem>>, vector<1x1x16x16xf32>,
    %103 = arith.subf %55, %77 : vector<16x16xf32>
    %104 = arith.subf %103, %92 : vector<16x16xf32>
    %c0_38 = arith.constant 0 : index
    %c2_39 = arith.constant 2 : index
    %c0_40 = arith.constant 0 : index
    %c0_41 = arith.constant 0 : index
    %105 = vector.load %arg6[%c0_38, %c2_39, %c0_40, %c0_41] : memref<2x5x16x16xf32, #tpu.memory_space<vmem>>, vector<1x1x16x16xf32>
    %106 = vector.shape_cast %105 : vector<1x1x16x16xf32> to vector<16x16xf32>
    %107 = vector.shape_cast %104 : vector<16x16xf32> to vector<1x1x16x16xf32>
    tpu.vector_store %arg6[%c0_38, %c2_39, %c0_40, %c0_41], %107 {strides = array<i32>} : memref<2x5x16x16xf32, #tpu.memory_space<vmem>>, vector<1x1x16x16xf32>,
    %108 = arith.subf %64, %77 : vector<16x16xf32>
    %109 = arith.subf %108, %92 : vector<16x16xf32>
    %c0_42 = arith.constant 0 : index
    %c3_43 = arith.constant 3 : index
    %c0_44 = arith.constant 0 : index
    %c0_45 = arith.constant 0 : index
    %110 = vector.load %arg6[%c0_42, %c3_43, %c0_44, %c0_45] : memref<2x5x16x16xf32, #tpu.memory_space<vmem>>, vector<1x1x16x16xf32>
    %111 = vector.shape_cast %110 : vector<1x1x16x16xf32> to vector<16x16xf32>
    %112 = vector.shape_cast %109 : vector<16x16xf32> to vector<1x1x16x16xf32>
    tpu.vector_store %arg6[%c0_42, %c3_43, %c0_44, %c0_45], %112 {strides = array<i32>} : memref<2x5x16x16xf32, #tpu.memory_space<vmem>>, vector<1x1x16x16xf32>,
    %113 = arith.subf %73, %77 : vector<16x16xf32>
    %114 = arith.subf %113, %92 : vector<16x16xf32>
    %c0_46 = arith.constant 0 : index
    %c4_47 = arith.constant 4 : index
    %c0_48 = arith.constant 0 : index
    %c0_49 = arith.constant 0 : index
    %115 = vector.load %arg6[%c0_46, %c4_47, %c0_48, %c0_49] : memref<2x5x16x16xf32, #tpu.memory_space<vmem>>, vector<1x1x16x16xf32>
    %116 = vector.shape_cast %115 : vector<1x1x16x16xf32> to vector<16x16xf32>
    %117 = vector.shape_cast %114 : vector<16x16xf32> to vector<1x1x16x16xf32>
    tpu.vector_store %arg6[%c0_46, %c4_47, %c0_48, %c0_49], %117 {strides = array<i32>} : memref<2x5x16x16xf32, #tpu.memory_space<vmem>>, vector<1x1x16x16xf32>,
    %c1_50 = arith.constant 1 : index
    %c0_51 = arith.constant 0 : index
    %c0_52 = arith.constant 0 : index
    %118 = vector.load %arg1[%c1_50, %c0_51, %c0_52] : memref<2x16x33xf32, #tpu.memory_space<vmem>>, vector<1x16x33xf32>
    %119 = vector.shape_cast %118 : vector<1x16x33xf32> to vector<16x33xf32>
    %c1_53 = arith.constant 1 : index
    %c0_54 = arith.constant 0 : index
    %c0_55 = arith.constant 0 : index
    %c0_56 = arith.constant 0 : index
    %120 = vector.load %arg2[%c1_53, %c0_54, %c0_55, %c0_56] : memref<2x16x16x32xf32, #tpu.memory_space<vmem>>, vector<1x16x16x32xf32>
    %121 = vector.shape_cast %120 : vector<1x16x16x32xf32> to vector<16x16x32xf32>
    %cst_57 = arith.constant dense<0.000000e+00> : vector<16x160xf32>
    %122 = tpu.matmul %119, %4, %cst_57 {dimension_numbers = #tpu.dot_dimension_numbers<[1], [0], [0], [1], [0, 0, 1, 1], [], []>} : vector<16x33xf32>, vector<33x160xf32>, vector<16x160xf32> -> vector<16x160xf32>
    %123 = vector.extract_strided_slice %122 {offsets = [0, 0], sizes = [16, 32], strides = [1, 1]} : vector<16x160xf32> to vector<16x32xf32>
    %124 = vector.shape_cast %123 : vector<16x32xf32> to vector<16x1x32xf32>
    %c0_58 = arith.constant 0 : index
    %c0_59 = arith.constant 0 : index
    %c0_60 = arith.constant 0 : index
    %125 = vector.load %arg7[%c0_58, %c0_59, %c0_60] : memref<16x10x32xf32, #tpu.memory_space<vmem>>, vector<16x1x32xf32>
    tpu.vector_store %arg7[%c0_58, %c0_59, %c0_60], %124 {strides = array<i32>} : memref<16x10x32xf32, #tpu.memory_space<vmem>>, vector<16x1x32xf32>,
    %126 = vector.extract_strided_slice %122 {offsets = [0, 32], sizes = [16, 32], strides = [1, 1]} : vector<16x160xf32> to vector<16x32xf32>
    %127 = vector.shape_cast %126 : vector<16x32xf32> to vector<16x1x32xf32>
    %c0_61 = arith.constant 0 : index
    %c1_62 = arith.constant 1 : index
    %c0_63 = arith.constant 0 : index
    %128 = vector.load %arg7[%c0_61, %c1_62, %c0_63] : memref<16x10x32xf32, #tpu.memory_space<vmem>>, vector<16x1x32xf32>
    tpu.vector_store %arg7[%c0_61, %c1_62, %c0_63], %127 {strides = array<i32>} : memref<16x10x32xf32, #tpu.memory_space<vmem>>, vector<16x1x32xf32>,
    %129 = vector.extract_strided_slice %122 {offsets = [0, 64], sizes = [16, 32], strides = [1, 1]} : vector<16x160xf32> to vector<16x32xf32>
    %130 = vector.shape_cast %129 : vector<16x32xf32> to vector<16x1x32xf32>
    %c0_64 = arith.constant 0 : index
    %c2_65 = arith.constant 2 : index
    %c0_66 = arith.constant 0 : index
    %131 = vector.load %arg7[%c0_64, %c2_65, %c0_66] : memref<16x10x32xf32, #tpu.memory_space<vmem>>, vector<16x1x32xf32>
    tpu.vector_store %arg7[%c0_64, %c2_65, %c0_66], %130 {strides = array<i32>} : memref<16x10x32xf32, #tpu.memory_space<vmem>>, vector<16x1x32xf32>,
    %132 = vector.extract_strided_slice %122 {offsets = [0, 96], sizes = [16, 32], strides = [1, 1]} : vector<16x160xf32> to vector<16x32xf32>
    %133 = vector.shape_cast %132 : vector<16x32xf32> to vector<16x1x32xf32>
    %c0_67 = arith.constant 0 : index
    %c3_68 = arith.constant 3 : index
    %c0_69 = arith.constant 0 : index
    %134 = vector.load %arg7[%c0_67, %c3_68, %c0_69] : memref<16x10x32xf32, #tpu.memory_space<vmem>>, vector<16x1x32xf32>
    tpu.vector_store %arg7[%c0_67, %c3_68, %c0_69], %133 {strides = array<i32>} : memref<16x10x32xf32, #tpu.memory_space<vmem>>, vector<16x1x32xf32>,
    %135 = vector.extract_strided_slice %122 {offsets = [0, 128], sizes = [16, 32], strides = [1, 1]} : vector<16x160xf32> to vector<16x32xf32>
    %136 = vector.shape_cast %135 : vector<16x32xf32> to vector<16x1x32xf32>
    %c0_70 = arith.constant 0 : index
    %c4_71 = arith.constant 4 : index
    %c0_72 = arith.constant 0 : index
    %137 = vector.load %arg7[%c0_70, %c4_71, %c0_72] : memref<16x10x32xf32, #tpu.memory_space<vmem>>, vector<16x1x32xf32>
    tpu.vector_store %arg7[%c0_70, %c4_71, %c0_72], %136 {strides = array<i32>} : memref<16x10x32xf32, #tpu.memory_space<vmem>>, vector<16x1x32xf32>,
    %cst_73 = arith.constant dense<0.000000e+00> : vector<16x5xf32>
    %138 = tpu.matmul %119, %5, %cst_73 {dimension_numbers = #tpu.dot_dimension_numbers<[1], [0], [0], [1], [0, 0, 1, 1], [], []>} : vector<16x33xf32>, vector<33x5xf32>, vector<16x5xf32> -> vector<16x5xf32>
    %c0_74 = arith.constant 0 : index
    %c0_75 = arith.constant 0 : index
    %c0_76 = arith.constant 0 : index
    %139 = vector.load %arg7[%c0_74, %c0_75, %c0_76] : memref<16x10x32xf32, #tpu.memory_space<vmem>>, vector<16x10x32xf32>
    "tpu.trace_start"() <{level = 10 : i32, message = "icd,ijd->icj"}> : () -> ()
    %cst_77 = arith.constant dense<0.000000e+00> : vector<16x10x16xf32>
    %140 = tpu.matmul %139, %121, %cst_77 {dimension_numbers = #tpu.dot_dimension_numbers<[2], [2], [1], [1], [0, 0, 0, 1, 1, 1], [0], [0]>} : vector<16x10x32xf32>, vector<16x16x32xf32>, vector<16x10x16xf32> -> vector<16x10x16xf32>
    "tpu.trace_stop"() : () -> ()
    %141 = vector.extract_strided_slice %140 {offsets = [0, 0, 0], sizes = [16, 1, 16], strides = [1, 1, 1]} : vector<16x10x16xf32> to vector<16x1x16xf32>
    %142 = vector.shape_cast %141 : vector<16x1x16xf32> to vector<16x16xf32>
    %143 = vector.extract_strided_slice %140 {offsets = [0, 5, 0], sizes = [16, 1, 16], strides = [1, 1, 1]} : vector<16x10x16xf32> to vector<16x1x16xf32>
    %144 = vector.shape_cast %143 : vector<16x1x16xf32> to vector<16x16xf32>
    %145 = tpu.transpose %142, [1, 0] : vector<16x16xf32> -> vector<16x16xf32>
    %146 = arith.addf %145, %144 : vector<16x16xf32>
    %147 = vector.extract_strided_slice %138 {offsets = [0, 0], sizes = [16, 1], strides = [1, 1]} : vector<16x5xf32> to vector<16x1xf32>
    %148 = vector.broadcast %147 : vector<16x1xf32> to vector<16x16xf32>
    %149 = arith.addf %146, %148 : vector<16x16xf32>
    %150 = vector.extract_strided_slice %140 {offsets = [0, 1, 0], sizes = [16, 1, 16], strides = [1, 1, 1]} : vector<16x10x16xf32> to vector<16x1x16xf32>
    %151 = vector.shape_cast %150 : vector<16x1x16xf32> to vector<16x16xf32>
    %152 = vector.extract_strided_slice %140 {offsets = [0, 6, 0], sizes = [16, 1, 16], strides = [1, 1, 1]} : vector<16x10x16xf32> to vector<16x1x16xf32>
    %153 = vector.shape_cast %152 : vector<16x1x16xf32> to vector<16x16xf32>
    %154 = tpu.transpose %151, [1, 0] : vector<16x16xf32> -> vector<16x16xf32>
    %155 = arith.addf %154, %153 : vector<16x16xf32>
    %156 = vector.extract_strided_slice %138 {offsets = [0, 1], sizes = [16, 1], strides = [1, 1]} : vector<16x5xf32> to vector<16x1xf32>
    %157 = vector.broadcast %156 : vector<16x1xf32> to vector<16x16xf32>
    %158 = arith.addf %155, %157 : vector<16x16xf32>
    %159 = vector.extract_strided_slice %140 {offsets = [0, 2, 0], sizes = [16, 1, 16], strides = [1, 1, 1]} : vector<16x10x16xf32> to vector<16x1x16xf32>
    %160 = vector.shape_cast %159 : vector<16x1x16xf32> to vector<16x16xf32>
    %161 = vector.extract_strided_slice %140 {offsets = [0, 7, 0], sizes = [16, 1, 16], strides = [1, 1, 1]} : vector<16x10x16xf32> to vector<16x1x16xf32>
    %162 = vector.shape_cast %161 : vector<16x1x16xf32> to vector<16x16xf32>
    %163 = tpu.transpose %160, [1, 0] : vector<16x16xf32> -> vector<16x16xf32>
    %164 = arith.addf %163, %162 : vector<16x16xf32>
    %165 = vector.extract_strided_slice %138 {offsets = [0, 2], sizes = [16, 1], strides = [1, 1]} : vector<16x5xf32> to vector<16x1xf32>
    %166 = vector.broadcast %165 : vector<16x1xf32> to vector<16x16xf32>
    %167 = arith.addf %164, %166 : vector<16x16xf32>
    %168 = vector.extract_strided_slice %140 {offsets = [0, 3, 0], sizes = [16, 1, 16], strides = [1, 1, 1]} : vector<16x10x16xf32> to vector<16x1x16xf32>
    %169 = vector.shape_cast %168 : vector<16x1x16xf32> to vector<16x16xf32>
    %170 = vector.extract_strided_slice %140 {offsets = [0, 8, 0], sizes = [16, 1, 16], strides = [1, 1, 1]} : vector<16x10x16xf32> to vector<16x1x16xf32>
    %171 = vector.shape_cast %170 : vector<16x1x16xf32> to vector<16x16xf32>
    %172 = tpu.transpose %169, [1, 0] : vector<16x16xf32> -> vector<16x16xf32>
    %173 = arith.addf %172, %171 : vector<16x16xf32>
    %174 = vector.extract_strided_slice %138 {offsets = [0, 3], sizes = [16, 1], strides = [1, 1]} : vector<16x5xf32> to vector<16x1xf32>
    %175 = vector.broadcast %174 : vector<16x1xf32> to vector<16x16xf32>
    %176 = arith.addf %173, %175 : vector<16x16xf32>
    %177 = vector.extract_strided_slice %140 {offsets = [0, 4, 0], sizes = [16, 1, 16], strides = [1, 1, 1]} : vector<16x10x16xf32> to vector<16x1x16xf32>
    %178 = vector.shape_cast %177 : vector<16x1x16xf32> to vector<16x16xf32>
    %179 = vector.extract_strided_slice %140 {offsets = [0, 9, 0], sizes = [16, 1, 16], strides = [1, 1, 1]} : vector<16x10x16xf32> to vector<16x1x16xf32>
    %180 = vector.shape_cast %179 : vector<16x1x16xf32> to vector<16x16xf32>
    %181 = tpu.transpose %178, [1, 0] : vector<16x16xf32> -> vector<16x16xf32>
    %182 = arith.addf %181, %180 : vector<16x16xf32>
    %183 = vector.extract_strided_slice %138 {offsets = [0, 4], sizes = [16, 1], strides = [1, 1]} : vector<16x5xf32> to vector<16x1xf32>
    %184 = vector.broadcast %183 : vector<16x1xf32> to vector<16x16xf32>
    %185 = arith.addf %182, %184 : vector<16x16xf32>
    %186 = arith.maximumf %149, %158 : vector<16x16xf32>
    %187 = arith.maximumf %186, %167 : vector<16x16xf32>
    %188 = arith.maximumf %187, %176 : vector<16x16xf32>
    %189 = arith.maximumf %188, %185 : vector<16x16xf32>
    %190 = arith.subf %149, %189 : vector<16x16xf32>
    %191 = math.exp %190 : vector<16x16xf32>
    %192 = arith.subf %158, %189 : vector<16x16xf32>
    %193 = math.exp %192 : vector<16x16xf32>
    %194 = arith.addf %191, %193 : vector<16x16xf32>
    %195 = arith.subf %167, %189 : vector<16x16xf32>
    %196 = math.exp %195 : vector<16x16xf32>
    %197 = arith.addf %194, %196 : vector<16x16xf32>
    %198 = arith.subf %176, %189 : vector<16x16xf32>
    %199 = math.exp %198 : vector<16x16xf32>
    %200 = arith.addf %197, %199 : vector<16x16xf32>
    %201 = arith.subf %185, %189 : vector<16x16xf32>
    %202 = math.exp %201 : vector<16x16xf32>
    %203 = arith.addf %200, %202 : vector<16x16xf32>
    %204 = math.log %203 : vector<16x16xf32>
    %205 = arith.subf %149, %189 : vector<16x16xf32>
    %206 = arith.subf %205, %204 : vector<16x16xf32>
    %c1_78 = arith.constant 1 : index
    %c0_79 = arith.constant 0 : index
    %c0_80 = arith.constant 0 : index
    %c0_81 = arith.constant 0 : index
    %207 = vector.load %arg6[%c1_78, %c0_79, %c0_80, %c0_81] : memref<2x5x16x16xf32, #tpu.memory_space<vmem>>, vector<1x1x16x16xf32>
    %208 = vector.shape_cast %207 : vector<1x1x16x16xf32> to vector<16x16xf32>
    %209 = vector.shape_cast %206 : vector<16x16xf32> to vector<1x1x16x16xf32>
    tpu.vector_store %arg6[%c1_78, %c0_79, %c0_80, %c0_81], %209 {strides = array<i32>} : memref<2x5x16x16xf32, #tpu.memory_space<vmem>>, vector<1x1x16x16xf32>,
    %210 = arith.subf %158, %189 : vector<16x16xf32>
    %211 = arith.subf %210, %204 : vector<16x16xf32>
    %c1_82 = arith.constant 1 : index
    %c1_83 = arith.constant 1 : index
    %c0_84 = arith.constant 0 : index
    %c0_85 = arith.constant 0 : index
    %212 = vector.load %arg6[%c1_82, %c1_83, %c0_84, %c0_85] : memref<2x5x16x16xf32, #tpu.memory_space<vmem>>, vector<1x1x16x16xf32>
    %213 = vector.shape_cast %212 : vector<1x1x16x16xf32> to vector<16x16xf32>
    %214 = vector.shape_cast %211 : vector<16x16xf32> to vector<1x1x16x16xf32>
    tpu.vector_store %arg6[%c1_82, %c1_83, %c0_84, %c0_85], %214 {strides = array<i32>} : memref<2x5x16x16xf32, #tpu.memory_space<vmem>>, vector<1x1x16x16xf32>,
    %215 = arith.subf %167, %189 : vector<16x16xf32>
    %216 = arith.subf %215, %204 : vector<16x16xf32>
    %c1_86 = arith.constant 1 : index
    %c2_87 = arith.constant 2 : index
    %c0_88 = arith.constant 0 : index
    %c0_89 = arith.constant 0 : index
    %217 = vector.load %arg6[%c1_86, %c2_87, %c0_88, %c0_89] : memref<2x5x16x16xf32, #tpu.memory_space<vmem>>, vector<1x1x16x16xf32>
    %218 = vector.shape_cast %217 : vector<1x1x16x16xf32> to vector<16x16xf32>
    %219 = vector.shape_cast %216 : vector<16x16xf32> to vector<1x1x16x16xf32>
    tpu.vector_store %arg6[%c1_86, %c2_87, %c0_88, %c0_89], %219 {strides = array<i32>} : memref<2x5x16x16xf32, #tpu.memory_space<vmem>>, vector<1x1x16x16xf32>,
    %220 = arith.subf %176, %189 : vector<16x16xf32>
    %221 = arith.subf %220, %204 : vector<16x16xf32>
    %c1_90 = arith.constant 1 : index
    %c3_91 = arith.constant 3 : index
    %c0_92 = arith.constant 0 : index
    %c0_93 = arith.constant 0 : index
    %222 = vector.load %arg6[%c1_90, %c3_91, %c0_92, %c0_93] : memref<2x5x16x16xf32, #tpu.memory_space<vmem>>, vector<1x1x16x16xf32>
    %223 = vector.shape_cast %222 : vector<1x1x16x16xf32> to vector<16x16xf32>
    %224 = vector.shape_cast %221 : vector<16x16xf32> to vector<1x1x16x16xf32>
    tpu.vector_store %arg6[%c1_90, %c3_91, %c0_92, %c0_93], %224 {strides = array<i32>} : memref<2x5x16x16xf32, #tpu.memory_space<vmem>>, vector<1x1x16x16xf32>,
    %225 = arith.subf %185, %189 : vector<16x16xf32>
    %226 = arith.subf %225, %204 : vector<16x16xf32>
    %c1_94 = arith.constant 1 : index
    %c4_95 = arith.constant 4 : index
    %c0_96 = arith.constant 0 : index
    %c0_97 = arith.constant 0 : index
    %227 = vector.load %arg6[%c1_94, %c4_95, %c0_96, %c0_97] : memref<2x5x16x16xf32, #tpu.memory_space<vmem>>, vector<1x1x16x16xf32>
    %228 = vector.shape_cast %227 : vector<1x1x16x16xf32> to vector<16x16xf32>
    %229 = vector.shape_cast %226 : vector<16x16xf32> to vector<1x1x16x16xf32>
    tpu.vector_store %arg6[%c1_94, %c4_95, %c0_96, %c0_97], %229 {strides = array<i32>} : memref<2x5x16x16xf32, #tpu.memory_space<vmem>>, vector<1x1x16x16xf32>,
    return
  }
  func.func @transform_0(%arg0: i32) -> (i32, i32, i32) {
    %c0_i32 = arith.constant 0 : i32
    %c0_i32_0 = arith.constant 0 : i32
    %c0_i32_1 = arith.constant 0 : i32
    return %arg0, %c0_i32, %c0_i32_0 : i32, i32, i32
  }
  func.func @transform_1(%arg0: i32) -> (i32, i32, i32, i32) {
    %c0_i32 = arith.constant 0 : i32
    %c0_i32_0 = arith.constant 0 : i32
    %c0_i32_1 = arith.constant 0 : i32
    %c0_i32_2 = arith.constant 0 : i32
    return %arg0, %c0_i32, %c0_i32_0, %c0_i32_1 : i32, i32, i32, i32
  }
  func.func @transform_2(%arg0: i32) -> (i32, i32) {
    %c0_i32 = arith.constant 0 : i32
    %c0_i32_0 = arith.constant 0 : i32
    %c0_i32_1 = arith.constant 0 : i32
    return %c0_i32, %c0_i32_0 : i32, i32
  }
  func.func @transform_3(%arg0: i32) -> (i32, i32) {
    %c0_i32 = arith.constant 0 : i32
    %c0_i32_0 = arith.constant 0 : i32
    %c0_i32_1 = arith.constant 0 : i32
    return %c0_i32, %c0_i32_0 : i32, i32
  }
  func.func @transform_4(%arg0: i32) -> (i32, i32) {
    %c0_i32 = arith.constant 0 : i32
    %c0_i32_0 = arith.constant 0 : i32
    %c0_i32_1 = arith.constant 0 : i32
    return %c0_i32, %c0_i32_0 : i32, i32
  }
  func.func @transform_5(%arg0: i32) -> (i32, i32, i32, i32) {
    %c0_i32 = arith.constant 0 : i32
    %c0_i32_0 = arith.constant 0 : i32
    %c0_i32_1 = arith.constant 0 : i32
    %c0_i32_2 = arith.constant 0 : i32
    return %arg0, %c0_i32, %c0_i32_0, %c0_i32_1 : i32, i32, i32, i32
  }
}

</mosaic_0001>

<bundles_post_ra>
// kernel: tpu_custom_call.1
= control target key start
LH: loop header
LB: loop body
LE: loop exit
PB: predicated region body
PF: predicated region fallthrough
CT: control target
= control target key end

     0   :  { %s6144_s0 = inlined_call_operand.hbm [shape: f32[4,16,33], index: 0, kind: input, shape index: {}]   ;;  %s6145_s1 = inlined_call_operand.hbm [shape: f32[4,16,16,32], index: 1, kind: input, shape index: {}]   ;;  %s6146_s2 = inlined_call_operand.hbm [shape: f32[33,160], index: 2, kind: input, shape index: {}]   ;;  %s6147_s3 = inlined_call_operand.vmem [shape: f32[33,5], index: 3, kind: input, shape index: {}]   ;;  %s6148_s4 = inlined_call_operand.vmem [shape: f32[5,32], index: 4, kind: input, shape index: {}]   ;;  %s6149_s5 = inlined_call_operand.hbm [shape: f32[4,5,16,16], index: 5, kind: output, shape index: {}]  }
   0x1   :  { %6156 = sst [smem:[#allocation25_spill]] %s6144_s0 }
   0x2   :  { %6157 = sst [smem:[#allocation26_spill]] %s6146_s2 }
   0x3   :  { %10 = vsyncpa [#allocation4], 0 }
   0x4   :  { %12 = vsyncpa [#allocation4 + $0x1], 0 }
   0x5   :  { %13 = vsyncpa [#allocation7], 0 }
   0x6   :  { %15 = vsyncpa [#allocation7 + $0x1], 0 }
   0x7   :  { %16 = vsyncpa [#allocation5], 0 }
   0x8   :  { %18 = vsyncpa [#allocation5 + $0x1], 0  ;;  %s4326_s18 = smov 0   ;;  %s4328_s19 = smov 0  }
   0x9   :  { %s4330_s20 = smov 0   ;;  %s4332_s21 = smov 0  }
   0xa LB: > { %6158 = sst [smem:[#allocation14_spill]] %s4275_s20  ;;  %s4347_s22 = sadd.s32 4294967295, %s4279_s21   ;;  %s4279_s21 = sphi %s4332_s21, %s6194_s21   ;;  %s4275_s20 = sphi %s4330_s20, %s6196_s20   ;;  %s4271_s19 = sphi %s4328_s19, %s6198_s19   ;;  %s4267_s18 = sphi %s4326_s18, %s6197_s18  }
   0xb   : > { %s3745_s23 = sadd.s32 4294967294, %s4279_s21   ;;  %p44_p0 = scmp.ne.s32.totalorder %s4271_s19, %s4267_s18 }
   0xc   : > { %p45_p1 = scmp.eq.s32.totalorder %s4347_s22, 0  ;;  %p157_p2 = scmp.eq.s32.totalorder %s4347_s22, 1 }
   0xd   : > { %p163_p3 = scmp.eq.s32.totalorder %s3745_s23, 1  ;;  %p3746_p5 = scmp.ge.s32.totalorder %s4279_s21, 1 }
   0xe   : > { %p4356_p4 = por %p45_p1, %p44_p0  ;;  %p170_p7 = scmp.lt.s32.totalorder %s4279_s21, 3 }
   0xf   : > { %p4361_p6 = por %p163_p3, %p44_p0  ;;  %s6161_s2 = sld [smem:[#allocation26_spill]] }
  0x10   : > { %p4369_p8 = pnand %p3746_p5, %p170_p7  ;;  %s4281_s30 = smov [#allocation8]  }
  0x11   : > { %s183_s6 = sshll.u32 %s4281_s30, 4  ;;  %s4379_s7 = sadd.s32 1, %s4279_s21   ;;  %s184_s6 = int_to_ptr.vmem [resolvable:$true] %s183_s6 }
  0x12   : > { %p3984_p9 = pneg %p4369_p8  ;;  %6163 = sst [smem:[#allocation15_spill]] %s4379_s7 }
  0x13   : > { %s4282_s8 = smov 256   ;;  %s4283_s9 = smov 16  }
  0x14   : > { %p3985_p10 = pnand %p3984_p9, %p45_p1  ;;  %s28_s10 = ssub.s32 %s4279_s21, %s4379_s7 }
  0x15   : > { %s181_s28 = sshll.u32 %s6161_s2, 4  ;;  %s31_s11 = sadd.s32 1, %s4275_s20  ;;  %s182_s28 = int_to_ptr.hbm [resolvable:$true] %s181_s28 }
  0x16   : > { %3987 = dma.hbm_to_vmem [thread:$0]  (!%p3985_p10), %s182_s28, 1280, %s184_s6, [#allocation7], %s4282_s8, %s4282_s8, %s4283_s9  }
  0x17   : > { %p29_p12 = scmp.eq.s32.totalorder %s28_s10, 0  ;;  %p38_p13 = scmp.ne.s32.totalorder %s4275_s20, %s4271_s19 }
  0x18   : > { %p39_p0 = scmp.eq.s32.totalorder %s4279_s21, 0  ;;  %p4000_p3 = scmp.lt.s32.totalorder %s4279_s21, 2 }
  0x19   : > { %s4389_s12 = scalar_select %p29_p12, %s4275_s20, %s31_s11  }
  0x1a   : > { %p40_p5 = por %p39_p0, %p38_p13  ;;  %p4393_p7 = por %p157_p2, %p38_p13 }
  0x1b   : > { %6164 = sst [smem:[#allocation16_spill]] %s4389_s12  ;;  %s4398_s14 = sand.u32 1, %s4275_s20  }
  0x1c   : > { %s3965_s15 = sshll.u32 %s4279_s21, 5  ;;  %s3749_s16 = sshll.u32 %s4398_s14, 5 }
  0x1d   : > { %s6166_s0 = sld [smem:[#allocation25_spill]]  ;;  %s207_s28 = scalar_lea.vmem [#allocation3], %s3749_s16 }
  0x1e   : > { %s216_s30 = sshll.u32 %s207_s28, 4  ;;  %p4407_p2 = pnand %p4000_p3, %p40_p5  ;;  %s217_s30 = int_to_ptr.vmem [resolvable:$true] %s216_s30 }
  0x1f   : > { %s226_s8 = sand.u32 1, %s4279_s21   ;;  %s204_s9 = scalar_lea.sflag [#allocation4], %s4398_s14 }
  0x20   : > { %p4149_p10 = pneg %p4407_p2 }
  0x23   : > { %s213_s26 = scalar_lea.hbm %s6166_s0, %s3965_s15  ;;  %s4152_s17 = scalar_lea.hbm %s6166_s0, 64 }
  0x24   : > { %s214_s27 = sshll.u32 %s213_s26, 4  ;;  %s215_s27 = int_to_ptr.hbm [resolvable:$true] %s214_s27 }
  0x25   : > { %s4145_s10 = sshra.s32 %s215_s27, 4  ;;  %s4146_s10 = int_to_ptr.hbm [resolvable:$true] %s4145_s10 }
  0x26   : > { %s4147_s11 = scalar_lea.hbm %s4146_s10, 32  ;;  %p4153_p0 = scmp.lt.s32.totalorder %s4146_s10, %s6166_s0 }
  0x27   : > { %p4148_p9 = scmp.ne.s32.totalorder %s4146_s10, %s4147_s11  ;;  %p4154_p3 = scmp.lt.s32.totalorder %s4152_s17, %s4147_s11 }
  0x29   : > { %p4150_p12 = pnand %p4149_p10, %p4148_p9  ;;  %p4155_p5 = por %p4154_p3, %p4153_p0 }
  0x2b   : > { %p4151_p13 = pneg %p4150_p12 }
  0x2d   : > { %p4156_p11 = pnand %p4155_p5, %p4151_p13 }
  0x2f   : > { %4159 = shalt.err (!%p4156_p11)
}
  0x30   : > { %s4284_s28 = smov 128   ;;  %s4285_s2 = smov 8  }
  0x31   : > { %3991 = dma.hbm_to_vmem [thread:$0]  (!%p4407_p2), %s215_s27, 512, %s217_s30, %s204_s9, %s4284_s28, %s4284_s28, %s4285_s2  }
  0x32   : > { %s3753_s12 = sshll.u32 %s4398_s14, 9  ;;  %s3967_s20 = sshll.u32 %s4279_s21, 9 }
  0x33   : > { %s236_s7 = scalar_lea.hbm %s6145_s1, %s3967_s20  ;;  %s230_s10 = scalar_lea.vmem [#allocation6], %s3753_s12 }
  0x34   : > { %s237_s23 = sshll.u32 %s236_s7, 4  ;;  %s239_s11 = sshll.u32 %s230_s10, 4  ;;  %s238_s23 = int_to_ptr.hbm [resolvable:$true] %s237_s23  ;;  %s240_s11 = int_to_ptr.vmem [resolvable:$true] %s239_s11 }
  0x35   : > { %s227_s17 = scalar_lea.sflag [#allocation7], %s226_s8  ;;  %s4175_s26 = sshra.s32 %s238_s23, 4  ;;  %s4176_s26 = int_to_ptr.hbm [resolvable:$true] %s4175_s26 }
  0x36   : > { %s4177_s0 = scalar_lea.hbm %s4176_s26, 512  ;;  %s4182_s30 = scalar_lea.hbm %s6145_s1, 1024 }
  0x37   : > { %p4178_p11 = scmp.ne.s32.totalorder %s4176_s26, %s4177_s0  ;;  %p4183_p13 = scmp.lt.s32.totalorder %s4176_s26, %s6145_s1 }
  0x38   : > { %p4184_p0 = scmp.lt.s32.totalorder %s4182_s30, %s4177_s0 }
  0x39   : > { %p4180_p9 = pnand %p4178_p11, %p4149_p10 }
  0x3a   : > { %p4185_p3 = por %p4184_p0, %p4183_p13 }
  0x3b   : > { %p4181_p12 = pneg %p4180_p9 }
  0x3d   : > { %p4186_p5 = pnand %p4185_p3, %p4181_p12 }
  0x3f   : > { %4189 = shalt.err (!%p4186_p5)
}
  0x40   : > { %3994 = dma.hbm_to_vmem [thread:$0]  (!%p4407_p2), %s238_s23, 8192, %s240_s11, %s227_s17, %s4284_s28, %s4284_s28, %s4285_s2  }
  0x41   : > { %251 = sbr.rel (%p4369_p8) target bundleno = 1317 (0x525), region = 40 }
  0x46   : > { %s4445_s7 = sand.u32 1, %s4271_s19  }
  0x47   : > { %s3758_s12 = sshll.u32 %s4445_s7, 5  ;;  %s254_s8 = scalar_lea.sflag [#allocation4], %s4445_s7 }
  0x48   : > { %s4449_s15 = scalar_lea.vmem [#allocation3], %s3758_s12 }
  0x49   : > { %4250 = dma.done.wait (%p4356_p4), %s254_s8, 512  }
  0x4a   : > { %4252 = vsyncadd (%p4356_p4), %s254_s8, 4294966784  ;;  %s263_s0 = sand.u32 1, %s4347_s22   ;;  %s3759_s2 = sshll.u32 %s4445_s7, 9 }
  0x4b   : > { %s264_s29 = scalar_lea.sflag [#allocation7], %s263_s0  ;;  %s4457_s6 = scalar_lea.vmem [#allocation6], %s3759_s2 }
  0x4c   : > { %4254 = dma.done.wait (%p4356_p4), %s264_s29, 8192  }
  0x4d   : > { %4256 = vsyncadd (%p4356_p4), %s264_s29, 4294959104 }
  0x4e   : > { %4258 = dma.done.wait (%p45_p1), [#allocation7], 1280  }
  0x4f   : > { %4260 = vsyncadd (%p45_p1), [#allocation7], 4294966016  ;;  %vm382_vm0 = vcmask 1040384   ;;  %v4467_v0 = vld [vmem:[#allocation8 + $0x40] sm:$0x1]  ;;  %v4469_v1 = vld [vmem:[#allocation8 + $0x30] sm:$0xff] }
  0x50   : > { %3761 = vmatpush.msk.msra.mxu0 %vm382_vm0, %v4467_v0  ;;  %v4473_v2 = vld [vmem:[#allocation8 + $0x20] sm:$0xff]  ;;  %v4480_v4 = vld [vmem:[#allocation8 + $0x48] sm:$0x1]  ;;  %v4488_v5 = vld [vmem:[%s6147_s3 + $0x18] sm:$0xff]  ;;  %vm375_vm1 = vcmask 269312   ;;  %vm465_vm2 = vcmask 253952  }
  0x51   : > { %v4478_v3 = vld [vmem:[%s6147_s3 + $0x20] sm:$0x1]  ;;  %v4490_v6 = vld [vmem:[#allocation8 + $0x38] sm:$0xff]  ;;  %v4492_v7 = vld [vmem:[#allocation8 + $0x10] sm:$0xff]  ;;  %3764 = vmatpush.msk.msra.mxu1 %vm382_vm0, %v4480_v4  ;;  %s4286_s30 = smov 32   ;;  %s4287_s9 = smov 64  }
  0x52   : > { %401 = vmatpush.msra.mxu0 %v4469_v1  ;;  %3767 = vmatpush.msk.msra.mxu2 %vm382_vm0, %v4478_v3  ;;  %v4499_v8 = vld [vmem:[%s6147_s3 + $0x10] sm:$0xff]  ;;  %v4503_v9 = vld [vmem:[#allocation8 + $0x28] sm:$0xff]  ;;  %v4505_v10 = vld [vmem:[#allocation8] sm:$0xff]  ;;  %s4288_s20 = smov 96   ;;  %vm794_vm3 = vcmask 261120   ;;  %v4289_v57 = vmov 1  }
  0x53   : > { %424 = vmatpush.msra.mxu1 %v4490_v6  ;;  %v4511_v11 = vld [vmem:[%s6147_s3 + $0x8] sm:$0xff]  ;;  %v341_v12 = vld [vmem:[%s4449_s15] sm:$0xff]  ;;  %v4516_v13 = vld [vmem:[#allocation8 + $0x18] sm:$0xff]  ;;  %4052 = vset.pattern.permute.xlu2 %v4289_v57  ;;  %vm309_vm4 = vcmask 258048   ;;  %vm1372_vm5 = vcmask 1041409   ;;  %vm1375_vm6 = vcmask 1042434  }
  0x54   : > { %402 = vmatpush.msra.mxu0 %v4473_v2  ;;  %751 = vmatpush.msra.mxu2 %v4488_v5  ;;  %v4522_v14 = vld [vmem:[%s6147_s3] sm:$0xff]  ;;  %v4526_v15 = vld [vmem:[#allocation8 + $0x8] sm:$0xff]  ;;  %vm1378_vm7 = vcmask 1043459   ;;  %vm1381_vm8 = vcmask 1044484   ;;  %vm1384_vm9 = vcmask 1045509   ;;  %vm1387_vm10 = vcmask 1046534  }
  0x55   : > { %425 = vmatpush.msra.mxu1 %v4503_v9  ;;  %v342_v16 = vld [vmem:[%s4449_s15 + $0x8] sm:$0xff]  ;;  %v343_v59 = vld [vmem:[%s4457_s6] sm:$0xff]  ;;  %vm1390_vm11 = vcmask 1047559   ;;  %vm1968_vm12 = vcmask 130048   ;;  %s3973_s2 = smul.u32 160, %s4347_s22  ;;  %s3624_s24 = scalar_lea.sflag [#allocation5], %s4445_s7 }
  0x56   : > { %403 = vmatpush.msra.mxu0 %v4492_v7  ;;  %752 = vmatpush.msra.mxu2 %v4499_v8  ;;  %v344_v55 = vld [vmem:[%s4457_s6 + $0x8] sm:$0xff]  ;;  %v308_v60 = vld [vmem:[%s6148_s4] sm:$0x1f]  ;;  %s4225_s26 = scalar_lea.hbm %s6149_s5, 320 }
  0x57   : > { %426 = vmatpush.msra.mxu1 %v4516_v13  ;;  %3968 = vmatpush.xpose.msk.msra.mxu3 %vm794_vm3, %v344_v55  ;;  %310 = vst.msk [vmem:[#allocation2 + $0x5] sm:$0x1f] %vm309_vm4, %v308_v60  ;;  %s3636_s28 = scalar_lea.hbm %s6149_s5, %s3973_s2 }
  0x58   : > { %404 = vmatpush.msra.mxu0 %v4505_v10  ;;  %753 = vmatpush.msra.mxu2 %v4511_v11  ;;  %311 = vst.msk [vmem:[#allocation2 + $0x15] sm:$0x1f] %vm309_vm4, %v308_v60  ;;  %s3639_s16 = sshll.u32 %s3636_s28, 4  ;;  %s3640_s16 = int_to_ptr.hbm [resolvable:$true] %s3639_s16 }
  0x59   : > { %3762 = vmatmul.msk.f32.vlgmr.msra.gmra.mxu0 %vm375_vm1, %v341_v12  ;;  %427 = vmatpush.msra.mxu1 %v4526_v15  ;;  %312 = vst.msk [vmem:[#allocation2 + $0x25] sm:$0x1f] %vm309_vm4, %v308_v60  ;;  %s4219_s23 = sshra.s32 %s3640_s16, 4  ;;  %s4220_s23 = int_to_ptr.hbm [resolvable:$true] %s4219_s23 }
  0x5a   : > { %754 = vmatpush.msra.mxu2 %v4522_v14  ;;  %3765 = vmatmul.msk.f32.vlgmr.msra.gmra.mxu1 %vm375_vm1, %v341_v12  ;;  %313 = vst.msk [vmem:[#allocation2 + $0x35] sm:$0x1f] %vm309_vm4, %v308_v60  ;;  %s4221_s10 = scalar_lea.hbm %s4220_s23, 160  ;;  %p4226_p2 = scmp.lt.s32.totalorder %s4220_s23, %s6149_s5 }
  0x5b   : > { %3768 = vmatmul.msk.f32.vlgmr.msra.gmra.mxu2 %vm375_vm1, %v341_v12  ;;  %3969 = vmatpush.xpose.msk.msra.mxu3 %vm794_vm3, %v343_v59  ;;  %314 = vst.msk [vmem:[#allocation2 + $0x45] sm:$0x1f] %vm309_vm4, %v308_v60  ;;  %v348_v12 = vld [vmem:[%s4457_s6 + $0x28] sm:$0xff]  ;;  %p4222_p1 = scmp.ne.s32.totalorder %s4220_s23, %s4221_s10  ;;  %p4227_p10 = scmp.lt.s32.totalorder %s4225_s26, %s4221_s10 }
  0x5c   : > { %3770 = vmatpush.xpose.msk.msrb.mxu2 %vm794_vm3, %v344_v55  ;;  %315 = vst.msk [vmem:[#allocation2 + $0x55] sm:$0x1f] %vm309_vm4, %v308_v60  ;;  %3970 = vmatpush.xpose.msk.msrb.mxu1 %vm794_vm3, %v348_v12 }
  0x5d   : > { %316 = vst.msk [vmem:[#allocation2 + $0x65] sm:$0x1f] %vm309_vm4, %v308_v60  ;;  %3778 = vmatpush.xpose.msk.msrb.mxu0 %vm794_vm3, %v348_v12  ;;  %p4223_p4 = pnand %p4222_p1, %p4393_p7  ;;  %p4228_p11 = por %p4227_p10, %p4226_p2 }
  0x5e   : > { %317 = vst.msk [vmem:[#allocation2 + $0x75] sm:$0x1f] %vm309_vm4, %v308_v60 }
  0x5f   : > { %318 = vst.msk [vmem:[#allocation2 + $0x85] sm:$0x1f] %vm309_vm4, %v308_v60  ;;  %p4224_p8 = pneg %p4223_p4 }
  0x60   : > { %3771 = vmatpush.xpose.msk.msrb.mxu2 %vm794_vm3, %v343_v59  ;;  %319 = vst.msk [vmem:[#allocation2 + $0x95] sm:$0x1f] %vm309_vm4, %v308_v60 }
  0x61   : > { %3763 = vmatmul.msk.f32.gmra.mxu0 %vm375_vm1, %v342_v16  ;;  %320 = vst.msk [vmem:[#allocation2 + $0xa5] sm:$0x1f] %vm309_vm4, %v308_v60  ;;  %p4229_p9 = pnand %p4228_p11, %p4224_p8 }
  0x62   : > { %3766 = vmatmul.msk.f32.gmra.mxu1 %vm375_vm1, %v342_v16  ;;  %321 = vst.msk [vmem:[#allocation2 + $0xb5] sm:$0x1f] %vm309_vm4, %v308_v60 }
  0x63   : > { %3769 = vmatmul.msk.f32.gmra.mxu2 %vm375_vm1, %v342_v16  ;;  %322 = vst.msk [vmem:[#allocation2 + $0xc5] sm:$0x1f] %vm309_vm4, %v308_v60  ;;  %v347_v16 = vld [vmem:[%s4457_s6 + $0x20] sm:$0xff] }
  0x64   : > { %323 = vst.msk [vmem:[#allocation2 + $0xd5] sm:$0x1f] %vm309_vm4, %v308_v60  ;;  %3971 = vmatpush.xpose.msk.msrb.mxu1 %vm794_vm3, %v347_v16  ;;  %3779 = vmatpush.xpose.msk.msrb.mxu0 %vm794_vm3, %v347_v16 }
  0x65   : > { %324 = vst.msk [vmem:[#allocation2 + $0xe5] sm:$0x1f] %vm309_vm4, %v308_v60 }
  0x66   : > { %325 = vst.msk [vmem:[#allocation2 + $0xf5] sm:$0x1f] %vm309_vm4, %v308_v60 }
  0xd6   : > { %v406_v17 = vpop.f32.mrf.mxu0 }
  0xd7   : > { %466 = vst.msk [vmem:[#allocation2] sm:$0x1] %vm465_vm2, %v406_v17  ;;  %v482_v18 = vperm.slane %v406_v17, 0  ;;  %v440_v19 = vrot.slane %v406_v17, 4  ;;  %v438_v20 = vrot.slane %v406_v17, 2  ;;  %v437_v21 = vrot.slane %v406_v17, 1  ;;  %v429_v48 = vpop.f32.mrf.mxu1 }
  0xd8   : > { %v441_v22 = vrot.slane %v406_v17, 5  ;;  %v439_v23 = vrot.slane %v406_v17, 3  ;;  %v442_v24 = vrot.slane %v406_v17, 6  ;;  %v443_v25 = vrot.slane %v406_v17, 7  ;;  %720 = vst.msk [vmem:[#allocation2 + $0x4] sm:$0x1] %vm465_vm2, %v429_v48 }
  0xd9   : > { %626 = vrot.lane.b32.xlu2 %v482_v18, %s4286_s30  ;;  %562 = vrot.lane.b32.xlu1 %v482_v18, %s4287_s9  ;;  %470 = vst.msk [vmem:[#allocation2 + $0x40] sm:$0x1] %vm465_vm2, %v440_v19  ;;  %v486_v26 = vperm.slane %v440_v19, 0  ;;  %v484_v27 = vperm.slane %v438_v20, 0  ;;  %v483_v28 = vperm.slane %v437_v21, 0  ;;  %v692_v49 = vrot.slane %v429_v48, 1 }
  0xda   : > { %498 = vrot.lane.b32.xlu0 %v482_v18, %s4288_s20  ;;  %468 = vst.msk [vmem:[#allocation2 + $0x20] sm:$0x1] %vm465_vm2, %v438_v20  ;;  %v487_v29 = vperm.slane %v441_v22, 0  ;;  %v485_v30 = vperm.slane %v439_v23, 0  ;;  %v488_v31 = vperm.slane %v442_v24, 0  ;;  %v489_v32 = vperm.slane %v443_v25, 0 }
  0xdb   : > { %467 = vst.msk [vmem:[#allocation2 + $0x10] sm:$0x1] %vm465_vm2, %v437_v21  ;;  %v693_v50 = vrot.slane %v429_v48, 2  ;;  %v694_v51 = vrot.slane %v429_v48, 3  ;;  %v695_v52 = vrot.slane %v429_v48, 4  ;;  %v696_v53 = vrot.slane %v429_v48, 5 }
  0xdc   : > { %471 = vst.msk [vmem:[#allocation2 + $0x50] sm:$0x1] %vm465_vm2, %v441_v22  ;;  %v697_v54 = vrot.slane %v429_v48, 6  ;;  %v698_v56 = vrot.slane %v429_v48, 7  ;;  %v767_v21 = vld [vmem:[#allocation2 + $0x28] sm:$0x3] }
  0xdd   : > { %469 = vst.msk [vmem:[#allocation2 + $0x30] sm:$0x1] %vm465_vm2, %v439_v23  ;;  %v350_v22 = vld [vmem:[%s4457_s6 + $0x38] sm:$0xff]  ;;  %3781 = vmatmul.msk.f32.vlgmr.msrb.gmra.mxu1 %vm794_vm3, %v767_v21  ;;  %v349_v23 = vld [vmem:[%s4457_s6 + $0x30] sm:$0xff] }
  0xde   : > { %472 = vst.msk [vmem:[#allocation2 + $0x60] sm:$0x1] %vm465_vm2, %v442_v24  ;;  %v409_v33 = vpop.f32.mrf.mxu0  ;;  %v4672_v20 = vpop.f32.mrf.mxu2  ;;  %3782 = vmatpush.xpose.msk.msra.mxu1 %vm794_vm3, %v350_v22 }
  0xdf   : > { %473 = vst.msk [vmem:[#allocation2 + $0x70] sm:$0x1] %vm465_vm2, %v443_v25  ;;  %v445_v34 = vrot.slane %v409_v33, 2  ;;  %v446_v35 = vrot.slane %v409_v33, 3  ;;  %v448_v36 = vrot.slane %v409_v33, 5  ;;  %v444_v37 = vrot.slane %v409_v33, 1 }
  0xe0   : > { %474 = vst.msk [vmem:[#allocation2 + $0x80] sm:$0x1] %vm465_vm2, %v409_v33  ;;  %v449_v38 = vrot.slane %v409_v33, 6  ;;  %v447_v39 = vrot.slane %v409_v33, 4  ;;  %v450_v40 = vrot.slane %v409_v33, 7  ;;  %v490_v42 = vperm.slane %v409_v33, 0 }
  0xe1   : > { %506 = vrot.lane.b32.xlu2 %v486_v26, %s4288_s20  ;;  %502 = vrot.lane.b32.xlu1 %v484_v27, %s4288_s20  ;;  %476 = vst.msk [vmem:[#allocation2 + $0xa0] sm:$0x1] %vm465_vm2, %v445_v34  ;;  %v4578_v41 = vperm.slane %v445_v34, 0  ;;  %v4584_v43 = vperm.slane %v446_v35, 0  ;;  %v4586_v44 = vperm.slane %v448_v36, 0  ;;  %v491_v45 = vperm.slane %v444_v37, 0 }
  0xe2   : > { %500 = vrot.lane.b32.xlu0 %v483_v28, %s4288_s20  ;;  %477 = vst.msk [vmem:[#allocation2 + $0xb0] sm:$0x1] %vm465_vm2, %v446_v35  ;;  %v4593_v46 = vperm.slane %v449_v38, 0  ;;  %v4595_v47 = vperm.slane %v447_v39, 0  ;;  %v4609_v58 = vperm.slane %v450_v40, 0  ;;  %3783 = vmatpush.xpose.msk.msra.mxu1 %vm794_vm3, %v349_v23  ;;  %v352_v34 = vld [vmem:[%s4457_s6 + $0x48] sm:$0xff] }
  0xe3   : > { %479 = vst.msk [vmem:[#allocation2 + $0xd0] sm:$0x1] %vm465_vm2, %v448_v36  ;;  %3786 = vmatpush.xpose.msk.msra.mxu2 %vm794_vm3, %v352_v34  ;;  %v351_v35 = vld [vmem:[%s4457_s6 + $0x40] sm:$0xff] }
  0xe4   : > { %475 = vst.msk [vmem:[#allocation2 + $0x90] sm:$0x1] %vm465_vm2, %v444_v37  ;;  %v359_v34 = vld [vmem:[%s4457_s6 + $0x80] sm:$0xff] }
  0xe5   : > { %480 = vst.msk [vmem:[#allocation2 + $0xe0] sm:$0x1] %vm465_vm2, %v449_v38 }
  0xe6   : > { %478 = vst.msk [vmem:[#allocation2 + $0xc0] sm:$0x1] %vm465_vm2, %v447_v39  ;;  %v354_v39 = vld [vmem:[%s4457_s6 + $0x58] sm:$0xff] }
  0xe7   : > { %481 = vst.msk [vmem:[#allocation2 + $0xf0] sm:$0x1] %vm465_vm2, %v450_v40  ;;  %3787 = vmatpush.xpose.msk.msra.mxu2 %vm794_vm3, %v351_v35  ;;  %v356_v40 = vld [vmem:[%s4457_s6 + $0x68] sm:$0xff]  ;;  %v773_v35 = vld [vmem:[#allocation2 + $0x58] sm:$0x3] }
  0xe8   : > { %721 = vst.msk [vmem:[#allocation2 + $0x14] sm:$0x1] %vm465_vm2, %v692_v49  ;;  %3794 = vmatpush.xpose.msk.msra.mxu0 %vm794_vm3, %v356_v40  ;;  %v368_v40 = vld [vmem:[%s4457_s6 + $0xc8] sm:$0xff] }
  0xe9   : > { %508 = vrot.lane.b32.xlu2 %v487_v29, %s4288_s20  ;;  %504 = vrot.lane.b32.xlu1 %v485_v30, %s4288_s20  ;;  %722 = vst.msk [vmem:[#allocation2 + $0x24] sm:$0x1] %vm465_vm2, %v693_v50 }
  0xea   : > { %510 = vrot.lane.b32.xlu0 %v488_v31, %s4288_s20  ;;  %723 = vst.msk [vmem:[#allocation2 + $0x34] sm:$0x1] %vm465_vm2, %v694_v51 }
  0xeb   : > { %724 = vst.msk [vmem:[#allocation2 + $0x44] sm:$0x1] %vm465_vm2, %v695_v52  ;;  %v432_v52 = vpop.f32.mrf.mxu1 }
  0xec   : > { %725 = vst.msk [vmem:[#allocation2 + $0x54] sm:$0x1] %vm465_vm2, %v696_v53  ;;  %v699_v53 = vrot.slane %v432_v52, 1  ;;  %v701_v55 = vrot.slane %v432_v52, 3  ;;  %v702_v60 = vrot.slane %v432_v52, 4  ;;  %v704_v12 = vrot.slane %v432_v52, 6 }
  0xed   : > { %726 = vst.msk [vmem:[#allocation2 + $0x64] sm:$0x1] %vm465_vm2, %v697_v54  ;;  %v700_v54 = vrot.slane %v432_v52, 2  ;;  %v705_v16 = vrot.slane %v432_v52, 7 }
  0xee   : > { %727 = vst.msk [vmem:[#allocation2 + $0x74] sm:$0x1] %vm465_vm2, %v698_v56  ;;  %v769_v56 = vld [vmem:[#allocation2 + $0x38] sm:$0x3] }
  0xef   : > { %728 = vst.msk [vmem:[#allocation2 + $0x84] sm:$0x1] %vm465_vm2, %v432_v52 }
  0xf0   : > { %729 = vst.msk [vmem:[#allocation2 + $0x94] sm:$0x1] %vm465_vm2, %v699_v53 }
  0xf1   : > { %512 = vrot.lane.b32.xlu1 %v489_v32, %s4288_s20  ;;  %564 = vrot.lane.b32.xlu2 %v483_v28, %s4287_s9  ;;  %730 = vst.msk [vmem:[#allocation2 + $0xa4] sm:$0x1] %vm465_vm2, %v700_v54  ;;  %v370_v54 = vld [vmem:[%s4457_s6 + $0xd8] sm:$0xff] }
  0xf2   : > { %566 = vrot.lane.b32.xlu0 %v484_v27, %s4287_s9  ;;  %731 = vst.msk [vmem:[#allocation2 + $0xb4] sm:$0x1] %vm465_vm2, %v701_v55  ;;  %v369_v55 = vld [vmem:[%s4457_s6 + $0xd0] sm:$0xff] }
  0xf3   : > { %732 = vst.msk [vmem:[#allocation2 + $0xc4] sm:$0x1] %vm465_vm2, %v702_v60 }
  0xf4   : > { %734 = vst.msk [vmem:[#allocation2 + $0xe4] sm:$0x1] %vm465_vm2, %v704_v12  ;;  %v373_v12 = vld [vmem:[%s4457_s6 + $0xf0] sm:$0xff] }
  0xf5   : > { %735 = vst.msk [vmem:[#allocation2 + $0xf4] sm:$0x1] %vm465_vm2, %v705_v16 }
  0xf9   : > { %568 = vrot.lane.b32.xlu1 %v485_v30, %s4287_s9  ;;  %570 = vrot.lane.b32.xlu2 %v486_v26, %s4287_s9 }
  0xfa   : > { %572 = vrot.lane.b32.xlu0 %v487_v29, %s4287_s9 }
 0x101   : > { %574 = vrot.lane.b32.xlu1 %v488_v31, %s4287_s9  ;;  %576 = vrot.lane.b32.xlu2 %v489_v32, %s4287_s9 }
 0x102   : > { %628 = vrot.lane.b32.xlu0 %v483_v28, %s4286_s30  ;;  %v763_v28 = vld [vmem:[#allocation2 + $0x8] sm:$0x3] }
 0x103   : > { %3773 = vmatmul.msk.f32.vlgmr.msra.gmra.mxu3 %vm794_vm3, %v763_v28 }
 0x109   : > { %630 = vrot.lane.b32.xlu1 %v484_v27, %s4286_s30  ;;  %632 = vrot.lane.b32.xlu2 %v485_v30, %s4286_s30  ;;  %v345_v30 = vld [vmem:[%s4457_s6 + $0x10] sm:$0xff] }
 0x10a   : > { %634 = vrot.lane.b32.xlu0 %v486_v26, %s4286_s30 }
 0x111   : > { %636 = vrot.lane.b32.xlu1 %v487_v29, %s4286_s30  ;;  %638 = vrot.lane.b32.xlu2 %v488_v31, %s4286_s30  ;;  %v346_v29 = vld [vmem:[%s4457_s6 + $0x18] sm:$0xff] }
 0x112   : > { %640 = vrot.lane.b32.xlu0 %v489_v32, %s4286_s30  ;;  %3774 = vmatpush.xpose.msk.msrb.mxu3 %vm794_vm3, %v346_v29 }
 0x116   : > { %3775 = vmatpush.xpose.msk.msrb.mxu3 %vm794_vm3, %v345_v30 }
 0x119   : > { %514 = vrot.lane.b32.xlu2 %v490_v42, %s4288_s20  ;;  %518 = vrot.lane.b32.xlu1 %v4578_v41, %s4288_s20 }
 0x11a   : > { %578 = vrot.lane.b32.xlu0 %v490_v42, %s4287_s9  ;;  %3790 = vmatpush.xpose.msk.msra.mxu3 %vm794_vm3, %v354_v39  ;;  %v775_v39 = vld [vmem:[#allocation2 + $0x68] sm:$0x3] }
 0x121   : > { %520 = vrot.lane.b32.xlu2 %v4584_v43, %s4288_s20  ;;  %524 = vrot.lane.b32.xlu1 %v4586_v44, %s4288_s20 }
 0x122   : > { %516 = vrot.lane.b32.xlu0 %v491_v45, %s4288_s20 }
 0x129   : > { %526 = vrot.lane.b32.xlu2 %v4593_v46, %s4288_s20  ;;  %580 = vrot.lane.b32.xlu1 %v491_v45, %s4287_s9 }
 0x12a   : > { %522 = vrot.lane.b32.xlu0 %v4595_v47, %s4288_s20 }
 0x131   : > { %582 = vrot.lane.b32.xlu2 %v4578_v41, %s4287_s9  ;;  %586 = vrot.lane.b32.xlu1 %v4595_v47, %s4287_s9 }
 0x132   : > { %528 = vrot.lane.b32.xlu0 %v4609_v58, %s4288_s20 }
 0x133   : > { %v627_v61 = vpop.permute.xlu2 %626 }
 0x134   : > { %674 = vst.msk [vmem:[#allocation2 + $0x3] sm:$0x1] %vm465_vm2, %v627_v61 }
 0x139   : > { %588 = vrot.lane.b32.xlu2 %v4586_v44, %s4287_s9  ;;  %642 = vrot.lane.b32.xlu1 %v490_v42, %s4286_s30  ;;  %v353_v42 = vld [vmem:[%s4457_s6 + $0x50] sm:$0xff] }
 0x13a   : > { %584 = vrot.lane.b32.xlu0 %v4584_v43, %s4287_s9  ;;  %3791 = vmatpush.xpose.msk.msra.mxu3 %vm794_vm3, %v353_v42 }
 0x13b   : > { %v507_v62 = vpop.permute.xlu2 %506 }
 0x13c   : > { %550 = vst.msk [vmem:[#allocation2 + $0x41] sm:$0x1] %vm465_vm2, %v507_v62 }
 0x141   : > { %644 = vrot.lane.b32.xlu2 %v491_v45, %s4286_s30  ;;  %592 = vrot.lane.b32.xlu1 %v4609_v58, %s4287_s9 }
 0x142   : > { %590 = vrot.lane.b32.xlu0 %v4593_v46, %s4287_s9 }
 0x143   : > { %v509_v63 = vpop.permute.xlu2 %508 }
 0x144   : > { %551 = vst.msk [vmem:[#allocation2 + $0x51] sm:$0x1] %vm465_vm2, %v509_v63  ;;  %v703_v63 = vrot.slane %v432_v52, 5 }
 0x146   : > { %733 = vst.msk [vmem:[#allocation2 + $0xd4] sm:$0x1] %vm465_vm2, %v703_v63  ;;  %v371_v63 = vld [vmem:[%s4457_s6 + $0xe0] sm:$0xff] }
 0x149   : > { %650 = vrot.lane.b32.xlu2 %v4595_v47, %s4286_s30  ;;  %648 = vrot.lane.b32.xlu1 %v4584_v43, %s4286_s30  ;;  %v355_v43 = vld [vmem:[%s4457_s6 + $0x60] sm:$0xff] }
 0x14a   : > { %646 = vrot.lane.b32.xlu0 %v4578_v41, %s4286_s30  ;;  %v358_v41 = vld [vmem:[%s4457_s6 + $0x78] sm:$0xff]  ;;  %3795 = vmatpush.xpose.msk.msra.mxu0 %vm794_vm3, %v355_v43 }
 0x14b   : > { %v563_v17 = vpop.permute.xlu1 %562  ;;  %v565_v18 = vpop.permute.xlu2 %564  ;;  %3798 = vmatpush.xpose.msk.msrb.mxu1 %vm794_vm3, %v358_v41  ;;  %v777_v41 = vld [vmem:[#allocation2 + $0x78] sm:$0x3] }
 0x14c   : > { %610 = vst.msk [vmem:[#allocation2 + $0x2] sm:$0x1] %vm465_vm2, %v563_v17  ;;  %v499_v19 = vpop.permute.xlu0 %498  ;;  %v362_v17 = vld [vmem:[%s4457_s6 + $0x98] sm:$0xff] }
 0x14d   : > { %546 = vst.msk [vmem:[#allocation2 + $0x1] sm:$0x1] %vm465_vm2, %v499_v19  ;;  %v765_v19 = vld [vmem:[#allocation2 + $0x18] sm:$0x3] }
 0x14e   : > { %611 = vst.msk [vmem:[#allocation2 + $0x12] sm:$0x1] %vm465_vm2, %v565_v18  ;;  %v361_v18 = vld [vmem:[%s4457_s6 + $0x90] sm:$0xff] }
 0x151   : > { %1579 = vperm.xlu2 %4052, %v4672_v20   ;;  %654 = vrot.lane.b32.xlu1 %v4593_v46, %s4286_s30 }
 0x152   : > { %652 = vrot.lane.b32.xlu0 %v4586_v44, %s4286_s30  ;;  %v357_v44 = vld [vmem:[%s4457_s6 + $0x70] sm:$0xff] }
 0x153   : > { %v503_v24 = vpop.permute.xlu1 %502  ;;  %v571_v25 = vpop.permute.xlu2 %570  ;;  %3799 = vmatpush.xpose.msk.msrb.mxu1 %vm794_vm3, %v357_v44 }
 0x154   : > { %548 = vst.msk [vmem:[#allocation2 + $0x21] sm:$0x1] %vm465_vm2, %v503_v24  ;;  %v501_v26 = vpop.permute.xlu0 %500  ;;  %v762_v27 = vld [vmem:[#allocation2] sm:$0xff] }
 0x155   : > { %614 = vst.msk [vmem:[#allocation2 + $0x42] sm:$0x1] %vm465_vm2, %v571_v25  ;;  %3772 = vmatmul.msk.f32.vlgmr.msrb.gmra.mxu2 %vm794_vm3, %v762_v27 }
 0x156   : > { %547 = vst.msk [vmem:[#allocation2 + $0x11] sm:$0x1] %vm465_vm2, %v501_v26  ;;  %v360_v26 = vld [vmem:[%s4457_s6 + $0x88] sm:$0xff] }
 0x157   : > { %3802 = vmatpush.xpose.msk.msrb.mxu2 %vm794_vm3, %v360_v26  ;;  %v791_v26 = vld [vmem:[#allocation2 + $0xe8] sm:$0x3] }
 0x159   : > { %656 = vrot.lane.b32.xlu2 %v4609_v58, %s4286_s30 }
 0x15b   : > { %v505_v31 = vpop.permute.xlu1 %504  ;;  %v577_v32 = vpop.permute.xlu2 %576  ;;  %3803 = vmatpush.xpose.msk.msrb.mxu2 %vm794_vm3, %v359_v34 }
 0x15c   : > { %549 = vst.msk [vmem:[#allocation2 + $0x31] sm:$0x1] %vm465_vm2, %v505_v31  ;;  %v511_v33 = vpop.permute.xlu0 %510 }
 0x15d   : > { %617 = vst.msk [vmem:[#allocation2 + $0x72] sm:$0x1] %vm465_vm2, %v577_v32 }
 0x15e   : > { %552 = vst.msk [vmem:[#allocation2 + $0x61] sm:$0x1] %vm465_vm2, %v511_v33  ;;  %v771_v33 = vld [vmem:[#allocation2 + $0x48] sm:$0x3] }
 0x163   : > { %v513_v36 = vpop.permute.xlu1 %512  ;;  %v633_v37 = vpop.permute.xlu2 %632 }
 0x164   : > { %553 = vst.msk [vmem:[#allocation2 + $0x71] sm:$0x1] %vm465_vm2, %v513_v36  ;;  %v567_v38 = vpop.permute.xlu0 %566 }
 0x165   : > { %677 = vst.msk [vmem:[#allocation2 + $0x33] sm:$0x1] %vm465_vm2, %v633_v37 }
 0x166   : > { %612 = vst.msk [vmem:[#allocation2 + $0x22] sm:$0x1] %vm465_vm2, %v567_v38 }
 0x16b   : > { %v569_v45 = vpop.permute.xlu1 %568  ;;  %v639_v46 = vpop.permute.xlu2 %638 }
 0x16c   : > { %613 = vst.msk [vmem:[#allocation2 + $0x32] sm:$0x1] %vm465_vm2, %v569_v45  ;;  %v573_v47 = vpop.permute.xlu0 %572  ;;  %v367_v45 = vld [vmem:[%s4457_s6 + $0xc0] sm:$0xff] }
 0x16d   : > { %680 = vst.msk [vmem:[#allocation2 + $0x63] sm:$0x1] %vm465_vm2, %v639_v46  ;;  %v364_v46 = vld [vmem:[%s4457_s6 + $0xa8] sm:$0xff] }
 0x16e   : > { %615 = vst.msk [vmem:[#allocation2 + $0x52] sm:$0x1] %vm465_vm2, %v573_v47  ;;  %v366_v47 = vld [vmem:[%s4457_s6 + $0xb8] sm:$0xff] }
 0x173   : > { %v575_v48 = vpop.permute.xlu1 %574  ;;  %v515_v49 = vpop.permute.xlu2 %514  ;;  %v768_v50 = vld [vmem:[#allocation2 + $0x30] sm:$0xff] }
 0x174   : > { %616 = vst.msk [vmem:[#allocation2 + $0x62] sm:$0x1] %vm465_vm2, %v575_v48  ;;  %v629_v51 = vpop.permute.xlu0 %628  ;;  %3784 = vmatmul.msk.f32.vlgmr.msra.gmra.mxu1 %vm794_vm3, %v768_v50  ;;  %v363_v48 = vld [vmem:[%s4457_s6 + $0xa0] sm:$0xff] }
 0x175   : > { %675 = vst.msk [vmem:[#allocation2 + $0x13] sm:$0x1] %vm465_vm2, %v629_v51  ;;  %3814 = vmatpush.xpose.msk.msra.mxu1 %vm794_vm3, %v366_v47 }
 0x176   : > { %554 = vst.msk [vmem:[#allocation2 + $0x81] sm:$0x1] %vm465_vm2, %v515_v49  ;;  %v365_v49 = vld [vmem:[%s4457_s6 + $0xb0] sm:$0xff] }
 0x179   : > { %3815 = vmatpush.xpose.msk.msra.mxu1 %vm794_vm3, %v365_v49 }
 0x17b   : > { %v631_v58 = vpop.permute.xlu1 %630  ;;  %v521_v59 = vpop.permute.xlu2 %520  ;;  %v774_v30 = vld [vmem:[#allocation2 + $0x60] sm:$0xff] }
 0x17c   : > { %676 = vst.msk [vmem:[#allocation2 + $0x23] sm:$0x1] %vm465_vm2, %v631_v58  ;;  %v635_v61 = vpop.permute.xlu0 %634  ;;  %v764_v62 = vld [vmem:[#allocation2 + $0x10] sm:$0xff]  ;;  %3785 = vmatmul.msk.f32.gmra.mxu1 %vm794_vm3, %v769_v56  ;;  %v781_v56 = vld [vmem:[#allocation2 + $0x98] sm:$0x3] }
 0x17d   : > { %678 = vst.msk [vmem:[#allocation2 + $0x43] sm:$0x1] %vm465_vm2, %v635_v61  ;;  %3776 = vmatmul.msk.f32.vlgmr.msrb.gmra.mxu3 %vm794_vm3, %v764_v62  ;;  %v372_v61 = vld [vmem:[%s4457_s6 + $0xe8] sm:$0xff]  ;;  %v374_v62 = vld [vmem:[%s4457_s6 + $0xf8] sm:$0xff] }
 0x17e   : > { %557 = vst.msk [vmem:[#allocation2 + $0xb1] sm:$0x1] %vm465_vm2, %v521_v59  ;;  %3806 = vmatpush.xpose.msk.msrb.mxu3 %vm794_vm3, %v362_v17 }
 0x182   : > { %3807 = vmatpush.xpose.msk.msrb.mxu3 %vm794_vm3, %v361_v18 }
 0x183   : > { %v637_v21 = vpop.permute.xlu1 %636  ;;  %v527_v22 = vpop.permute.xlu2 %526  ;;  %v766_v23 = vld [vmem:[#allocation2 + $0x20] sm:$0xff] }
 0x184   : > { %679 = vst.msk [vmem:[#allocation2 + $0x53] sm:$0x1] %vm465_vm2, %v637_v21  ;;  %v641_v24 = vpop.permute.xlu0 %640  ;;  %3780 = vmatmul.msk.f32.vlgmr.msrb.gmra.mxu0 %vm794_vm3, %v766_v23  ;;  %v770_v25 = vld [vmem:[#allocation2 + $0x40] sm:$0xff]  ;;  %v789_v23 = vld [vmem:[#allocation2 + $0xd8] sm:$0x3] }
 0x185   : > { %681 = vst.msk [vmem:[#allocation2 + $0x73] sm:$0x1] %vm465_vm2, %v641_v24  ;;  %3777 = vmatmul.msk.f32.gmra.mxu3 %vm794_vm3, %v765_v19  ;;  %3788 = vmatmul.msk.f32.vlgmr.msra.gmra.mxu2 %vm794_vm3, %v770_v25  ;;  %v4290_v24 = vmov 0  }
 0x186   : > { %560 = vst.msk [vmem:[#allocation2 + $0xe1] sm:$0x1] %vm465_vm2, %v527_v22  ;;  %3818 = vmatpush.xpose.msk.msra.mxu2 %vm794_vm3, %v368_v40  ;;  %3810 = vmatpush.xpose.msk.msrb.mxu0 %vm794_vm3, %v364_v46 }
 0x187   : > { %4053 = vset.pattern.permute.xlu2 %v4290_v24  ;;  %4051 = vset.pattern.permute.xlu1 %v4290_v24 }
 0x188   : > { %1474 = vperm.xlu1 %4051, %v4672_v20  }
 0x18a   : > { %3819 = vmatpush.xpose.msk.msra.mxu2 %vm794_vm3, %v367_v45  ;;  %3811 = vmatpush.xpose.msk.msrb.mxu0 %vm794_vm3, %v363_v48 }
 0x18b   : > { %v583_v27 = vpop.permute.xlu2 %582  ;;  %v519_v28 = vpop.permute.xlu1 %518  ;;  %v772_v29 = vld [vmem:[#allocation2 + $0x50] sm:$0xff] }
 0x18c   : > { %v579_v31 = vpop.permute.xlu0 %578  ;;  %620 = vst.msk [vmem:[#allocation2 + $0xa2] sm:$0x1] %vm465_vm2, %v583_v27  ;;  %3796 = vmatmul.msk.f32.vlgmr.msra.gmra.mxu0 %vm794_vm3, %v774_v30  ;;  %v776_v32 = vld [vmem:[#allocation2 + $0x70] sm:$0xff]  ;;  %v6154_v27 = vmov 3   ;;  %v4863_v30 = vpop.f32.mrf.mxu3 }
 0x18d   : > { %618 = vst.msk [vmem:[#allocation2 + $0x82] sm:$0x1] %vm465_vm2, %v579_v31  ;;  %3792 = vmatmul.msk.f32.vlgmr.msra.gmra.mxu3 %vm794_vm3, %v772_v29  ;;  %3800 = vmatmul.msk.f32.vlgmr.msrb.gmra.mxu1 %vm794_vm3, %v776_v32  ;;  %v4861_v29 = vpop.f32.mrf.mxu1 }
 0x18e   : > { %556 = vst.msk [vmem:[#allocation2 + $0xa1] sm:$0x1] %vm465_vm2, %v519_v28  ;;  %3789 = vmatmul.msk.f32.gmra.mxu2 %vm794_vm3, %v771_v33  ;;  %3822 = vmatpush.xpose.msk.msra.mxu3 %vm794_vm3, %v370_v54  ;;  %v4292_v28 = vmov 2   ;;  %v1772_v32 = vrot.slane %v4861_v29, 6  ;;  %v1876_v33 = vrot.slane %v4861_v29, 7 }
 0x18f   : > { %3826 = vmatpush.xpose.msk.msra.mxu0 %vm794_vm3, %v372_v61  ;;  %3830 = vmatpush.xpose.msk.msrb.mxu1 %vm794_vm3, %v374_v62 }
 0x190   : > { %4057 = vset.pattern.permute.xlu0 %v6154_v27  ;;  %4055 = vset.pattern.permute.xlu1 %v4292_v28 }
 0x192   : > { %3823 = vmatpush.xpose.msk.msra.mxu3 %vm794_vm3, %v369_v55 }
 0x193   : > { %v589_v36 = vpop.permute.xlu2 %588  ;;  %v525_v37 = vpop.permute.xlu1 %524  ;;  %3827 = vmatpush.xpose.msk.msra.mxu0 %vm794_vm3, %v371_v63  ;;  %3831 = vmatpush.xpose.msk.msrb.mxu1 %vm794_vm3, %v373_v12  ;;  %v1874_v12 = vrot.slane %v4863_v30, 1 }
 0x194   : > { %623 = vst.msk [vmem:[#allocation2 + $0xd2] sm:$0x1] %vm465_vm2, %v589_v36  ;;  %v517_v38 = vpop.permute.xlu0 %516  ;;  %3797 = vmatmul.msk.f32.gmra.mxu0 %vm794_vm3, %v775_v39 }
 0x195   : > { %559 = vst.msk [vmem:[#allocation2 + $0xd1] sm:$0x1] %vm465_vm2, %v525_v37  ;;  %3793 = vmatmul.msk.f32.gmra.mxu3 %vm794_vm3, %v773_v35  ;;  %3801 = vmatmul.msk.f32.gmra.mxu1 %vm794_vm3, %v777_v41 }
 0x196   : > { %555 = vst.msk [vmem:[#allocation2 + $0x91] sm:$0x1] %vm465_vm2, %v517_v38 }
 0x19b   : > { %v645_v42 = vpop.permute.xlu2 %644  ;;  %v581_v43 = vpop.permute.xlu1 %580 }
 0x19c   : > { %683 = vst.msk [vmem:[#allocation2 + $0x93] sm:$0x1] %vm465_vm2, %v645_v42  ;;  %v523_v44 = vpop.permute.xlu0 %522 }
 0x19d   : > { %619 = vst.msk [vmem:[#allocation2 + $0x92] sm:$0x1] %vm465_vm2, %v581_v43 }
 0x19e   : > { %558 = vst.msk [vmem:[#allocation2 + $0xc1] sm:$0x1] %vm465_vm2, %v523_v44 }
 0x1a3   : > { %v651_v50 = vpop.permute.xlu2 %650  ;;  %v587_v51 = vpop.permute.xlu1 %586 }
 0x1a4   : > { %686 = vst.msk [vmem:[#allocation2 + $0xc3] sm:$0x1] %vm465_vm2, %v651_v50  ;;  %v529_v52 = vpop.permute.xlu0 %528  ;;  %v780_v53 = vld [vmem:[#allocation2 + $0x90] sm:$0xff] }
 0x1a5   : > { %622 = vst.msk [vmem:[#allocation2 + $0xc2] sm:$0x1] %vm465_vm2, %v587_v51  ;;  %3808 = vmatmul.msk.f32.vlgmr.msrb.gmra.mxu3 %vm794_vm3, %v780_v53 }
 0x1a6   : > { %561 = vst.msk [vmem:[#allocation2 + $0xf1] sm:$0x1] %vm465_vm2, %v529_v52  ;;  %3879 = vmatpush.msk.msrb.mxu3 %vm382_vm0, %v4480_v4 }
 0x1a8   : > { %2068 = vmatpush.msrb.mxu3 %v4490_v6 }
 0x1aa   : > { %2069 = vmatpush.msrb.mxu3 %v4503_v9  ;;  %v779_v9 = vld [vmem:[#allocation2 + $0x88] sm:$0x3] }
 0x1ab   : > { %v4787_v58 = vpop.permute.xlu2 %1579  ;;  %v643_v59 = vpop.permute.xlu1 %642 }
 0x1ac   : > { %682 = vst.msk [vmem:[#allocation2 + $0x83] sm:$0x1] %vm465_vm2, %v643_v59  ;;  %v585_v60 = vpop.permute.xlu0 %584  ;;  %2070 = vmatpush.msrb.mxu3 %v4516_v13  ;;  %v786_v19 = vld [vmem:[#allocation2 + $0xc0] sm:$0xff] }
 0x1ad   : > { %621 = vst.msk [vmem:[#allocation2 + $0xb2] sm:$0x1] %vm465_vm2, %v585_v60  ;;  %3809 = vmatmul.msk.f32.gmra.mxu3 %vm794_vm3, %v781_v56 }
 0x1ae   : > { %2071 = vmatpush.msrb.mxu3 %v4526_v15 }
 0x1b3   : > { %v657_v4 = vpop.permute.xlu2 %656  ;;  %v593_v16 = vpop.permute.xlu1 %592  ;;  %v778_v17 = vld [vmem:[#allocation2 + $0x80] sm:$0xff] }
 0x1b4   : > { %689 = vst.msk [vmem:[#allocation2 + $0xf3] sm:$0x1] %vm465_vm2, %v657_v4  ;;  %v591_v6 = vpop.permute.xlu0 %590  ;;  %3804 = vmatmul.msk.f32.vlgmr.msrb.gmra.mxu2 %vm794_vm3, %v778_v17 }
 0x1b5   : > { %625 = vst.msk [vmem:[#allocation2 + $0xf2] sm:$0x1] %vm465_vm2, %v593_v16  ;;  %3876 = vmatpush.msk.msrb.mxu2 %vm382_vm0, %v4467_v0 }
 0x1b6   : > { %624 = vst.msk [vmem:[#allocation2 + $0xe2] sm:$0x1] %vm465_vm2, %v591_v6 }
 0x1b7   : > { %2045 = vmatpush.msrb.mxu2 %v4469_v1 }
 0x1b9   : > { %2046 = vmatpush.msrb.mxu2 %v4473_v2  ;;  %v785_v2 = vld [vmem:[#allocation2 + $0xb8] sm:$0x3] }
 0x1bb   : > { %v649_v13 = vpop.permute.xlu1 %648  ;;  %2047 = vmatpush.msrb.mxu2 %v4492_v7  ;;  %v787_v7 = vld [vmem:[#allocation2 + $0xc8] sm:$0x3] }
 0x1bc   : > { %685 = vst.msk [vmem:[#allocation2 + $0xb3] sm:$0x1] %vm465_vm2, %v649_v13  ;;  %v647_v18 = vpop.permute.xlu0 %646  ;;  %3805 = vmatmul.msk.f32.gmra.mxu2 %vm794_vm3, %v779_v9 }
 0x1bd   : > { %684 = vst.msk [vmem:[#allocation2 + $0xa3] sm:$0x1] %vm465_vm2, %v647_v18  ;;  %2048 = vmatpush.msrb.mxu2 %v4505_v10  ;;  %v783_v10 = vld [vmem:[#allocation2 + $0xa8] sm:$0x3] }
 0x1c3   : > { %v655_v0 = vpop.permute.xlu1 %654  ;;  %v784_v15 = vld [vmem:[#allocation2 + $0xb0] sm:$0xff] }
 0x1c4   : > { %688 = vst.msk [vmem:[#allocation2 + $0xe3] sm:$0x1] %vm465_vm2, %v655_v0  ;;  %v653_v1 = vpop.permute.xlu0 %652  ;;  %v782_v21 = vld [vmem:[#allocation2 + $0xa0] sm:$0xff]  ;;  %3816 = vmatmul.msk.f32.vlgmr.msra.gmra.mxu1 %vm794_vm3, %v784_v15  ;;  %3820 = vmatmul.msk.f32.vlgmr.msra.gmra.mxu2 %vm794_vm3, %v786_v19 }
 0x1c5   : > { %687 = vst.msk [vmem:[#allocation2 + $0xd3] sm:$0x1] %vm465_vm2, %v653_v1  ;;  %3812 = vmatmul.msk.f32.vlgmr.msrb.gmra.mxu0 %vm794_vm3, %v782_v21 }
 0x1c6   : > { %3882 = vmatpush.msk.msrb.mxu0 %vm382_vm0, %v4478_v3  ;;  %v3842_v3 = vld [vmem:[%s4449_s15 + $0x10] sm:$0xff] }
 0x1c8   : > { %2391 = vmatpush.msrb.mxu0 %v4488_v5  ;;  %v4835_v5 = vpop.f32.mrf.mxu2 }
 0x1c9   : > { %1479 = vperm.xlu2 %4053, %v4835_v5   ;;  %1807 = vperm.xlu0 %4057, %v4835_v5  }
 0x1ca   : > { %2392 = vmatpush.msrb.mxu0 %v4499_v8  ;;  %v792_v8 = vld [vmem:[#allocation2 + $0xf0] sm:$0xff]  ;;  %1687 = vperm.xlu1 %4055, %v4835_v5  }
 0x1cb   : > { %v790_v25 = vld [vmem:[#allocation2 + $0xe0] sm:$0xff] }
 0x1cc   : > { %3817 = vmatmul.msk.f32.gmra.mxu1 %vm794_vm3, %v785_v2  ;;  %3821 = vmatmul.msk.f32.gmra.mxu2 %vm794_vm3, %v787_v7  ;;  %v788_v22 = vld [vmem:[#allocation2 + $0xd0] sm:$0xff] }
 0x1cd   : > { %3813 = vmatmul.msk.f32.gmra.mxu0 %vm794_vm3, %v783_v10  ;;  %3824 = vmatmul.msk.f32.vlgmr.msra.gmra.mxu3 %vm794_vm3, %v788_v22 }
 0x1ce   : > { %2393 = vmatpush.msrb.mxu0 %v4511_v11  ;;  %v793_v11 = vld [vmem:[#allocation2 + $0xf8] sm:$0x3] }
 0x1d0   : > { %2394 = vmatpush.msrb.mxu0 %v4522_v14  ;;  %v3843_v14 = vld [vmem:[%s4449_s15 + $0x18] sm:$0xff]  ;;  %s3972_s15 = smul.u32 160, %s4445_s7 }
 0x1d1   : > { %4054 = vset.pattern.permute.xlu2 %v4289_v57  ;;  %4058 = vset.pattern.permute.xlu0 %v4292_v28 }
 0x1d2   : > { %1583 = vperm.xlu2 %4054, %v4835_v5   ;;  %1683 = vperm.xlu0 %4058, %v4672_v20   ;;  %s6018_s0 = scalar_lea.vmem [#allocation9], %s3972_s15 }
 0x1d3   : > { %4059 = vset.pattern.permute.xlu1 %v4290_v24  ;;  %s3637_s22 = sshll.u32 %s6018_s0, 4  ;;  %s3638_s22 = int_to_ptr.vmem [resolvable:$true] %s3637_s22 }
 0x1d4   : > { %3832 = vmatmul.msk.f32.vlgmr.msrb.gmra.mxu1 %vm794_vm3, %v792_v8  ;;  %3877 = vmatmul.msk.f32.vlgmr.msrb.gmra.mxu2 %vm375_vm1, %v3842_v3 }
 0x1d5   : > { %3825 = vmatmul.msk.f32.gmra.mxu3 %vm794_vm3, %v789_v23  ;;  %3828 = vmatmul.msk.f32.vlgmr.msra.gmra.mxu0 %vm794_vm3, %v790_v25 }
 0x1d8   : > { %v4865_v31 = vpop.f32.mrf.mxu2 }
 0x1d9   : > { %v1484_v35 = vrot.slane %v4865_v31, 1  ;;  %v1812_v36 = vrot.slane %v4865_v31, 4  ;;  %v1588_v37 = vrot.slane %v4865_v31, 2  ;;  %v1692_v38 = vrot.slane %v4865_v31, 3 }
 0x1da   : > { %4056 = vset.pattern.permute.xlu2 %v6154_v27  ;;  %v1546_v39 = vrot.slane %v4865_v31, 6  ;;  %v1440_v40 = vrot.slane %v4865_v31, 5  ;;  %v1650_v41 = vrot.slane %v4865_v31, 7 }
 0x1db   : > { %1803 = vperm.xlu2 %4056, %v4672_v20  }
 0x1dc   : > { %3833 = vmatmul.msk.f32.gmra.mxu1 %vm794_vm3, %v793_v11  ;;  %3878 = vmatmul.msk.f32.gmra.mxu2 %vm375_vm1, %v3843_v14 }
 0x1dd   : > { %3829 = vmatmul.msk.f32.gmra.mxu0 %vm794_vm3, %v791_v26  ;;  %3880 = vmatmul.msk.f32.vlgmr.msrb.gmra.mxu3 %vm375_vm1, %v3842_v3 }
 0x1e3   : > { %4060 = vset.pattern.permute.xlu2 %v4290_v24 }
 0x1e5   : > { %3883 = vmatmul.msk.f32.vlgmr.msrb.gmra.mxu0 %vm375_vm1, %v3842_v3  ;;  %3881 = vmatmul.msk.f32.gmra.mxu3 %vm375_vm1, %v3843_v14 }
 0x1ed   : > { %3884 = vmatmul.msk.f32.gmra.mxu0 %vm375_vm1, %v3843_v14 }
 0x1f1   : > { %v4869_v34 = vpop.f32.mrf.mxu1 }
 0x1f2   : > { %v1377_v43 = vrot.slane %v4869_v34, 5  ;;  %v1592_v44 = vrot.slane %v4869_v34, 7  ;;  %v1817_v6 = vrot.slane %v4869_v34, 1  ;;  %v1488_v19 = vrot.slane %v4869_v34, 6 }
 0x1f9   : > { %v932_v17 = vpop.f32.mrf.mxu1 }
 0x1fa   : > { %v1774_v0 = vrot.slane %v932_v17, 5  ;;  %v1878_v15 = vrot.slane %v932_v17, 6 }
 0x200   : > { %v4878_v42 = vpop.f32.mrf.mxu3 }
 0x201   : > { %v4882_v45 = vpop.f32.mrf.mxu0  ;;  %v1485_v46 = vsel %vm1372_vm5, %v4878_v42, %v1484_v35  ;;  %v1813_v47 = vrot.slane %v4878_v42, 3  ;;  %v1371_v48 = vrot.slane %v4878_v42, 7  ;;  %v1589_v49 = vrot.slane %v4878_v42, 1 }
 0x202   : > { %v1486_v50 = vrot.slane %v4882_v45, 7  ;;  %v1815_v51 = vrot.slane %v4882_v45, 2  ;;  %v1374_v52 = vrot.slane %v4882_v45, 6  ;;  %v1693_v53 = vrot.slane %v4878_v42, 2 }
 0x203   : > { %v1814_v54 = vsel %vm1372_vm5, %v1813_v47, %v1812_v36  ;;  %v1373_v55 = vsel %vm1372_vm5, %v1371_v48, %v4865_v31  ;;  %v1590_v56 = vsel %vm1372_vm5, %v1589_v49, %v1588_v37  ;;  %v1695_v59 = vrot.slane %v4882_v45, 1 }
 0x204   : > { %v1487_v60 = vsel %vm1375_vm6, %v1486_v50, %v1485_v46  ;;  %v1816_v61 = vsel %vm1375_vm6, %v1815_v51, %v1814_v54  ;;  %v1376_v62 = vsel %vm1375_vm6, %v1374_v52, %v1373_v55  ;;  %v1591_v63 = vsel %vm1375_vm6, %v4882_v45, %v1590_v56 }
 0x205   : > { %v1379_v4 = vsel %vm1378_vm7, %v1377_v43, %v1376_v62  ;;  %v1593_v16 = vsel %vm1378_vm7, %v1592_v44, %v1591_v63  ;;  %v1694_v9 = vsel %vm1372_vm5, %v1693_v53, %v1692_v38  ;;  %v1547_v13 = vrot.slane %v4878_v42, 5 }
 0x206   : > { %v1441_v18 = vrot.slane %v4878_v42, 4  ;;  %v1696_v1 = vsel %vm1375_vm6, %v1695_v59, %v1694_v9  ;;  %v1818_v7 = vsel %vm1378_vm7, %v1817_v6, %v1816_v61  ;;  %v1489_v14 = vsel %vm1378_vm7, %v1488_v19, %v1487_v60 }
 0x207   : > { %v1697_v10 = vsel %vm1378_vm7, %v4869_v34, %v1696_v1  ;;  %v1548_v22 = vsel %vm1372_vm5, %v1547_v13, %v1546_v39  ;;  %v1551_v35 = vrot.slane %v4869_v34, 3  ;;  %v1443_v44 = vrot.slane %v4882_v45, 3 }
 0x208   : > { %v862_v21 = vpop.f32.mrf.mxu3  ;;  %v4912_v2 = vpop.f32.mrf.mxu2  ;;  %v1442_v3 = vsel %vm1372_vm5, %v1441_v18, %v1440_v40  ;;  %v1549_v40 = vrot.slane %v4882_v45, 4  ;;  %v1445_v46 = vrot.slane %v4869_v34, 2 }
 0x209   : > { %v1770_v23 = vrot.slane %v862_v21, 7  ;;  %v1875_v24 = vsel %vm1372_vm5, %v862_v21, %v1874_v12  ;;  %v1490_v8 = vrot.slane %v4912_v2, 5  ;;  %v1819_v25 = vsel %vm1381_vm8, %v4912_v2, %v1818_v7  ;;  %v4930_v38 = vpop.f32.mrf.mxu0 }
 0x20a   : > { %v1877_v11 = vsel %vm1375_vm6, %v1876_v33, %v1875_v24  ;;  %v1380_v26 = vrot.slane %v4912_v2, 4  ;;  %v1594_v47 = vrot.slane %v4912_v2, 6  ;;  %v1494_v48 = vrot.slane %v4930_v38, 3 }
 0x20b   : > { %v1771_v36 = vsel %vm1372_vm5, %v1770_v23, %v4863_v30  ;;  %v1879_v37 = vsel %vm1378_vm7, %v1878_v15, %v1877_v11  ;;  %v1491_v39 = vsel %vm1381_vm8, %v1490_v8, %v1489_v14  ;;  %v1822_v49 = vrot.slane %v4930_v38, 6 }
 0x20c   : > { %v1773_v33 = vsel %vm1375_vm6, %v1772_v32, %v1771_v36  ;;  %v1382_v43 = vsel %vm1381_vm8, %v1380_v26, %v1379_v4  ;;  %v1698_v29 = vrot.slane %v4912_v2, 7  ;;  %v1651_v32 = vrot.slane %v4878_v42, 6  ;;  %v4960_v4 = vpop.f32.mrf.mxu1 }
 0x20d   : > { %v1775_v30 = vsel %vm1378_vm7, %v1774_v0, %v1773_v33  ;;  %v1386_v50 = vrot.slane %v4930_v38, 2  ;;  %v1595_v51 = vsel %vm1381_vm8, %v1594_v47, %v1593_v16  ;;  %v1550_v52 = vsel %vm1375_vm6, %v1549_v40, %v1548_v22 }
 0x20e   : > { %v1553_v53 = vrot.slane %v4912_v2, 2  ;;  %v1598_v55 = vrot.slane %v4930_v38, 4  ;;  %v1699_v56 = vsel %vm1381_vm8, %v1698_v29, %v1697_v10  ;;  %v1552_v59 = vsel %vm1378_vm7, %v1551_v35, %v1550_v52 }
 0x20f   : > { %v1444_v60 = vsel %vm1375_vm6, %v1443_v44, %v1442_v3  ;;  %v1389_v10 = vrot.slane %v4960_v4, 1  ;;  %v1600_v22 = vrot.slane %v4960_v4, 3  ;;  %v1702_v3 = vrot.slane %v4930_v38, 5 }
 0x210   : > { %v4950_v54 = vpop.f32.mrf.mxu3  ;;  %v1554_v9 = vsel %vm1381_vm8, %v1553_v53, %v1552_v59  ;;  %v1653_v23 = vrot.slane %v4882_v45, 5  ;;  %v1447_v11 = vrot.slane %v4912_v2, 1  ;;  %v1655_v40 = vrot.slane %v4869_v34, 4 }
 0x211   : > { %v967_v61 = vpop.f32.mrf.mxu2  ;;  %v1492_v42 = vrot.slane %v4950_v54, 4  ;;  %v1820_v62 = vrot.slane %v4950_v54, 7  ;;  %v1383_v63 = vrot.slane %v4950_v54, 3  ;;  %v1596_v12 = vrot.slane %v4950_v54, 5  ;;  %v1037_v47 = vpop.f32.mrf.mxu0 }
 0x212   : > { %v1776_v16 = vrot.slane %v967_v61, 4  ;;  %v1880_v17 = vrot.slane %v967_v61, 5  ;;  %v1700_v6 = vrot.slane %v4950_v54, 6  ;;  %v1555_v36 = vrot.slane %v4950_v54, 1 }
 0x213   : > { %v1493_v13 = vsel %vm1384_vm9, %v1492_v42, %v1491_v39  ;;  %v1821_v18 = vsel %vm1384_vm9, %v1820_v62, %v1819_v25  ;;  %v1385_v0 = vsel %vm1384_vm9, %v1383_v63, %v1382_v43  ;;  %v1597_v15 = vsel %vm1384_vm9, %v1596_v12, %v1595_v51 }
 0x214   : > { %v1777_v19 = vsel %vm1381_vm8, %v1776_v16, %v1775_v30  ;;  %v1881_v1 = vsel %vm1381_vm8, %v1880_v17, %v1879_v37  ;;  %v4971_v21 = vsel %vm1387_vm10, %v1494_v48, %v1493_v13  ;;  %v4974_v7 = vsel %vm1387_vm10, %v1822_v49, %v1821_v18 }
 0x215   : > { %v1388_v24 = vsel %vm1387_vm10, %v1386_v50, %v1385_v0  ;;  %v1599_v8 = vsel %vm1387_vm10, %v1598_v55, %v1597_v15  ;;  %v1704_v25 = vrot.slane %v4960_v4, 4  ;;  %v1701_v35 = vsel %vm1384_vm9, %v1700_v6, %v1699_v56  ;;  %v1072_v50 = vpop.f32.mrf.mxu1 }
 0x216   : > { %v4985_v14 = vsel %vm1390_vm11, %v1389_v10, %v1388_v24  ;;  %v4988_v26 = vsel %vm1390_vm11, %v1600_v22, %v1599_v8  ;;  %v1703_v45 = vsel %vm1387_vm10, %v1702_v3, %v1701_v35  ;;  %v1558_v37 = vrot.slane %v4960_v4, 7 }
 0x217   : > { %v1446_v39 = vsel %vm1378_vm7, %v1445_v46, %v1444_v60  ;;  %v4997_v33 = vsel %vm1390_vm11, %v1704_v25, %v1703_v45  ;;  %v1556_v43 = vsel %vm1384_vm9, %v1555_v36, %v1554_v9  ;;  %v1450_v44 = vrot.slane %v4930_v38, 7 }
 0x218   : > { %v1452_v30 = vrot.slane %v4960_v4, 6  ;;  %v1557_v48 = vsel %vm1387_vm10, %v4930_v38, %v1556_v43  ;;  %v1448_v49 = vsel %vm1381_vm8, %v1447_v11, %v1446_v39  ;;  %v1652_v46 = vsel %vm1372_vm5, %v1651_v32, %v1650_v41  ;;  %v1002_v29 = vpop.f32.mrf.mxu3 }
 0x219   : > { %v1657_v34 = vrot.slane %v4912_v2, 3  ;;  %v5010_v51 = vsel %vm1390_vm11, %v1558_v37, %v1557_v48  ;;  %v1449_v52 = vsel %vm1384_vm9, %v4950_v54, %v1448_v49  ;;  %v1654_v53 = vsel %vm1375_vm6, %v1653_v23, %v1652_v46 }
 0x21a   : > { %v1659_v55 = vrot.slane %v4950_v54, 2  ;;  %v1882_v56 = vrot.slane %v1002_v29, 4  ;;  %v1451_v59 = vsel %vm1387_vm10, %v1450_v44, %v1449_v52  ;;  %v1656_v31 = vsel %vm1378_vm7, %v1655_v40, %v1654_v53 }
 0x21b   : > { %v1884_v41 = vrot.slane %v1037_v47, 3  ;;  %v5019_v2 = vsel %vm1390_vm11, %v1452_v30, %v1451_v59  ;;  %v1658_v32 = vsel %vm1381_vm8, %v1657_v34, %v1656_v31  ;;  %v1661_v60 = vrot.slane %v4930_v38, 1 }
 0x21c   : > { %v1886_v61 = vrot.slane %v1072_v50, 2  ;;  %v1660_v42 = vsel %vm1384_vm9, %v1659_v55, %v1658_v32  ;;  %v1883_v54 = vsel %vm1384_vm9, %v1882_v56, %v1881_v1  ;;  %v1778_v17 = vrot.slane %v1002_v29, 3 }
 0x21d   : > { %v1662_v62 = vsel %vm1387_vm10, %v1661_v60, %v1660_v42  ;;  %v1885_v12 = vsel %vm1387_vm10, %v1884_v41, %v1883_v54  ;;  %v1780_v6 = vrot.slane %v1037_v47, 2  ;;  %v1782_v9 = vrot.slane %v1072_v50, 1 }
 0x21e   : > { %v5028_v63 = vsel %vm1390_vm11, %v4960_v4, %v1662_v62  ;;  %v5032_v16 = vsel %vm1390_vm11, %v1886_v61, %v1885_v12  ;;  %v1779_v38 = vsel %vm1384_vm9, %v1778_v17, %v1777_v19 }
 0x21f   : > { %6168 = vst [vmem:[#allocation17_spill] sm:$0xff] %v5032_v16  ;;  %v1781_v13 = vsel %vm1387_vm10, %v1780_v6, %v1779_v38 }
 0x220   : > { %v5037_v18 = vsel %vm1390_vm11, %v1782_v9, %v1781_v13 }
 0x228   : > { %v1139_v0 = vpop.f32.mrf.mxu3 }
 0x229   : > { %v1392_v15 = vrot.slane %v1139_v0, 7  ;;  %v1603_v1 = vrot.slane %v1139_v0, 1  ;;  %v1707_v10 = vrot.slane %v1139_v0, 2  ;;  %v1827_v22 = vrot.slane %v1139_v0, 3 }
 0x22a   : > { %v1561_v23 = vrot.slane %v1139_v0, 5  ;;  %v1455_v24 = vrot.slane %v1139_v0, 4  ;;  %v1665_v8 = vrot.slane %v1139_v0, 6 }
 0x230   : > { %v1142_v45 = vpop.f32.mrf.mxu3 }
 0x231   : > { %v1784_v34 = vrot.slane %v1142_v45, 7 }
 0x237   : > { %v1104_v3 = vpop.f32.mrf.mxu2 }
 0x238   : > { %v1498_v25 = vrot.slane %v1104_v3, 1  ;;  %v1602_v11 = vrot.slane %v1104_v3, 2  ;;  %v1706_v35 = vrot.slane %v1104_v3, 3  ;;  %v1826_v36 = vrot.slane %v1104_v3, 4 }
 0x239   : > { %v1393_v19 = vsel %vm1372_vm5, %v1392_v15, %v1104_v3  ;;  %v1560_v37 = vrot.slane %v1104_v3, 6  ;;  %v1454_v39 = vrot.slane %v1104_v3, 5  ;;  %v1664_v40 = vrot.slane %v1104_v3, 7 }
 0x23a   : > { %v1499_v43 = vsel %vm1372_vm5, %v1139_v0, %v1498_v25  ;;  %v1828_v44 = vsel %vm1372_vm5, %v1827_v22, %v1826_v36  ;;  %v1604_v30 = vsel %vm1372_vm5, %v1603_v1, %v1602_v11  ;;  %v1708_v47 = vsel %vm1372_vm5, %v1707_v10, %v1706_v35 }
 0x23b   : > { %v1562_v48 = vsel %vm1372_vm5, %v1561_v23, %v1560_v37  ;;  %v1456_v49 = vsel %vm1372_vm5, %v1455_v24, %v1454_v39  ;;  %v1666_v46 = vsel %vm1372_vm5, %v1665_v8, %v1664_v40 }
 0x23f   : > { %v1107_v29 = vpop.f32.mrf.mxu2 }
 0x240   : > { %v1785_v50 = vsel %vm1372_vm5, %v1784_v34, %v1107_v29  ;;  %v1888_v52 = vrot.slane %v1107_v29, 1 }
 0x241   : > { %v1209_v53 = vpop.f32.mrf.mxu1 }
 0x242   : > { %v1889_v55 = vsel %vm1372_vm5, %v1142_v45, %v1888_v52  ;;  %v1174_v56 = vpop.f32.mrf.mxu0  ;;  %v1502_v59 = vrot.slane %v1209_v53, 6  ;;  %v1831_v31 = vrot.slane %v1209_v53, 1  ;;  %v1396_v41 = vrot.slane %v1209_v53, 5 }
 0x243   : > { %v1500_v32 = vrot.slane %v1174_v56, 7  ;;  %v1829_v60 = vrot.slane %v1174_v56, 2  ;;  %v1394_v61 = vrot.slane %v1174_v56, 6  ;;  %v1605_v42 = vsel %vm1375_vm6, %v1174_v56, %v1604_v30 }
 0x244   : > { %v1606_v62 = vrot.slane %v1209_v53, 7  ;;  %v1709_v54 = vrot.slane %v1174_v56, 1  ;;  %v1563_v12 = vrot.slane %v1174_v56, 4  ;;  %v1565_v17 = vrot.slane %v1209_v53, 3 }
 0x245   : > { %v1501_v6 = vsel %vm1375_vm6, %v1500_v32, %v1499_v43  ;;  %v1830_v9 = vsel %vm1375_vm6, %v1829_v60, %v1828_v44  ;;  %v1395_v38 = vsel %vm1375_vm6, %v1394_v61, %v1393_v19  ;;  %v1457_v13 = vrot.slane %v1174_v56, 3 }
 0x246   : > { %v1503_v0 = vsel %vm1378_vm7, %v1502_v59, %v1501_v6  ;;  %v1832_v15 = vsel %vm1378_vm7, %v1831_v31, %v1830_v9  ;;  %v1397_v1 = vsel %vm1378_vm7, %v1396_v41, %v1395_v38  ;;  %v1607_v10 = vsel %vm1378_vm7, %v1606_v62, %v1605_v42 }
 0x247   : > { %v1244_v22 = vpop.f32.mrf.mxu2  ;;  %v1710_v3 = vsel %vm1375_vm6, %v1709_v54, %v1708_v47  ;;  %v1564_v23 = vsel %vm1375_vm6, %v1563_v12, %v1562_v48  ;;  %v1458_v24 = vsel %vm1375_vm6, %v1457_v13, %v1456_v49  ;;  %v1459_v8 = vrot.slane %v1209_v53, 2 }
 0x248   : > { %v1504_v25 = vrot.slane %v1244_v22, 5  ;;  %v1833_v11 = vsel %vm1381_vm8, %v1244_v22, %v1832_v15  ;;  %v1398_v35 = vrot.slane %v1244_v22, 4  ;;  %v1608_v36 = vrot.slane %v1244_v22, 6 }
 0x249   : > { %v1212_v45 = vpop.f32.mrf.mxu1  ;;  %v1711_v19 = vsel %vm1378_vm7, %v1209_v53, %v1710_v3  ;;  %v1712_v37 = vrot.slane %v1244_v22, 7  ;;  %v1566_v39 = vsel %vm1378_vm7, %v1565_v17, %v1564_v23  ;;  %v1567_v40 = vrot.slane %v1244_v22, 2 }
 0x24a   : > { %v1177_v43 = vpop.f32.mrf.mxu0  ;;  %v1788_v44 = vrot.slane %v1212_v45, 5  ;;  %v1892_v30 = vrot.slane %v1212_v45, 6  ;;  %v1505_v47 = vsel %vm1381_vm8, %v1504_v25, %v1503_v0  ;;  %v1399_v48 = vsel %vm1381_vm8, %v1398_v35, %v1397_v1 }
 0x24b   : > { %v1786_v49 = vrot.slane %v1177_v43, 6  ;;  %v1890_v34 = vrot.slane %v1177_v43, 7  ;;  %v1609_v29 = vsel %vm1381_vm8, %v1608_v36, %v1607_v10  ;;  %v5067_v52 = vsel %vm1381_vm8, %v1712_v37, %v1711_v19 }
 0x24c   : > { %v5070_v59 = vsel %vm1381_vm8, %v1567_v40, %v1566_v39  ;;  %v1460_v31 = vsel %vm1378_vm7, %v1459_v8, %v1458_v24  ;;  %v1461_v41 = vrot.slane %v1244_v22, 1  ;;  %v1667_v32 = vrot.slane %v1174_v56, 5 }
 0x24d   : > { %v1787_v60 = vsel %vm1375_vm6, %v1786_v49, %v1785_v50  ;;  %v1891_v61 = vsel %vm1375_vm6, %v1890_v34, %v1889_v55  ;;  %v1669_v42 = vrot.slane %v1209_v53, 4  ;;  %v1671_v62 = vrot.slane %v1244_v22, 3 }
 0x24e   : > { %v1789_v54 = vsel %vm1378_vm7, %v1788_v44, %v1787_v60  ;;  %v1893_v12 = vsel %vm1378_vm7, %v1892_v30, %v1891_v61  ;;  %v5078_v17 = vsel %vm1381_vm8, %v1461_v41, %v1460_v31  ;;  %v1668_v6 = vsel %vm1375_vm6, %v1667_v32, %v1666_v46 }
 0x24f   : > { %v1247_v9 = vpop.f32.mrf.mxu2  ;;  %v1670_v38 = vsel %vm1378_vm7, %v1669_v42, %v1668_v6 }
 0x250   : > { %v1790_v13 = vrot.slane %v1247_v9, 4  ;;  %v1894_v56 = vrot.slane %v1247_v9, 5  ;;  %v5082_v0 = vpop.f32.mrf.mxu3  ;;  %v5085_v50 = vsel %vm1381_vm8, %v1671_v62, %v1670_v38 }
 0x251   : > { %v5087_v53 = vpop.f32.mrf.mxu1  ;;  %v1506_v55 = vrot.slane %v5082_v0, 4  ;;  %v1834_v15 = vrot.slane %v5082_v0, 7  ;;  %v1400_v1 = vrot.slane %v5082_v0, 3  ;;  %v1610_v46 = vrot.slane %v5082_v0, 5 }
 0x252   : > { %v5094_v10 = vsel %vm1381_vm8, %v1790_v13, %v1789_v54  ;;  %v1895_v22 = vsel %vm1381_vm8, %v1894_v56, %v1893_v12  ;;  %v5097_v3 = vpop.f32.mrf.mxu0  ;;  %v1404_v45 = vrot.slane %v5087_v53, 1  ;;  %v1714_v60 = vrot.slane %v5082_v0, 6 }
 0x253   : > { %v1507_v23 = vsel %vm1384_vm9, %v1506_v55, %v1505_v47  ;;  %v1508_v24 = vrot.slane %v5097_v3, 3  ;;  %v1835_v8 = vsel %vm1384_vm9, %v1834_v15, %v1833_v11  ;;  %v1836_v25 = vrot.slane %v5097_v3, 6 }
 0x254   : > { %v1401_v35 = vsel %vm1384_vm9, %v1400_v1, %v1399_v48  ;;  %v1402_v36 = vrot.slane %v5097_v3, 2  ;;  %v1611_v19 = vsel %vm1384_vm9, %v1610_v46, %v1609_v29  ;;  %v1612_v40 = vrot.slane %v5097_v3, 4 }
 0x255   : > { %v5108_v37 = vsel %vm1387_vm10, %v1508_v24, %v1507_v23  ;;  %v5111_v39 = vsel %vm1387_vm10, %v1836_v25, %v1835_v8  ;;  %v1614_v47 = vrot.slane %v5087_v53, 3  ;;  %v1716_v54 = vrot.slane %v5097_v3, 5 }
 0x256   : > { %v1403_v11 = vsel %vm1387_vm10, %v1402_v36, %v1401_v35  ;;  %v1613_v30 = vsel %vm1387_vm10, %v1612_v40, %v1611_v19  ;;  %v1718_v6 = vrot.slane %v5087_v53, 4  ;;  %v1715_v56 = vsel %vm1384_vm9, %v1714_v60, %v5067_v52 }
 0x257   : > { %v5115_v43 = vpop.f32.mrf.mxu2  ;;  %v5118_v44 = vsel %vm1390_vm11, %v1404_v45, %v1403_v11  ;;  %v5145_v13 = vsel %vm1390_vm11, %v1614_v47, %v1613_v30  ;;  %v1569_v55 = vrot.slane %v5082_v0, 1  ;;  %v1572_v15 = vrot.slane %v5087_v53, 7 }
 0x258   : > { %v1282_v48 = vpop.f32.mrf.mxu3  ;;  %2109 = vst.msk [vmem:[#allocation2] sm:$0x1] %vm465_vm2, %v5115_v43  ;;  %v2125_v49 = vperm.slane %v5115_v43, 0  ;;  %v2082_v34 = vrot.slane %v5115_v43, 2  ;;  %v2081_v29 = vrot.slane %v5115_v43, 1  ;;  %v2085_v31 = vrot.slane %v5115_v43, 5 }
 0x259   : > { %v1896_v41 = vrot.slane %v1282_v48, 4  ;;  %v2083_v32 = vrot.slane %v5115_v43, 3  ;;  %v2084_v62 = vrot.slane %v5115_v43, 4  ;;  %v2086_v9 = vrot.slane %v5115_v43, 6 }
 0x25a   : > { %v1317_v61 = vpop.f32.mrf.mxu0  ;;  %2205 = vrot.lane.b32.xlu0 %v2125_v49, %s4287_s9  ;;  %2141 = vrot.lane.b32.xlu2 %v2125_v49, %s4288_s20  ;;  %v5132_v42 = vperm.slane %v2082_v34, 0  ;;  %2111 = vst.msk [vmem:[#allocation2 + $0x20] sm:$0x1] %vm465_vm2, %v2082_v34  ;;  %v2087_v38 = vrot.slane %v5115_v43, 7  ;;  %v1792_v46 = vrot.slane %v1282_v48, 3  ;;  %v1717_v23 = vsel %vm1387_vm10, %v1716_v54, %v1715_v56 }
 0x25b   : > { %v1898_v12 = vrot.slane %v1317_v61, 3  ;;  %2110 = vst.msk [vmem:[#allocation2 + $0x10] sm:$0x1] %vm465_vm2, %v2081_v29  ;;  %v1897_v1 = vsel %vm1384_vm9, %v1896_v41, %v1895_v22  ;;  %v1794_v8 = vrot.slane %v1317_v61, 2  ;;  %v5162_v52 = vsel %vm1390_vm11, %v1718_v6, %v1717_v23 }
 0x25c   : > { %2273 = vrot.lane.b32.xlu1 %v5132_v42, %s4286_s30  ;;  %2114 = vst.msk [vmem:[#allocation2 + $0x50] sm:$0x1] %vm465_vm2, %v2085_v31  ;;  %v1570_v35 = vsel %vm1384_vm9, %v1569_v55, %v5070_v59  ;;  %v1463_v22 = vsel %vm1384_vm9, %v5082_v0, %v5078_v17  ;;  %v2126_v36 = vperm.slane %v2081_v29, 0  ;;  %v1464_v40 = vrot.slane %v5097_v3, 7  ;;  %v5248_v55 = vpop.permute.xlu2 %1479 }
 0x25d   : > { %2112 = vst.msk [vmem:[#allocation2 + $0x30] sm:$0x1] %vm465_vm2, %v2083_v32  ;;  %v5156_v24 = vsel %vm1387_vm10, %v1898_v12, %v1897_v1  ;;  %v1571_v19 = vsel %vm1387_vm10, %v5097_v3, %v1570_v35  ;;  %v1466_v59 = vrot.slane %v5087_v53, 6  ;;  %v1673_v17 = vrot.slane %v5082_v0, 2 }
 0x25e   : > { %2113 = vst.msk [vmem:[#allocation2 + $0x40] sm:$0x1] %vm465_vm2, %v2084_v62  ;;  %v5177_v11 = vsel %vm1390_vm11, %v1572_v15, %v1571_v19  ;;  %v1675_v43 = vrot.slane %v5097_v3, 1  ;;  %v2130_v30 = vperm.slane %v2085_v31, 0  ;;  %v1465_v48 = vsel %vm1387_vm10, %v1464_v40, %v1463_v22  ;;  %v3845_v40 = vld [vmem:[%s4457_s6 + $0x108] sm:$0xff] }
 0x25f   : > { %6169 = vst [vmem:[#allocation18_spill] sm:$0xff] %v5156_v24  ;;  %v5158_v25 = vpop.f32.mrf.mxu2  ;;  %v1793_v34 = vsel %vm1384_vm9, %v1792_v46, %v5094_v10  ;;  %v5190_v29 = vsel %vm1390_vm11, %v1466_v59, %v1465_v48  ;;  %v1674_v0 = vsel %vm1384_vm9, %v1673_v17, %v5085_v50  ;;  %v2128_v10 = vperm.slane %v2083_v32, 0  ;;  %3885 = vmatpush.xpose.msk.msra.mxu1 %vm794_vm3, %v3845_v40  ;;  %v3844_v17 = vld [vmem:[%s4457_s6 + $0x100] sm:$0xff]  ;;  %v5295_v48 = vpop.permute.xlu1 %1474  ;;  %v3851_v40 = vld [vmem:[%s4457_s6 + $0x138] sm:$0xff] }
 0x260   : > { %2115 = vst.msk [vmem:[#allocation2 + $0x60] sm:$0x1] %vm465_vm2, %v2086_v9  ;;  %v2094_v45 = vrot.slane %v5158_v25, 7  ;;  %v2090_v47 = vrot.slane %v5158_v25, 3  ;;  %v5195_v3 = vsel %vm1387_vm10, %v1794_v8, %v1793_v34  ;;  %v5205_v41 = vperm.slane %v5158_v25, 0  ;;  %v2073_v23 = vpop.f32.mrf.mxu3  ;;  %3897 = vmatpush.xpose.msk.msra.mxu0 %vm794_vm3, %v3851_v40 }
 0x261   : > { %2117 = vst.msk [vmem:[#allocation2 + $0x80] sm:$0x1] %vm465_vm2, %v5158_v25  ;;  %v2093_v50 = vrot.slane %v5158_v25, 6  ;;  %v2129_v60 = vperm.slane %v2084_v62, 0  ;;  %v2131_v32 = vperm.slane %v2086_v9, 0  ;;  %v2132_v61 = vperm.slane %v2087_v38, 0 }
 0x262   : > { %2116 = vst.msk [vmem:[#allocation2 + $0x70] sm:$0x1] %vm465_vm2, %v2087_v38  ;;  %2269 = vrot.lane.b32.xlu2 %v2125_v49, %s4286_s30  ;;  %2143 = vrot.lane.b32.xlu0 %v2126_v36, %s4288_s20  ;;  %v1676_v49 = vsel %vm1387_vm10, %v1675_v43, %v1674_v0  ;;  %v5218_v54 = vperm.slane %v2094_v45, 0  ;;  %v5224_v12 = vperm.slane %v2090_v47, 0  ;;  %v5237_v6 = vpop.f32.mrf.mxu0  ;;  %v2089_v9 = vrot.slane %v5158_v25, 2 }
 0x263   : > { %2124 = vst.msk [vmem:[#allocation2 + $0xf0] sm:$0x1] %vm465_vm2, %v2094_v45  ;;  %v5202_v31 = vsel %vm1390_vm11, %v5087_v53, %v1676_v49  ;;  %v5231_v62 = vperm.slane %v2093_v50, 0  ;;  %v2091_v38 = vrot.slane %v5158_v25, 4  ;;  %v2092_v56 = vrot.slane %v5158_v25, 5  ;;  %3886 = vmatpush.xpose.msk.msra.mxu1 %vm794_vm3, %v3844_v17 }
 0x264   : > { %2279 = vrot.lane.b32.xlu1 %v2130_v30, %s4286_s30  ;;  %2120 = vst.msk [vmem:[#allocation2 + $0xb0] sm:$0x1] %vm465_vm2, %v2090_v47  ;;  %v5258_v1 = vpop.permute.xlu2 %1583  ;;  %v6153_v46 = vmov 4   ;;  %v2336_v8 = vrot.slane %v2073_v23, 2  ;;  %v2338_v22 = vrot.slane %v2073_v23, 4  ;;  %v2340_v19 = vrot.slane %v2073_v23, 6  ;;  %v5289_v47 = vpop.permute.xlu0 %1807 }
 0x265   : > { %2123 = vst.msk [vmem:[#allocation2 + $0xe0] sm:$0x1] %vm465_vm2, %v2093_v50  ;;  %v2341_v59 = vrot.slane %v2073_v23, 7  ;;  %v5298_v0 = vperm.slane %v2091_v38, 0  ;;  %v5300_v49 = vperm.slane %v2092_v56, 0 }
 0x266   : > { %2119 = vst.msk [vmem:[#allocation2 + $0xa0] sm:$0x1] %vm465_vm2, %v2089_v9 }
 0x267   : > { %2121 = vst.msk [vmem:[#allocation2 + $0xc0] sm:$0x1] %vm465_vm2, %v2091_v38  ;;  %v5309_v50 = vpop.permute.xlu1 %1687 }
 0x268   : > { %2122 = vst.msk [vmem:[#allocation2 + $0xd0] sm:$0x1] %vm465_vm2, %v2092_v56 }
 0x269   : > { %2363 = vst.msk [vmem:[#allocation2 + $0x4] sm:$0x1] %vm465_vm2, %v2073_v23 }
 0x26a   : > { %2145 = vrot.lane.b32.xlu2 %v5132_v42, %s4288_s20  ;;  %2147 = vrot.lane.b32.xlu0 %v2128_v10, %s4288_s20  ;;  %v5253_v15 = vpop.f32.mrf.mxu0  ;;  %2365 = vst.msk [vmem:[#allocation2 + $0x24] sm:$0x1] %vm465_vm2, %v2336_v8  ;;  %v3848_v8 = vld [vmem:[%s4457_s6 + $0x120] sm:$0xff] }
 0x26b   : > { %2367 = vst.msk [vmem:[#allocation2 + $0x44] sm:$0x1] %vm465_vm2, %v2338_v22 }
 0x26c   : > { %2157 = vrot.lane.b32.xlu1 %v5205_v41, %s4288_s20  ;;  %v5267_v35 = vpop.permute.xlu2 %1803  ;;  %2369 = vst.msk [vmem:[#allocation2 + $0x64] sm:$0x1] %vm465_vm2, %v2340_v19  ;;  %v1510_v19 = vrot.slane %v5087_v53, 2 }
 0x26d   : > { %2370 = vst.msk [vmem:[#allocation2 + $0x74] sm:$0x1] %vm465_vm2, %v2341_v59 }
 0x272   : > { %2149 = vrot.lane.b32.xlu2 %v2129_v60, %s4288_s20  ;;  %2151 = vrot.lane.b32.xlu0 %v2130_v30, %s4288_s20 }
 0x274   : > { %2285 = vrot.lane.b32.xlu1 %v5205_v41, %s4286_s30 }
 0x27a   : > { %2153 = vrot.lane.b32.xlu2 %v2131_v32, %s4288_s20  ;;  %2155 = vrot.lane.b32.xlu0 %v2132_v61, %s4288_s20 }
 0x27c   : > { %2235 = vrot.lane.b32.xlu1 %v5218_v54, %s4287_s9 }
 0x282   : > { %2207 = vrot.lane.b32.xlu2 %v2126_v36, %s4287_s9  ;;  %2209 = vrot.lane.b32.xlu0 %v5132_v42, %s4287_s9  ;;  %v2088_v42 = vrot.slane %v5158_v25, 1  ;;  %v2337_v25 = vrot.slane %v2073_v23, 3 }
 0x284   : > { %2291 = vrot.lane.b32.xlu1 %v5224_v12, %s4286_s30  ;;  %2118 = vst.msk [vmem:[#allocation2 + $0x90] sm:$0x1] %vm465_vm2, %v2088_v42  ;;  %v5270_v45 = vperm.slane %v2088_v42, 0 }
 0x285   : > { %2366 = vst.msk [vmem:[#allocation2 + $0x34] sm:$0x1] %vm465_vm2, %v2337_v25 }
 0x28a   : > { %2211 = vrot.lane.b32.xlu2 %v2128_v10, %s4287_s9  ;;  %2213 = vrot.lane.b32.xlu0 %v2129_v60, %s4287_s9 }
 0x28c   : > { %2297 = vrot.lane.b32.xlu1 %v5231_v62, %s4286_s30 }
 0x292   : > { %2215 = vrot.lane.b32.xlu2 %v2130_v30, %s4287_s9  ;;  %2217 = vrot.lane.b32.xlu0 %v2131_v32, %s4287_s9  ;;  %v5287_v30 = vperm.slane %v2089_v9, 0 }
 0x294   : > { %3106 = vperm.xlu1 %4059, %v5237_v6  }
 0x29a   : > { %2219 = vrot.lane.b32.xlu2 %v2132_v61, %s4287_s9  ;;  %2271 = vrot.lane.b32.xlu0 %v2126_v36, %s4286_s30  ;;  %v2339_v36 = vrot.slane %v2073_v23, 5 }
 0x29c   : > { %4062 = vset.pattern.permute.xlu1 %v4292_v28  ;;  %v2335_v28 = vrot.slane %v2073_v23, 1  ;;  %2368 = vst.msk [vmem:[#allocation2 + $0x54] sm:$0x1] %vm465_vm2, %v2339_v36  ;;  %v3849_v23 = vld [vmem:[%s4457_s6 + $0x128] sm:$0xff] }
 0x29d   : > { %3319 = vperm.xlu1 %4062, %v5253_v15   ;;  %3893 = vmatpush.xpose.msk.msra.mxu3 %vm794_vm3, %v3849_v23 }
 0x29e   : > { %2364 = vst.msk [vmem:[#allocation2 + $0x14] sm:$0x1] %vm465_vm2, %v2335_v28  ;;  %v1496_v28 = vrot.slane %v4960_v4, 2 }
 0x2a0   : > { %v1497_v25 = vsel %vm1390_vm11, %v1496_v28, %v4971_v21  ;;  %v1511_v21 = vsel %vm1390_vm11, %v1510_v19, %v5108_v37  ;;  %v3856_v37 = vld [vmem:[%s4457_s6 + $0x160] sm:$0xff] }
 0x2a1   : > { %3894 = vmatpush.xpose.msk.msra.mxu3 %vm794_vm3, %v3848_v8  ;;  %v2076_v8 = vpop.f32.mrf.mxu3 }
 0x2a2   : > { %2275 = vrot.lane.b32.xlu2 %v2128_v10, %s4286_s30  ;;  %2277 = vrot.lane.b32.xlu0 %v2129_v60, %s4286_s30  ;;  %v5306_v10 = vpop.permute.xlu0 %1683  ;;  %v2343_v19 = vrot.slane %v2076_v8, 2  ;;  %v2344_v40 = vrot.slane %v2076_v8, 3  ;;  %2371 = vst.msk [vmem:[#allocation2 + $0x84] sm:$0x1] %vm465_vm2, %v2076_v8 }
 0x2a4   : > { %2373 = vst.msk [vmem:[#allocation2 + $0xa4] sm:$0x1] %vm465_vm2, %v2343_v19  ;;  %v2413_v19 = vld [vmem:[#allocation2 + $0x58] sm:$0x3] }
 0x2a5   : > { %4066 = vset.pattern.permute.xlu1 %v6153_v46  ;;  %2374 = vst.msk [vmem:[#allocation2 + $0xb4] sm:$0x1] %vm465_vm2, %v2344_v40 }
 0x2a6   : > { %3539 = vperm.xlu1 %4066, %v5237_v6  }
 0x2aa   : > { %2281 = vrot.lane.b32.xlu2 %v2131_v32, %s4286_s30  ;;  %2283 = vrot.lane.b32.xlu0 %v2132_v61, %s4286_s30 }
 0x2b2   : > { %2221 = vrot.lane.b32.xlu0 %v5205_v41, %s4287_s9  ;;  %2159 = vrot.lane.b32.xlu2 %v5270_v45, %s4288_s20 }
 0x2b4   : > { %v2142_v43 = vpop.permute.xlu2 %2141 }
 0x2b5   : > { %2189 = vst.msk [vmem:[#allocation2 + $0x1] sm:$0x1] %vm465_vm2, %v2142_v43  ;;  %v3857_v43 = vld [vmem:[%s4457_s6 + $0x168] sm:$0xff] }
 0x2b6   : > { %3909 = vmatpush.xpose.msk.msrb.mxu3 %vm794_vm3, %v3857_v43 }
 0x2ba   : > { %2161 = vrot.lane.b32.xlu0 %v5287_v30, %s4288_s20  ;;  %2163 = vrot.lane.b32.xlu2 %v5224_v12, %s4288_s20 }
 0x2bb   : > { %3910 = vmatpush.xpose.msk.msrb.mxu3 %vm794_vm3, %v3856_v37  ;;  %v2346_v37 = vrot.slane %v2076_v8, 5 }
 0x2bc   : > { %v2270_v34 = vpop.permute.xlu2 %2269 }
 0x2bd   : > { %2317 = vst.msk [vmem:[#allocation2 + $0x3] sm:$0x1] %vm465_vm2, %v2270_v34 }
 0x2be   : > { %2376 = vst.msk [vmem:[#allocation2 + $0xd4] sm:$0x1] %vm465_vm2, %v2346_v37 }
 0x2c2   : > { %2165 = vrot.lane.b32.xlu0 %v5298_v0, %s4288_s20  ;;  %2167 = vrot.lane.b32.xlu2 %v5300_v49, %s4288_s20 }
 0x2c4   : > { %v2146_v41 = vpop.permute.xlu2 %2145 }
 0x2c5   : > { %2191 = vst.msk [vmem:[#allocation2 + $0x21] sm:$0x1] %vm465_vm2, %v2146_v41 }
 0x2ca   : > { %2169 = vrot.lane.b32.xlu0 %v5231_v62, %s4288_s20  ;;  %2171 = vrot.lane.b32.xlu2 %v5218_v54, %s4288_s20 }
 0x2cc   : > { %v2206_v60 = vpop.permute.xlu0 %2205  ;;  %v2150_v32 = vpop.permute.xlu2 %2149 }
 0x2cd   : > { %2253 = vst.msk [vmem:[#allocation2 + $0x2] sm:$0x1] %vm465_vm2, %v2206_v60 }
 0x2ce   : > { %2193 = vst.msk [vmem:[#allocation2 + $0x41] sm:$0x1] %vm465_vm2, %v2150_v32  ;;  %v2274_v61 = vpop.permute.xlu1 %2273 }
 0x2cf   : > { %2319 = vst.msk [vmem:[#allocation2 + $0x23] sm:$0x1] %vm465_vm2, %v2274_v61  ;;  %v3847_v61 = vld [vmem:[%s4457_s6 + $0x118] sm:$0xff] }
 0x2d0   : > { %3889 = vmatpush.xpose.msk.msra.mxu2 %vm794_vm3, %v3847_v61  ;;  %v2409_v61 = vld [vmem:[#allocation2 + $0x38] sm:$0x3] }
 0x2d2   : > { %2225 = vrot.lane.b32.xlu0 %v5287_v30, %s4287_s9  ;;  %2223 = vrot.lane.b32.xlu2 %v5270_v45, %s4287_s9 }
 0x2d4   : > { %v2154_v42 = vpop.permute.xlu2 %2153  ;;  %v2144_v9 = vpop.permute.xlu0 %2143  ;;  %v2402_v38 = vld [vmem:[#allocation2] sm:$0xff] }
 0x2d5   : > { %2195 = vst.msk [vmem:[#allocation2 + $0x61] sm:$0x1] %vm465_vm2, %v2154_v42  ;;  %3887 = vmatmul.msk.f32.vlgmr.msra.gmra.mxu1 %vm794_vm3, %v2402_v38  ;;  %v3853_v38 = vld [vmem:[%s4457_s6 + $0x148] sm:$0xff] }
 0x2d6   : > { %2190 = vst.msk [vmem:[#allocation2 + $0x11] sm:$0x1] %vm465_vm2, %v2144_v9  ;;  %v2280_v56 = vpop.permute.xlu1 %2279  ;;  %v2403_v9 = vld [vmem:[#allocation2 + $0x8] sm:$0x3]  ;;  %3901 = vmatpush.xpose.msk.msrb.mxu1 %vm794_vm3, %v3853_v38  ;;  %v3867_v38 = vld [vmem:[%s4457_s6 + $0x1b8] sm:$0xff] }
 0x2d7   : > { %2322 = vst.msk [vmem:[#allocation2 + $0x53] sm:$0x1] %vm465_vm2, %v2280_v56 }
 0x2da   : > { %2229 = vrot.lane.b32.xlu0 %v5298_v0, %s4287_s9  ;;  %2227 = vrot.lane.b32.xlu2 %v5224_v12, %s4287_s9  ;;  %v3850_v12 = vld [vmem:[%s4457_s6 + $0x130] sm:$0xff] }
 0x2db   : > { %1514 = vxpose.xlu1.b32.start [1/2] (short) (narrow) %v1497_v25, 16  ;;  %3898 = vmatpush.xpose.msk.msra.mxu0 %vm794_vm3, %v3850_v12  ;;  %v3855_v25 = vld [vmem:[%s4457_s6 + $0x158] sm:$0xff]  ;;  %v3854_v12 = vld [vmem:[%s4457_s6 + $0x150] sm:$0xff] }
 0x2dc   : > { %v2208_v22 = vpop.permute.xlu2 %2207  ;;  %v2148_v36 = vpop.permute.xlu0 %2147 }
 0x2dd   : > { %2254 = vst.msk [vmem:[#allocation2 + $0x12] sm:$0x1] %vm465_vm2, %v2208_v22  ;;  %3888 = vmatmul.msk.f32.gmra.mxu1 %vm794_vm3, %v2403_v9  ;;  %v3859_v22 = vld [vmem:[%s4457_s6 + $0x178] sm:$0xff] }
 0x2de   : > { %2192 = vst.msk [vmem:[#allocation2 + $0x31] sm:$0x1] %vm465_vm2, %v2148_v36  ;;  %v2158_v34 = vpop.permute.xlu1 %2157  ;;  %v2342_v36 = vrot.slane %v2076_v8, 1 }
 0x2df   : > { %2197 = vst.msk [vmem:[#allocation2 + $0x81] sm:$0x1] %vm465_vm2, %v2158_v34  ;;  %3913 = vmatpush.xpose.msk.msrb.mxu0 %vm794_vm3, %v3859_v22 }
 0x2e0   : > { %2372 = vst.msk [vmem:[#allocation2 + $0x94] sm:$0x1] %vm465_vm2, %v2342_v36  ;;  %v3862_v36 = vld [vmem:[%s4457_s6 + $0x190] sm:$0xff] }
 0x2e2   : > { %2233 = vrot.lane.b32.xlu0 %v5231_v62, %s4287_s9  ;;  %2231 = vrot.lane.b32.xlu2 %v5300_v49, %s4287_s9  ;;  %v1824_v62 = vrot.slane %v4960_v4, 5  ;;  %v1838_v4 = vrot.slane %v5087_v53, 5 }
 0x2e3   : > { %1515 = vxpose.xlu1.b32.end [2/2] (short) (narrow) %v1511_v21, 16  ;;  %v3858_v21 = vld [vmem:[%s4457_s6 + $0x170] sm:$0xff] }
 0x2e4   : > { %v2212_v59 = vpop.permute.xlu2 %2211  ;;  %v2152_v17 = vpop.permute.xlu0 %2151  ;;  %v1825_v41 = vsel %vm1390_vm11, %v1824_v62, %v4974_v7  ;;  %v1839_v7 = vsel %vm1390_vm11, %v1838_v4, %v5111_v39  ;;  %v3852_v39 = vld [vmem:[%s4457_s6 + $0x140] sm:$0xff]  ;;  %3914 = vmatpush.xpose.msk.msrb.mxu0 %vm794_vm3, %v3858_v21 }
 0x2e5   : > { %2256 = vst.msk [vmem:[#allocation2 + $0x32] sm:$0x1] %vm465_vm2, %v2212_v59  ;;  %3902 = vmatpush.xpose.msk.msrb.mxu1 %vm794_vm3, %v3852_v39  ;;  %v2407_v59 = vld [vmem:[#allocation2 + $0x28] sm:$0x3]  ;;  %v3860_v4 = vld [vmem:[%s4457_s6 + $0x180] sm:$0xff] }
 0x2e6   : > { %2194 = vst.msk [vmem:[#allocation2 + $0x51] sm:$0x1] %vm465_vm2, %v2152_v17  ;;  %v2345_v17 = vrot.slane %v2076_v8, 4  ;;  %v2405_v39 = vld [vmem:[#allocation2 + $0x18] sm:$0x3] }
 0x2e8   : > { %2375 = vst.msk [vmem:[#allocation2 + $0xc4] sm:$0x1] %vm465_vm2, %v2345_v17  ;;  %v3869_v17 = vld [vmem:[%s4457_s6 + $0x1c8] sm:$0xff] }
 0x2ea   : > { %2289 = vrot.lane.b32.xlu0 %v5287_v30, %s4286_s30  ;;  %2287 = vrot.lane.b32.xlu2 %v5270_v45, %s4286_s30  ;;  %v2286_v30 = vpop.permute.xlu1 %2285  ;;  %v3846_v45 = vld [vmem:[%s4457_s6 + $0x110] sm:$0xff] }
 0x2eb   : > { %1842 = vxpose.xlu1.b32.start [1/2] (short) (narrow) %v1825_v41, 16  ;;  %2325 = vst.msk [vmem:[#allocation2 + $0x83] sm:$0x1] %vm465_vm2, %v2286_v30  ;;  %3890 = vmatpush.xpose.msk.msra.mxu2 %vm794_vm3, %v3846_v45  ;;  %v2348_v41 = vrot.slane %v2076_v8, 7 }
 0x2ec   : > { %v2216_v60 = vpop.permute.xlu2 %2215  ;;  %v2156_v32 = vpop.permute.xlu0 %2155 }
 0x2ed   : > { %2258 = vst.msk [vmem:[#allocation2 + $0x52] sm:$0x1] %vm465_vm2, %v2216_v60  ;;  %v3861_v60 = vld [vmem:[%s4457_s6 + $0x188] sm:$0xff] }
 0x2ee   : > { %2196 = vst.msk [vmem:[#allocation2 + $0x71] sm:$0x1] %vm465_vm2, %v2156_v32  ;;  %3917 = vmatpush.xpose.msk.msra.mxu1 %vm794_vm3, %v3861_v60 }
 0x2ef   : > { %3905 = vmatpush.xpose.msk.msrb.mxu2 %vm794_vm3, %v3855_v25  ;;  %2378 = vst.msk [vmem:[#allocation2 + $0xf4] sm:$0x1] %vm465_vm2, %v2348_v41 }
 0x2f2   : > { %2295 = vrot.lane.b32.xlu0 %v5300_v49, %s4286_s30  ;;  %2293 = vrot.lane.b32.xlu2 %v5298_v0, %s4286_s30  ;;  %v2236_v56 = vpop.permute.xlu1 %2235 }
 0x2f3   : > { %1843 = vxpose.xlu1.b32.end [2/2] (short) (narrow) %v1839_v7, 16  ;;  %2268 = vst.msk [vmem:[#allocation2 + $0xf2] sm:$0x1] %vm465_vm2, %v2236_v56  ;;  %3906 = vmatpush.xpose.msk.msrb.mxu2 %vm794_vm3, %v3854_v12  ;;  %v3866_v56 = vld [vmem:[%s4457_s6 + $0x1b0] sm:$0xff] }
 0x2f4   : > { %v2220_v53 = vpop.permute.xlu2 %2219  ;;  %v2210_v42 = vpop.permute.xlu0 %2209  ;;  %3918 = vmatpush.xpose.msk.msra.mxu1 %vm794_vm3, %v3860_v4  ;;  %v2412_v25 = vld [vmem:[#allocation2 + $0x50] sm:$0xff]  ;;  %v3864_v4 = vld [vmem:[%s4457_s6 + $0x1a0] sm:$0xff] }
 0x2f5   : > { %2260 = vst.msk [vmem:[#allocation2 + $0x72] sm:$0x1] %vm465_vm2, %v2220_v53 }
 0x2f6   : > { %2255 = vst.msk [vmem:[#allocation2 + $0x22] sm:$0x1] %vm465_vm2, %v2210_v42 }
 0x2fa   : > { %3315 = vperm.xlu0 %4058, %v5237_v6   ;;  %3111 = vperm.xlu2 %4060, %v5253_v15   ;;  %v2292_v28 = vpop.permute.xlu1 %2291 }
 0x2fb   : > { %2328 = vst.msk [vmem:[#allocation2 + $0xb3] sm:$0x1] %vm465_vm2, %v2292_v28 }
 0x2fc   : > { %v2276_v0 = vpop.permute.xlu2 %2275  ;;  %v2214_v49 = vpop.permute.xlu0 %2213 }
 0x2fd   : > { %2320 = vst.msk [vmem:[#allocation2 + $0x33] sm:$0x1] %vm465_vm2, %v2276_v0  ;;  %v2406_v23 = vld [vmem:[#allocation2 + $0x20] sm:$0xff] }
 0x2fe   : > { %2257 = vst.msk [vmem:[#allocation2 + $0x42] sm:$0x1] %vm465_vm2, %v2214_v49  ;;  %3895 = vmatmul.msk.f32.vlgmr.msra.gmra.mxu3 %vm794_vm3, %v2406_v23  ;;  %v2411_v23 = vld [vmem:[#allocation2 + $0x48] sm:$0x3] }
 0x302   : > { %4061 = vset.pattern.permute.xlu2 %v4289_v57  ;;  %v2347_v57 = vrot.slane %v2076_v8, 6  ;;  %v2298_v32 = vpop.permute.xlu1 %2297 }
 0x303   : > { %3211 = vperm.xlu2 %4061, %v5237_v6   ;;  %2331 = vst.msk [vmem:[#allocation2 + $0xe3] sm:$0x1] %vm465_vm2, %v2298_v32 }
 0x304   : > { %v2282_v43 = vpop.permute.xlu2 %2281  ;;  %v2218_v34 = vpop.permute.xlu0 %2217  ;;  %v2408_v62 = vld [vmem:[#allocation2 + $0x30] sm:$0xff]  ;;  %2377 = vst.msk [vmem:[#allocation2 + $0xe4] sm:$0x1] %vm465_vm2, %v2347_v57  ;;  %v3865_v57 = vld [vmem:[%s4457_s6 + $0x1a8] sm:$0xff] }
 0x305   : > { %2323 = vst.msk [vmem:[#allocation2 + $0x63] sm:$0x1] %vm465_vm2, %v2282_v43  ;;  %3899 = vmatmul.msk.f32.vlgmr.msra.gmra.mxu0 %vm794_vm3, %v2408_v62  ;;  %v2419_v43 = vld [vmem:[#allocation2 + $0x88] sm:$0x3]  ;;  %3925 = vmatpush.xpose.msk.msra.mxu3 %vm794_vm3, %v3865_v57 }
 0x306   : > { %2259 = vst.msk [vmem:[#allocation2 + $0x62] sm:$0x1] %vm465_vm2, %v2218_v34  ;;  %3896 = vmatmul.msk.f32.gmra.mxu3 %vm794_vm3, %v2407_v59  ;;  %3929 = vmatpush.xpose.msk.msra.mxu0 %vm794_vm3, %v3867_v38  ;;  %v2415_v59 = vld [vmem:[#allocation2 + $0x68] sm:$0x3]  ;;  %v3868_v34 = vld [vmem:[%s4457_s6 + $0x1c0] sm:$0xff] }
 0x307   : > { %v3872_v38 = vld [vmem:[%s4457_s6 + $0x1e0] sm:$0xff] }
 0x309   : > { %3926 = vmatpush.xpose.msk.msra.mxu3 %vm794_vm3, %v3864_v4 }
 0x30a   : > { %3930 = vmatpush.xpose.msk.msra.mxu0 %vm794_vm3, %v3866_v56  ;;  %v2425_v56 = vld [vmem:[#allocation2 + $0xb8] sm:$0x3] }
 0x30b   : > { %3215 = vperm.xlu2 %4061, %v5253_v15  }
 0x30c   : > { %v2272_v30 = vpop.permute.xlu0 %2271  ;;  %v2160_v45 = vpop.permute.xlu2 %2159 }
 0x30d   : > { %2318 = vst.msk [vmem:[#allocation2 + $0x13] sm:$0x1] %vm465_vm2, %v2272_v30  ;;  %v2414_v7 = vld [vmem:[#allocation2 + $0x60] sm:$0xff]  ;;  %3900 = vmatmul.msk.f32.gmra.mxu0 %vm794_vm3, %v2409_v61  ;;  %v3871_v61 = vld [vmem:[%s4457_s6 + $0x1d8] sm:$0xff] }
 0x30e   : > { %2198 = vst.msk [vmem:[#allocation2 + $0x91] sm:$0x1] %vm465_vm2, %v2160_v45  ;;  %3911 = vmatmul.msk.f32.vlgmr.msrb.gmra.mxu3 %vm794_vm3, %v2414_v7  ;;  %v3873_v45 = vld [vmem:[%s4457_s6 + $0x1e8] sm:$0xff]  ;;  %v3870_v7 = vld [vmem:[%s4457_s6 + $0x1d0] sm:$0xff] }
 0x30f   : > { %3941 = vmatpush.xpose.msk.msrb.mxu3 %vm794_vm3, %v3873_v45 }
 0x313   : > { %2299 = vrot.lane.b32.xlu2 %v5218_v54, %s4286_s30  ;;  %3942 = vmatpush.xpose.msk.msrb.mxu3 %vm794_vm3, %v3872_v38 }
 0x314   : > { %v2278_v53 = vpop.permute.xlu0 %2277  ;;  %v2164_v42 = vpop.permute.xlu2 %2163  ;;  %v2404_v9 = vld [vmem:[#allocation2 + $0x10] sm:$0xff] }
 0x315   : > { %2321 = vst.msk [vmem:[#allocation2 + $0x43] sm:$0x1] %vm465_vm2, %v2278_v53  ;;  %3891 = vmatmul.msk.f32.vlgmr.msra.gmra.mxu2 %vm794_vm3, %v2404_v9  ;;  %v3875_v53 = vld [vmem:[%s4457_s6 + $0x1f8] sm:$0xff] }
 0x316   : > { %2200 = vst.msk [vmem:[#allocation2 + $0xb1] sm:$0x1] %vm465_vm2, %v2164_v42  ;;  %3912 = vmatmul.msk.f32.gmra.mxu3 %vm794_vm3, %v2415_v59 }
 0x31c   : > { %v2284_v0 = vpop.permute.xlu0 %2283  ;;  %1408 = vxpose.xlu0.b32.start [1/2] (short) (narrow) %v4985_v14, 16  ;;  %v2168_v54 = vpop.permute.xlu2 %2167  ;;  %v2410_v49 = vld [vmem:[#allocation2 + $0x40] sm:$0xff]  ;;  %v3863_v14 = vld [vmem:[%s4457_s6 + $0x198] sm:$0xff] }
 0x31d   : > { %2324 = vst.msk [vmem:[#allocation2 + $0x73] sm:$0x1] %vm465_vm2, %v2284_v0  ;;  %3892 = vmatmul.msk.f32.gmra.mxu2 %vm794_vm3, %v2405_v39  ;;  %3903 = vmatmul.msk.f32.vlgmr.msrb.gmra.mxu1 %vm794_vm3, %v2410_v49  ;;  %v3874_v39 = vld [vmem:[%s4457_s6 + $0x1f0] sm:$0xff] }
 0x31e   : > { %2202 = vst.msk [vmem:[#allocation2 + $0xd1] sm:$0x1] %vm465_vm2, %v2168_v54  ;;  %3921 = vmatpush.xpose.msk.msra.mxu2 %vm794_vm3, %v3863_v14  ;;  %3933 = vmatpush.xpose.msk.msrb.mxu1 %vm794_vm3, %v3869_v17 }
 0x322   : > { %3922 = vmatpush.xpose.msk.msra.mxu2 %vm794_vm3, %v3862_v36  ;;  %3934 = vmatpush.xpose.msk.msrb.mxu1 %vm794_vm3, %v3868_v34  ;;  %v2423_v36 = vld [vmem:[#allocation2 + $0xa8] sm:$0x3]  ;;  %v2433_v34 = vld [vmem:[#allocation2 + $0xf8] sm:$0x3] }
 0x324   : > { %v2222_v28 = vpop.permute.xlu0 %2221  ;;  %1409 = vxpose.xlu0.b32.end [2/2] (short) (narrow) %v5118_v44, 16  ;;  %v2172_v8 = vpop.permute.xlu2 %2171  ;;  %v2416_v22 = vld [vmem:[#allocation2 + $0x70] sm:$0xff]  ;;  %v2417_v44 = vld [vmem:[#allocation2 + $0x78] sm:$0x3] }
 0x325   : > { %2261 = vst.msk [vmem:[#allocation2 + $0x82] sm:$0x1] %vm465_vm2, %v2222_v28  ;;  %3904 = vmatmul.msk.f32.gmra.mxu1 %vm794_vm3, %v2411_v23  ;;  %3907 = vmatmul.msk.f32.vlgmr.msrb.gmra.mxu2 %vm794_vm3, %v2412_v25  ;;  %v2427_v23 = vld [vmem:[#allocation2 + $0xc8] sm:$0x3] }
 0x326   : > { %2204 = vst.msk [vmem:[#allocation2 + $0xf1] sm:$0x1] %vm465_vm2, %v2172_v8  ;;  %3915 = vmatmul.msk.f32.vlgmr.msrb.gmra.mxu0 %vm794_vm3, %v2416_v22  ;;  %3937 = vmatpush.xpose.msk.msrb.mxu2 %vm794_vm3, %v3871_v61 }
 0x327   : > { %3945 = vmatpush.xpose.msk.msrb.mxu0 %vm794_vm3, %v3875_v53 }
 0x32a   : > { %3938 = vmatpush.xpose.msk.msrb.mxu2 %vm794_vm3, %v3870_v7 }
 0x32b   : > { %3946 = vmatpush.xpose.msk.msrb.mxu0 %vm794_vm3, %v3874_v39 }
 0x32c   : > { %v2162_v40 = vpop.permute.xlu0 %2161  ;;  %v2224_v12 = vpop.permute.xlu2 %2223  ;;  %v2418_v21 = vld [vmem:[#allocation2 + $0x80] sm:$0xff] }
 0x32d   : > { %2199 = vst.msk [vmem:[#allocation2 + $0xa1] sm:$0x1] %vm465_vm2, %v2162_v40  ;;  %3919 = vmatmul.msk.f32.vlgmr.msra.gmra.mxu1 %vm794_vm3, %v2418_v21  ;;  %3908 = vmatmul.msk.f32.gmra.mxu2 %vm794_vm3, %v2413_v19 }
 0x32e   : > { %2262 = vst.msk [vmem:[#allocation2 + $0x92] sm:$0x1] %vm465_vm2, %v2224_v12  ;;  %3916 = vmatmul.msk.f32.gmra.mxu0 %vm794_vm3, %v2417_v44  ;;  %v2429_v12 = vld [vmem:[#allocation2 + $0xd8] sm:$0x3] }
 0x334   : > { %v2166_v62 = vpop.permute.xlu0 %2165  ;;  %v2228_v37 = vpop.permute.xlu2 %2227 }
 0x335   : > { %2201 = vst.msk [vmem:[#allocation2 + $0xc1] sm:$0x1] %vm465_vm2, %v2166_v62  ;;  %3920 = vmatmul.msk.f32.gmra.mxu1 %vm794_vm3, %v2419_v43  ;;  %v2431_v43 = vld [vmem:[#allocation2 + $0xe8] sm:$0x3] }
 0x336   : > { %2264 = vst.msk [vmem:[#allocation2 + $0xb2] sm:$0x1] %vm465_vm2, %v2228_v37  ;;  %v5519_v37 = vpop.f32.mrf.mxu1 }
 0x339   : > { %1618 = vxpose.xlu2.b32.start [1/2] (short) (narrow) %v4988_v26, 16 }
 0x33c   : > { %v2170_v41 = vpop.permute.xlu0 %2169  ;;  %v2232_v60 = vpop.permute.xlu2 %2231 }
 0x33d   : > { %2203 = vst.msk [vmem:[#allocation2 + $0xe1] sm:$0x1] %vm465_vm2, %v2170_v41  ;;  %v2424_v32 = vld [vmem:[#allocation2 + $0xb0] sm:$0xff] }
 0x33e   : > { %2266 = vst.msk [vmem:[#allocation2 + $0xd2] sm:$0x1] %vm465_vm2, %v2232_v60  ;;  %3931 = vmatmul.msk.f32.vlgmr.msra.gmra.mxu0 %vm794_vm3, %v2424_v32 }
 0x341   : > { %1619 = vxpose.xlu2.b32.end [2/2] (short) (narrow) %v5145_v13, 16 }
 0x344   : > { %v2226_v26 = vpop.permute.xlu0 %2225  ;;  %v2288_v30 = vpop.permute.xlu2 %2287 }
 0x345   : > { %2263 = vst.msk [vmem:[#allocation2 + $0xa2] sm:$0x1] %vm465_vm2, %v2226_v26 }
 0x346   : > { %2326 = vst.msk [vmem:[#allocation2 + $0x93] sm:$0x1] %vm465_vm2, %v2288_v30  ;;  %3932 = vmatmul.msk.f32.gmra.mxu0 %vm794_vm3, %v2425_v56 }
 0x349   : > { %1722 = vxpose.xlu2.b32.start [1/2] (short) (narrow) %v4997_v33, 16  ;;  %v2421_v33 = vld [vmem:[#allocation2 + $0x98] sm:$0x3] }
 0x34c   : > { %v2230_v13 = vpop.permute.xlu0 %2229  ;;  %v2294_v42 = vpop.permute.xlu2 %2293 }
 0x34d   : > { %2265 = vst.msk [vmem:[#allocation2 + $0xc2] sm:$0x1] %vm465_vm2, %v2230_v13  ;;  %v2420_v9 = vld [vmem:[#allocation2 + $0x90] sm:$0xff] }
 0x34e   : > { %2329 = vst.msk [vmem:[#allocation2 + $0xc3] sm:$0x1] %vm465_vm2, %v2294_v42  ;;  %3923 = vmatmul.msk.f32.vlgmr.msra.gmra.mxu2 %vm794_vm3, %v2420_v9 }
 0x351   : > { %1723 = vxpose.xlu2.b32.end [2/2] (short) (narrow) %v5162_v52, 16  ;;  %v5499_v52 = vpop.permute.xlu1 %3106 }
 0x352   : > { %6172 = vst [vmem:[#allocation21_spill] sm:$0xff] %v5499_v52  ;;  %v5523_v60 = vpop.f32.mrf.mxu1 }
 0x353   : > { %v3220_v30 = vrot.slane %v5523_v60, 2  ;;  %v3324_v45 = vrot.slane %v5523_v60, 3  ;;  %v3116_v7 = vrot.slane %v5523_v60, 1  ;;  %v3444_v53 = vrot.slane %v5523_v60, 4 }
 0x354   : > { %v2234_v0 = vpop.permute.xlu0 %2233  ;;  %v5490_v54 = vpop.permute.xlu2 %3111  ;;  %v3282_v13 = vrot.slane %v5523_v60, 7  ;;  %v3178_v9 = vrot.slane %v5523_v60, 6 }
 0x355   : > { %6170 = vst [vmem:[#allocation19_spill] sm:$0xff] %v5490_v54  ;;  %v2426_v49 = vld [vmem:[#allocation2 + $0xc0] sm:$0xff] }
 0x356   : > { %2267 = vst.msk [vmem:[#allocation2 + $0xe2] sm:$0x1] %vm465_vm2, %v2234_v0  ;;  %3935 = vmatmul.msk.f32.vlgmr.msrb.gmra.mxu1 %vm794_vm3, %v2426_v49  ;;  %3924 = vmatmul.msk.f32.gmra.mxu2 %vm794_vm3, %v2421_v33 }
 0x359   : > { %v5505_v44 = vpop.permute.xlu1 %3319 }
 0x35a   : > { %6174 = vst [vmem:[#allocation23_spill] sm:$0xff] %v5505_v44  ;;  %v5530_v61 = vpop.f32.mrf.mxu1 }
 0x35b   : > { %v3506_v42 = vrot.slane %v5530_v61, 1 }
 0x35c   : > { %v2290_v28 = vpop.permute.xlu0 %2289 }
 0x35d   : > { %2327 = vst.msk [vmem:[#allocation2 + $0xa3] sm:$0x1] %vm465_vm2, %v2290_v28  ;;  %v5496_v8 = vpop.permute.xlu2 %3211  ;;  %v2430_v21 = vld [vmem:[#allocation2 + $0xe0] sm:$0xff] }
 0x35e   : > { %6171 = vst [vmem:[#allocation20_spill] sm:$0xff] %v5496_v8  ;;  %3936 = vmatmul.msk.f32.gmra.mxu1 %vm794_vm3, %v2427_v23 }
 0x361   : > { %v5513_v17 = vpop.permute.xlu1 %3539 }
 0x362   : > { %6175 = vst [vmem:[#allocation24_spill] sm:$0xff] %v5513_v17 }
 0x364   : > { %v2296_v25 = vpop.permute.xlu0 %2295  ;;  %v2422_v22 = vld [vmem:[#allocation2 + $0xa0] sm:$0xff] }
 0x365   : > { %2330 = vst.msk [vmem:[#allocation2 + $0xd3] sm:$0x1] %vm465_vm2, %v2296_v25  ;;  %3927 = vmatmul.msk.f32.vlgmr.msra.gmra.mxu3 %vm794_vm3, %v2422_v22  ;;  %v5503_v14 = vpop.permute.xlu2 %3215 }
 0x366   : > { %6173 = vst [vmem:[#allocation22_spill] sm:$0xff] %v5503_v14 }
 0x36c   : > { %v2428_v19 = vld [vmem:[#allocation2 + $0xd0] sm:$0xff] }
 0x36d   : > { %3928 = vmatmul.msk.f32.gmra.mxu3 %vm794_vm3, %v2423_v36  ;;  %v2300_v40 = vpop.permute.xlu2 %2299  ;;  %3939 = vmatmul.msk.f32.vlgmr.msrb.gmra.mxu2 %vm794_vm3, %v2428_v19 }
 0x36e   : > { %2332 = vst.msk [vmem:[#allocation2 + $0xf3] sm:$0x1] %vm465_vm2, %v2300_v40 }
 0x375   : > { %3940 = vmatmul.msk.f32.gmra.mxu2 %vm794_vm3, %v2429_v12  ;;  %3943 = vmatmul.msk.f32.vlgmr.msrb.gmra.mxu3 %vm794_vm3, %v2430_v21  ;;  %v2432_v59 = vld [vmem:[#allocation2 + $0xf0] sm:$0xff] }
 0x376   : > { %3947 = vmatmul.msk.f32.vlgmr.msrb.gmra.mxu0 %vm794_vm3, %v2432_v59 }
 0x37d   : > { %3944 = vmatmul.msk.f32.gmra.mxu3 %vm794_vm3, %v2431_v43 }
 0x37e   : > { %3948 = vmatmul.msk.f32.gmra.mxu0 %vm794_vm3, %v2433_v34 }
 0x37f   : > { %v5517_v62 = vpop.trf.xlu1 }
 0x381   : > { %v5521_v57 = vpop.f32.mrf.mxu3 }
 0x382   : > { %v5532_v26 = vpop.f32.mrf.mxu0  ;;  %v3012_v39 = vrot.slane %v5521_v57, 6  ;;  %v3327_v0 = vrot.slane %v5521_v57, 1  ;;  %v3447_v28 = vrot.slane %v5521_v57, 2  ;;  %v3285_v22 = vrot.slane %v5521_v57, 5 }
 0x383   : > { %v3449_v25 = vrot.slane %v5532_v26, 1  ;;  %v3287_v40 = vrot.slane %v5532_v26, 4  ;;  %v3181_v12 = vrot.slane %v5521_v57, 4 }
 0x387   : > { %v1531_v41 = vpop.trf.xlu1 }
 0x388   : > { %v5526_v32 = vadd.f32 %v5177_v11, %v1531_v41  ;;  %v3118_v11 = vrot.slane %v5521_v57, 7  ;;  %v3183_v41 = vrot.slane %v5532_v26, 3 }
 0x389   : > { %v5528_v4 = vpop.f32.mrf.mxu3 }
 0x38a   : > { %v3404_v21 = vrot.slane %v5528_v4, 6  ;;  %v2571_v27 = vpop.f32.mrf.mxu0  ;;  %v3508_v24 = vrot.slane %v5528_v4, 7 }
 0x38b   : > { %v3406_v16 = vrot.slane %v2571_v27, 5  ;;  %v3510_v54 = vrot.slane %v2571_v27, 6 }
 0x391   : > { %v5558_v59 = vpop.f32.mrf.mxu3 }
 0x398   : > { %v5547_v49 = vpop.f32.mrf.mxu2 }
 0x399   : > { %v3325_v36 = vrot.slane %v5547_v49, 2  ;;  %v3010_v19 = vrot.slane %v5547_v49, 7  ;;  %v3221_v43 = vrot.slane %v5547_v49, 1  ;;  %v3117_v38 = vsel %vm1372_vm5, %v5547_v49, %v3116_v7 }
 0x39a   : > { %v5561_v34 = vpop.f32.mrf.mxu1  ;;  %v3445_v33 = vrot.slane %v5547_v49, 3  ;;  %v3283_v56 = vrot.slane %v5547_v49, 6  ;;  %v3179_v44 = vrot.slane %v5547_v49, 5 }
 0x39b   : > { %v3011_v23 = vsel %vm1372_vm5, %v3010_v19, %v5523_v60  ;;  %v3326_v17 = vsel %vm1372_vm5, %v3325_v36, %v3324_v45  ;;  %v3119_v19 = vsel %vm1375_vm6, %v3118_v11, %v3117_v38  ;;  %v3330_v4 = vrot.slane %v5561_v34, 7 }
 0x39c   : > { %v3328_v7 = vsel %vm1375_vm6, %v3327_v0, %v3326_v17  ;;  %v3013_v52 = vsel %vm1375_vm6, %v3012_v39, %v3011_v23  ;;  %v3222_v45 = vsel %vm1372_vm5, %v3221_v43, %v3220_v30  ;;  %v3446_v36 = vsel %vm1372_vm5, %v3445_v33, %v3444_v53 }
 0x39d   : > { %v3329_v8 = vsel %vm1378_vm7, %v5532_v26, %v3328_v7  ;;  %v3284_v27 = vsel %vm1372_vm5, %v3283_v56, %v3282_v13  ;;  %v3289_v46 = vrot.slane %v5561_v34, 3  ;;  %v3448_v11 = vsel %vm1375_vm6, %v3447_v28, %v3446_v36 }
 0x39e   : > { %v5587_v17 = vsel %vm1381_vm8, %v3330_v4, %v3329_v8  ;;  %v3286_v38 = vsel %vm1375_vm6, %v3285_v22, %v3284_v27  ;;  %v3180_v39 = vsel %vm1372_vm5, %v3179_v44, %v3178_v9  ;;  %v3450_v30 = vsel %vm1378_vm7, %v3449_v25, %v3448_v11 }
 0x39f   : > { %v3288_v53 = vsel %vm1378_vm7, %v3287_v40, %v3286_v38  ;;  %v3451_v8 = vsel %vm1381_vm8, %v5561_v34, %v3450_v30  ;;  %v3182_v28 = vsel %vm1375_vm6, %v3181_v12, %v3180_v39  ;;  %v3122_v22 = vrot.slane %v5561_v34, 5 }
 0x3a0   : > { %v2501_v14 = vpop.f32.mrf.mxu2  ;;  %v3290_v33 = vsel %vm1381_vm8, %v3289_v46, %v3288_v53  ;;  %v3223_v40 = vsel %vm1375_vm6, %v5521_v57, %v3222_v45  ;;  %v6177_v43 = vrot.slane %v5532_v26, 5  ;;  %v3226_v4 = vrot.slane %v5561_v34, 6 }
 0x3a1   : > { %v3402_v0 = vrot.slane %v2501_v14, 7  ;;  %v3507_v23 = vsel %vm1372_vm5, %v2501_v14, %v3506_v42  ;;  %v3184_v45 = vsel %vm1378_vm7, %v3183_v41, %v3182_v28  ;;  %v6178_v27 = vrot.slane %v5532_v26, 7 }
 0x3a2   : > { %v3509_v13 = vsel %vm1375_vm6, %v3508_v24, %v3507_v23  ;;  %v2606_v56 = vpop.f32.mrf.mxu1  ;;  %v3016_v24 = vrot.slane %v5561_v34, 4  ;;  %v3334_v38 = vrot.slane %v5558_v59, 5  ;;  %v3293_v41 = vrot.slane %v5558_v59, 1 }
 0x3a3   : > { %v3403_v44 = vsel %vm1372_vm5, %v3402_v0, %v5530_v61  ;;  %v3511_v9 = vsel %vm1378_vm7, %v3510_v54, %v3509_v13  ;;  %v3408_v14 = vrot.slane %v2606_v56, 4  ;;  %v3512_v42 = vrot.slane %v2606_v56, 5  ;;  %v2708_v36 = vpop.f32.mrf.mxu0 }
 0x3a4   : > { %v3405_v25 = vsel %vm1375_vm6, %v3404_v21, %v3403_v44  ;;  %v6176_v61 = vrot.slane %v5532_v26, 6  ;;  %v3015_v21 = vsel %vm1378_vm7, %v6177_v43, %v3013_v52  ;;  %v3225_v11 = vsel %vm1378_vm7, %v6178_v27, %v3223_v40 }
 0x3a5   : > { %v3407_v46 = vsel %vm1378_vm7, %v3406_v16, %v3405_v25  ;;  %v5610_v12 = vsel %vm1381_vm8, %v3512_v42, %v3511_v9  ;;  %v3185_v16 = vrot.slane %v5561_v34, 2  ;;  %v3454_v52 = vrot.slane %v5558_v59, 6 }
 0x3a6   : > { %v3121_v54 = vsel %vm1378_vm7, %v6176_v61, %v3119_v19  ;;  %v5619_v7 = vsel %vm1381_vm8, %v3408_v14, %v3407_v46  ;;  %v3230_v19 = vrot.slane %v5558_v59, 4  ;;  %v3017_v23 = vsel %vm1381_vm8, %v3016_v24, %v3015_v21 }
 0x3a7   : > { %v3123_v0 = vsel %vm1381_vm8, %v3122_v22, %v3121_v54  ;;  %v3186_v30 = vsel %vm1381_vm8, %v3185_v16, %v3184_v45  ;;  %v3073_v28 = vrot.slane %v5547_v49, 4  ;;  %v3128_v44 = vrot.slane %v2708_v36, 2 }
 0x3a8   : > { %v2638_v39 = vpop.f32.mrf.mxu2  ;;  %v3022_v9 = vrot.slane %v2708_v36, 1  ;;  %v3227_v14 = vsel %vm1381_vm8, %v3226_v4, %v3225_v11  ;;  %v3232_v25 = vrot.slane %v2708_v36, 3  ;;  %v3336_v40 = vrot.slane %v2708_v36, 4 }
 0x3a9   : > { %v3124_v53 = vrot.slane %v2638_v39, 4  ;;  %v3018_v13 = vrot.slane %v2638_v39, 3  ;;  %v3228_v56 = vrot.slane %v2638_v39, 5  ;;  %v3332_v42 = vrot.slane %v2638_v39, 6 }
 0x3aa   : > { %v3452_v46 = vrot.slane %v2638_v39, 7  ;;  %v3291_v22 = vrot.slane %v2638_v39, 2  ;;  %v3187_v43 = vrot.slane %v2638_v39, 1  ;;  %v6179_v21 = vrot.slane %v5558_v59, 3 }
 0x3ab   : > { %v3125_v24 = vsel %vm1384_vm9, %v3124_v53, %v3123_v0  ;;  %v3019_v61 = vsel %vm1384_vm9, %v3018_v13, %v3017_v23  ;;  %v3229_v54 = vsel %vm1384_vm9, %v3228_v56, %v3227_v14  ;;  %v6180_v45 = vrot.slane %v5558_v59, 2 }
 0x3ac   : > { %v3127_v49 = vsel %vm1387_vm10, %v6179_v21, %v3125_v24  ;;  %v3231_v16 = vsel %vm1387_vm10, %v3230_v19, %v3229_v54  ;;  %v6181_v27 = vrot.slane %v5523_v60, 5  ;;  %v3333_v13 = vsel %vm1384_vm9, %v3332_v42, %v5587_v17 }
 0x3ad   : > { %v3021_v4 = vsel %vm1387_vm10, %v6180_v45, %v3019_v61  ;;  %v3129_v0 = vsel %vm1390_vm11, %v3128_v44, %v3127_v49  ;;  %v3233_v53 = vsel %vm1390_vm11, %v3232_v25, %v3231_v16  ;;  %v3335_v56 = vsel %vm1387_vm10, %v3334_v38, %v3333_v13 }
 0x3ae   : > { %v3074_v11 = vsel %vm1372_vm5, %v3073_v28, %v6181_v27  ;;  %v3023_v23 = vsel %vm1390_vm11, %v3022_v9, %v3021_v4  ;;  %3146 = vxpose.xlu1.b32.start [1/2] (short) (narrow) %v3129_v0, 16  ;;  %v3453_v14 = vsel %vm1384_vm9, %v3452_v46, %v3451_v8  ;;  %v3456_v19 = vrot.slane %v2708_v36, 5  ;;  %3250 = vxpose.xlu2.b32.start [1/2] (short) (narrow) %v3233_v53, 16  ;;  %v2711_v27 = vpop.f32.mrf.mxu0 }
 0x3af   : > { %3040 = vxpose.xlu0.b32.start [1/2] (short) (narrow) %v3023_v23, 16  ;;  %v3292_v60 = vsel %vm1384_vm9, %v3291_v22, %v3290_v33  ;;  %v5658_v28 = vsel %vm1390_vm11, %v3336_v40, %v3335_v56  ;;  %v3455_v44 = vsel %vm1387_vm10, %v3454_v52, %v3453_v14  ;;  %v3188_v25 = vsel %vm1384_vm9, %v3187_v43, %v3186_v30  ;;  %v5684_v43 = vpop.permute.xlu0 %3315 }
 0x3b0   : > { %v3294_v9 = vsel %vm1387_vm10, %v3293_v41, %v3292_v60  ;;  %v5664_v17 = vsel %vm1390_vm11, %v3456_v19, %v3455_v44  ;;  %v3190_v8 = vrot.slane %v2708_v36, 7  ;;  %v3079_v42 = vrot.slane %v5561_v34, 1  ;;  %v2641_v4 = vpop.f32.mrf.mxu2  ;;  %v5713_v19 = vpop.f32.mrf.mxu1 }
 0x3b1   : > { %v5667_v38 = vsel %vm1390_vm11, %v2708_v36, %v3294_v9  ;;  %v3189_v33 = vsel %vm1387_vm10, %v5558_v59, %v3188_v25  ;;  %v6182_v40 = vrot.slane %v5521_v57, 3  ;;  %v3077_v41 = vrot.slane %v5532_v26, 2 }
 0x3b2   : > { %v5677_v30 = vsel %vm1390_vm11, %v3190_v8, %v3189_v33  ;;  %v3082_v24 = vrot.slane %v5558_v59, 7  ;;  %v3084_v61 = vrot.slane %v2708_v36, 6  ;;  %v1576_v26 = vadd.f32 %v5010_v51, %v5517_v62 }
 0x3b3   : > { %v3076_v52 = vsel %vm1375_vm6, %v6182_v40, %v3074_v11  ;;  %v3410_v16 = vrot.slane %v2641_v4, 3  ;;  %v3514_v11 = vrot.slane %v2641_v4, 4  ;;  %v3414_v51 = vrot.slane %v2711_v27, 1 }
 0x3b4   : > { %v3078_v46 = vsel %vm1378_vm7, %v3077_v41, %v3076_v52  ;;  %v5693_v45 = vadd.f32 %v4787_v58, %v1576_v26  ;;  %v3518_v53 = vrot.slane %v2711_v27, 2  ;;  %v5703_v58 = vadd.f32 %v5258_v1, %v5526_v32 }
 0x3b5   : > { %v3080_v22 = vsel %vm1381_vm8, %v3079_v42, %v3078_v46  ;;  %v3411_v13 = vsel %vm1384_vm9, %v3410_v16, %v5619_v7  ;;  %v3515_v14 = vsel %vm1384_vm9, %v3514_v11, %v5610_v12  ;;  %v3296_v25 = vrot.slane %v5713_v19, 7 }
 0x3b6   : > { %v3081_v34 = vsel %vm1384_vm9, %v2638_v39, %v3080_v22  ;;  %v2676_v39 = vpop.f32.mrf.mxu3  ;;  %v3192_v8 = vrot.slane %v5713_v19, 6  ;;  %v1796_v27 = vrot.slane %v5519_v37, 1 }
 0x3b7   : > { %v3083_v54 = vsel %vm1387_vm10, %v3082_v24, %v3081_v34  ;;  %v3412_v23 = vrot.slane %v2676_v39, 2 }
 0x3b8   : > { %v5687_v57 = vsel %vm1390_vm11, %v3084_v61, %v3083_v54  ;;  %v2746_v42 = vpop.f32.mrf.mxu1 }
 0x3b9   : > { %v3413_v56 = vsel %vm1387_vm10, %v3412_v23, %v3411_v13  ;;  %v3520_v40 = vrot.slane %v2746_v42, 1  ;;  %v3130_v23 = vrot.slane %v5713_v19, 1  ;;  %v3458_v13 = vrot.slane %v5713_v19, 4 }
 0x3ba   : > { %v5718_v60 = vsel %vm1390_vm11, %v3414_v51, %v3413_v56  ;;  %v3234_v51 = vrot.slane %v5713_v19, 2 }
 0x3bb   : > { %v5753_v4 = vpop.f32.mrf.mxu0 }
 0x3c0   : > { %v1424_v21 = vpop.trf.xlu0 }
 0x3c1   : > { %v1470_v49 = vadd.f32 %v5019_v2, %v1424_v21  ;;  %v3516_v2 = vrot.slane %v2676_v39, 3 }
 0x3c3   : > { %v5696_v59 = vadd.f32 %v5295_v48, %v1470_v49  ;;  %v3517_v1 = vsel %vm1387_vm10, %v3516_v2, %v3515_v14  ;;  %v2851_v14 = vpop.f32.mrf.mxu0 }
 0x3c5   : > { %v1916_v36 = vmax.f32 %v5696_v59, %v5693_v45 }
 0x3c8   : > { %v1425_v0 = vpop.trf.xlu0 }
 0x3c9   : > { %v1471_v62 = vadd.f32 %v5190_v29, %v1425_v0 }
 0x3cb   : > { %v5706_v48 = vadd.f32 %v5248_v55, %v1471_v62  ;;  %v5722_v55 = vsel %vm1390_vm11, %v3518_v53, %v3517_v1  ;;  %v3338_v53 = vrot.slane %v5713_v19, 3  ;;  %v3420_v1 = vrot.slane %v2851_v14, 5 }
 0x3cd   : > { %v1917_v29 = vmax.f32 %v5706_v48, %v5703_v58 }
 0x3d1   : > { %v5724_v32 = vpop.f32.mrf.mxu2 }
 0x3d2   : > { %v1634_v7 = vpop.trf.xlu2  ;;  %v3297_v12 = vrot.slane %v5724_v32, 6  ;;  %v3193_v9 = vrot.slane %v5724_v32, 5  ;;  %v3087_v22 = vrot.slane %v5724_v32, 4 }
 0x3d3   : > { %v1680_v44 = vadd.f32 %v5028_v63, %v1634_v7  ;;  %v3086_v63 = vrot.slane %v5713_v19, 5  ;;  %v5768_v62 = vpop.f32.mrf.mxu1  ;;  %v3301_v7 = vrot.slane %v5753_v4, 4 }
 0x3d4   : > { %v3298_v52 = vsel %vm1372_vm5, %v3297_v12, %v3296_v25  ;;  %v3194_v41 = vsel %vm1372_vm5, %v3193_v9, %v3192_v8  ;;  %v3024_v12 = vrot.slane %v5724_v32, 7  ;;  %v3303_v25 = vrot.slane %v5768_v62, 3 }
 0x3d5   : > { %v5732_v33 = vadd.f32 %v5306_v10, %v1680_v44  ;;  %v5742_v34 = vsel %vm1372_vm5, %v3087_v22, %v3086_v63  ;;  %v3197_v44 = vrot.slane %v5753_v4, 3  ;;  %v3199_v8 = vrot.slane %v5768_v62, 2 }
 0x3d7   : > { %v5737_v46 = vmax.f32 %v1916_v36, %v5732_v33 }
 0x3d9   : > { %v2781_v24 = vpop.f32.mrf.mxu2 }
 0x3da   : > { %v1635_v61 = vpop.trf.xlu2  ;;  %v3416_v54 = vrot.slane %v2781_v24, 7  ;;  %v3521_v10 = vsel %vm1372_vm5, %v2781_v24, %v3520_v40  ;;  %v3524_v24 = vrot.slane %v2851_v14, 6  ;;  %v3028_v14 = vrot.slane %v5753_v4, 5 }
 0x3db   : > { %v1681_v26 = vadd.f32 %v5202_v31, %v1635_v61  ;;  %v3131_v61 = vsel %vm1372_vm5, %v5724_v32, %v3130_v23 }
 0x3dc   : > { %v3417_v21 = vsel %vm1372_vm5, %v3416_v54, %v2746_v42 }
 0x3dd   : > { %v5748_v49 = vadd.f32 %v5309_v50, %v1681_v26  ;;  %v1797_v50 = vsel %vm1390_vm11, %v1796_v27, %v5195_v3  ;;  %v3235_v3 = vrot.slane %v5724_v32, 1 }
 0x3df   : > { %v5751_v36 = vmax.f32 %v1917_v29, %v5748_v49  ;;  %v3238_v29 = vrot.slane %v5753_v4, 7 }
 0x3e2   : > { %v1738_v39 = vpop.trf.xlu2 }
 0x3e3   : > { %v1800_v16 = vadd.f32 %v5037_v18, %v1738_v39 }
 0x3e5   : > { %v5758_v11 = vadd.f32 %v5267_v35, %v1800_v16  ;;  %v3236_v16 = vsel %vm1372_vm5, %v3235_v3, %v3234_v51 }
 0x3e7   : > { %v1920_v31 = vmax.f32 %v5737_v46, %v5758_v11  ;;  %v6192_v46 = vld [vmem:[#allocation18_spill] sm:$0xff] }
 0x3e8   : > { %v5762_v0 = vpop.f32.mrf.mxu3 }
 0x3e9   : > { %v3299_v2 = vrot.slane %v5762_v0, 5  ;;  %v3195_v35 = vrot.slane %v5762_v0, 4  ;;  %v3132_v42 = vrot.slane %v5762_v0, 7  ;;  %v3026_v40 = vrot.slane %v5762_v0, 6 }
 0x3ea   : > { %v1739_v18 = vpop.trf.xlu2  ;;  %v3237_v23 = vsel %vm1375_vm6, %v5762_v0, %v3236_v16 }
 0x3eb   : > { %v1801_v56 = vadd.f32 %v1797_v50, %v1739_v18  ;;  %v3300_v63 = vsel %vm1375_vm6, %v3299_v2, %v3298_v52  ;;  %v3196_v22 = vsel %vm1375_vm6, %v3195_v35, %v3194_v41  ;;  %v3025_v2 = vsel %vm1372_vm5, %v3024_v12, %v5713_v19 }
 0x3ec   : > { %v3302_v54 = vsel %vm1378_vm7, %v3301_v7, %v3300_v63  ;;  %v3133_v35 = vsel %vm1375_vm6, %v3132_v42, %v3131_v61  ;;  %v3027_v51 = vsel %vm1375_vm6, %v3026_v40, %v3025_v2  ;;  %v3239_v42 = vsel %vm1378_vm7, %v3238_v29, %v3237_v23 }
 0x3ed   : > { %v5780_v9 = vadd.f32 %v5289_v47, %v1801_v56  ;;  %v3198_v47 = vsel %vm1378_vm7, %v3197_v44, %v3196_v22  ;;  %v3304_v27 = vsel %vm1381_vm8, %v3303_v25, %v3302_v54  ;;  %v3134_v56 = vrot.slane %v5753_v4, 6 }
 0x3ee   : > { %v3200_v50 = vsel %vm1381_vm8, %v3199_v8, %v3198_v47  ;;  %v3089_v25 = vrot.slane %v5762_v0, 3  ;;  %v3240_v63 = vrot.slane %v5768_v62, 6  ;;  %v3029_v22 = vsel %vm1378_vm7, %v3028_v14, %v3027_v51 }
 0x3ef   : > { %v1921_v52 = vmax.f32 %v5751_v36, %v5780_v9  ;;  %v3339_v61 = vrot.slane %v5724_v32, 2  ;;  %v3091_v29 = vrot.slane %v5753_v4, 2 }
 0x3f0   : > { %v2816_v26 = vpop.f32.mrf.mxu3  ;;  %v5792_v39 = vpop.f32.mrf.mxu2  ;;  %v3241_v47 = vsel %vm1381_vm8, %v3240_v63, %v3239_v42 }
 0x3f1   : > { %v3418_v41 = vrot.slane %v2816_v26, 6  ;;  %v3522_v18 = vrot.slane %v2816_v26, 7  ;;  %v3305_v44 = vrot.slane %v5792_v39, 2  ;;  %v3242_v40 = vrot.slane %v5792_v39, 5 }
 0x3f2   : > { %v3032_v26 = vrot.slane %v5792_v39, 3 }
 0x3f3   : > { %v3419_v3 = vsel %vm1375_vm6, %v3418_v41, %v3417_v21  ;;  %v3523_v7 = vsel %vm1375_vm6, %v3522_v18, %v3521_v10  ;;  %v3135_v21 = vsel %vm1378_vm7, %v3134_v56, %v3133_v35  ;;  %v3138_v10 = vrot.slane %v5792_v39, 4  ;;  %v5824_v54 = vpop.f32.mrf.mxu0 }
 0x3f4   : > { %v5812_v8 = vsel %vm1378_vm7, %v3420_v1, %v3419_v3  ;;  %v5815_v12 = vsel %vm1378_vm7, %v3524_v24, %v3523_v7  ;;  %v3136_v1 = vrot.slane %v5768_v62, 5  ;;  %v3030_v24 = vrot.slane %v5768_v62, 4 }
 0x3f5   : > { %v3306_v16 = vsel %vm1384_vm9, %v3305_v44, %v3304_v27  ;;  %v3090_v41 = vsel %vm1375_vm6, %v3089_v25, %v5742_v34  ;;  %v3243_v23 = vsel %vm1384_vm9, %v3242_v40, %v3241_v47  ;;  %v3246_v14 = vrot.slane %v5824_v54, 3 }
 0x3f6   : > { %v3137_v2 = vsel %vm1381_vm8, %v3136_v1, %v3135_v21  ;;  %v3031_v35 = vsel %vm1381_vm8, %v3030_v24, %v3029_v22  ;;  %v3092_v56 = vsel %vm1378_vm7, %v3091_v29, %v3090_v41  ;;  %v3142_v27 = vrot.slane %v5824_v54, 2 }
 0x3f7   : > { %v3139_v3 = vsel %vm1384_vm9, %v3138_v10, %v3137_v2  ;;  %v3201_v34 = vrot.slane %v5792_v39, 1  ;;  %v3033_v63 = vsel %vm1384_vm9, %v3032_v26, %v3031_v35  ;;  %v3036_v21 = vrot.slane %v5824_v54, 1 }
 0x3f8   : > { %v2953_v18 = vpop.f32.mrf.mxu3  ;;  %v3459_v22 = vrot.slane %v5724_v32, 3  ;;  %v3341_v47 = vrot.slane %v5762_v0, 1  ;;  %v3461_v41 = vrot.slane %v5762_v0, 2  ;;  %v3093_v26 = vrot.slane %v5768_v62, 1 }
 0x3f9   : > { %v3244_v51 = vrot.slane %v2953_v18, 4  ;;  %v3140_v7 = vrot.slane %v2953_v18, 3  ;;  %v3034_v44 = vrot.slane %v2953_v18, 2  ;;  %v3307_v42 = vrot.slane %v2953_v18, 1 }
 0x3fa   : > { %v3340_v32 = vsel %vm1372_vm5, %v3339_v61, %v3338_v53  ;;  %v3202_v2 = vsel %vm1384_vm9, %v3201_v34, %v3200_v50  ;;  %v3204_v35 = vrot.slane %v5824_v54, 7  ;;  %v3094_v0 = vsel %vm1381_vm8, %v3093_v26, %v3092_v56 }
 0x3fb   : > { %v3245_v25 = vsel %vm1387_vm10, %v3244_v51, %v3243_v23  ;;  %v3141_v40 = vsel %vm1387_vm10, %v3140_v7, %v3139_v3  ;;  %v3035_v24 = vsel %vm1387_vm10, %v3034_v44, %v3033_v63  ;;  %v3308_v23 = vsel %vm1387_vm10, %v3307_v42, %v3306_v16 }
 0x3fc   : > { %v3247_v1 = vsel %vm1390_vm11, %v3246_v14, %v3245_v25  ;;  %v3143_v10 = vsel %vm1390_vm11, %v3142_v27, %v3141_v40  ;;  %v3037_v29 = vsel %vm1390_vm11, %v3036_v21, %v3035_v24  ;;  %v3309_v51 = vsel %vm1390_vm11, %v5824_v54, %v3308_v23 }
 0x3fd   : > { %3251 = vxpose.xlu2.b32.end [2/2] (short) (narrow) %v3247_v1, 16  ;;  %3147 = vxpose.xlu1.b32.end [2/2] (short) (narrow) %v3143_v10, 16  ;;  %v3203_v14 = vsel %vm1387_vm10, %v2953_v18, %v3202_v2  ;;  %v3096_v3 = vrot.slane %v2953_v18, 7  ;;  %v3460_v7 = vsel %vm1372_vm5, %v3459_v22, %v3458_v13  ;;  %v3095_v61 = vsel %vm1384_vm9, %v5792_v39, %v3094_v0 }
 0x3fe   : > { %3041 = vxpose.xlu0.b32.end [2/2] (short) (narrow) %v3037_v29, 16  ;;  %v3205_v53 = vsel %vm1390_vm11, %v3204_v35, %v3203_v14  ;;  %v3098_v50 = vrot.slane %v5824_v54, 6  ;;  %v3342_v16 = vsel %vm1375_vm6, %v3341_v47, %v3340_v32  ;;  %v3462_v27 = vsel %vm1375_vm6, %v3461_v41, %v3460_v7 }
 0x3ff   : > { %v3097_v44 = vsel %vm1387_vm10, %v3096_v3, %v3095_v61  ;;  %v3463_v56 = vrot.slane %v5753_v4, 1  ;;  %v3343_v19 = vsel %vm1378_vm7, %v5753_v4, %v3342_v16  ;;  %v3346_v13 = vrot.slane %v5792_v39, 6 }
 0x400   : > { %v3099_v42 = vsel %vm1390_vm11, %v3098_v50, %v3097_v44  ;;  %v3466_v25 = vrot.slane %v5792_v39, 7  ;;  %v3344_v40 = vrot.slane %v5768_v62, 7  ;;  %v3348_v63 = vrot.slane %v2953_v18, 5 }
 0x401   : > { %v3464_v34 = vsel %vm1378_vm7, %v3463_v56, %v3462_v27  ;;  %v3468_v21 = vrot.slane %v2953_v18, 6  ;;  %v6183_v47 = vmov 3  }
 0x402   : > { %v3345_v22 = vsel %vm1381_vm8, %v3344_v40, %v3343_v19  ;;  %v3465_v1 = vsel %vm1381_vm8, %v5768_v62, %v3464_v34  ;;  %v6184_v62 = vmov 4  }
 0x403   : > { %v3347_v4 = vsel %vm1384_vm9, %v3346_v13, %v3345_v22  ;;  %v3467_v10 = vsel %vm1384_vm9, %v3466_v25, %v3465_v1  ;;  %v5931_v1 = vpop.f32.mrf.mxu2 }
 0x404   : > { %v3349_v24 = vsel %vm1387_vm10, %v3348_v63, %v3347_v4  ;;  %v3469_v39 = vsel %vm1387_vm10, %v3468_v21, %v3467_v10 }
 0x405   : > { %3354 = vxpose.xlu2.b32.start [1/2] (short) (narrow) %v5658_v28, 16  ;;  %3474 = vxpose.xlu1.b32.start [1/2] (short) (narrow) %v5664_v17, 16  ;;  %v3350_v28 = vrot.slane %v5824_v54, 4  ;;  %v3470_v17 = vrot.slane %v5824_v54, 5  ;;  %v5903_v54 = vpop.trf.xlu1 }
 0x407   : > { %v3351_v29 = vsel %vm1390_vm11, %v3350_v28, %v3349_v24  ;;  %v3471_v18 = vsel %vm1390_vm11, %v3470_v17, %v3469_v39  ;;  %v5934_v24 = vpop.f32.mrf.mxu3  ;;  %v6190_v39 = vld [vmem:[#allocation24_spill] sm:$0xff] }
 0x40d   : > { %3355 = vxpose.xlu2.b32.end [2/2] (short) (narrow) %v3351_v29, 16  ;;  %3475 = vxpose.xlu1.b32.end [2/2] (short) (narrow) %v3471_v18, 16  ;;  %v5905_v41 = vpop.trf.xlu1  ;;  %v3424_v29 = vrot.slane %v5931_v1, 3  ;;  %v3426_v18 = vrot.slane %v5934_v24, 2 }
 0x465   : > { %4064 = vset.pattern.permute.xlu0 %v6183_v47 }
 0x46c   : > { %3439 = vperm.xlu0 %4064, %v5253_v15  }
 0x46f   : > { %4063 = vset.pattern.permute.xlu2 %v6183_v47  ;;  %v5939_v47 = vpop.f32.mrf.mxu0 }
 0x474   : > { %4065 = vset.pattern.permute.xlu0 %v6184_v62 }
 0x475   : > { %1907 = vperm.xlu0 %4065, %v4672_v20   ;;  %v6185_v20 = vld [vmem:[#allocation20_spill] sm:$0xff] }
 0x476   : > { %3435 = vperm.xlu2 %4063, %v5237_v6   ;;  %v6186_v6 = vld [vmem:[#allocation21_spill] sm:$0xff] }
 0x47d   : > { %1911 = vperm.xlu0 %4065, %v4835_v5  }
 0x485   : > { %3543 = vperm.xlu0 %4065, %v5253_v15  }
 0x48e   : > { %v3266_v26 = vpop.trf.xlu2 }
 0x48f   : > { %v3312_v35 = vadd.f32 %v5667_v38, %v3266_v26  ;;  %v6188_v38 = vld [vmem:[#allocation19_spill] sm:$0xff] }
 0x491   : > { %v3322_v5 = vadd.f32 %v5684_v43, %v3312_v35  ;;  %v3428_v35 = vrot.slane %v5939_v47, 1 }
 0x496   : > { %v3267_v7 = vpop.trf.xlu2 }
 0x497   : > { %v3313_v44 = vadd.f32 %v3309_v51, %v3267_v7  ;;  %v5927_v51 = vpop.f32.mrf.mxu1 }
 0x498   : > { %v3422_v10 = vrot.slane %v5927_v51, 4 }
 0x499   : > { %v3162_v32 = vpop.trf.xlu1 }
 0x49a   : > { %v3208_v23 = vadd.f32 %v5677_v30, %v3162_v32  ;;  %v3056_v2 = vpop.trf.xlu0  ;;  %v6187_v30 = vld [vmem:[#allocation22_spill] sm:$0xff] }
 0x49b   : > { %v3102_v14 = vadd.f32 %v5687_v57, %v3056_v2  ;;  %v6189_v57 = vld [vmem:[#allocation23_spill] sm:$0xff] }
 0x49c   : > { %v3218_v0 = vadd.f32 %v6185_v20, %v3208_v23  ;;  %v5920_v34 = vadd.f32 %v6189_v57, %v3313_v44 }
 0x49d   : > { %v3114_v3 = vadd.f32 %v6186_v6, %v3102_v14 }
 0x49e   : > { %v3370_v40 = vpop.trf.xlu2 }
 0x49f   : > { %v3548_v15 = vmax.f32 %v3114_v3, %v3218_v0 }
 0x4a1   : > { %v3163_v61 = vpop.trf.xlu1  ;;  %v3550_v50 = vmax.f32 %v3548_v15, %v3322_v5 }
 0x4a2   : > { %v3209_v16 = vadd.f32 %v3205_v53, %v3163_v61  ;;  %v3057_v27 = vpop.trf.xlu0 }
 0x4a3   : > { %v3103_v56 = vadd.f32 %v3099_v42, %v3057_v27  ;;  %v3432_v42 = vadd.f32 %v5718_v60, %v3370_v40 }
 0x4a4   : > { %v5914_v19 = vadd.f32 %v6187_v30, %v3209_v16 }
 0x4a5   : > { %v5917_v13 = vadd.f32 %v6188_v38, %v3103_v56 }
 0x4a6   : > { %v3371_v53 = vpop.trf.xlu2 }
 0x4a7   : > { %v3549_v43 = vmax.f32 %v5917_v13, %v5914_v19 }
 0x4a9   : > { %v5925_v25 = vmax.f32 %v3549_v43, %v5920_v34  ;;  %v3490_v63 = vpop.trf.xlu1  ;;  %v6191_v43 = vld [vmem:[#allocation17_spill] sm:$0xff] }
 0x4aa   : > { %v3536_v21 = vadd.f32 %v5722_v55, %v3490_v63  ;;  %v3423_v55 = vsel %vm1381_vm8, %v3422_v10, %v5812_v8  ;;  %v1904_v40 = vadd.f32 %v6191_v43, %v5903_v54  ;;  %v3526_v10 = vrot.slane %v5927_v51, 5 }
 0x4ab   : > { %v3425_v2 = vsel %vm1384_vm9, %v3424_v29, %v3423_v55 }
 0x4ac   : > { %v3546_v28 = vadd.f32 %v6190_v39, %v3536_v21  ;;  %v3427_v20 = vsel %vm1387_vm10, %v3426_v18, %v3425_v2 }
 0x4d0   : > { %v3436_v22 = vpop.permute.xlu2 %3435 }
 0x4d1   : > { %v3442_v4 = vadd.f32 %v3436_v22, %v3432_v42  ;;  %v1900_v22 = vrot.slane %v5519_v37, 2 }
 0x4d3   : > { %v3552_v17 = vmax.f32 %v3550_v50, %v3442_v4 }
 0x4d5   : > { %v3554_v60 = vmax.f32 %v3552_v17, %v3546_v28  ;;  %v3530_v17 = vrot.slane %v5934_v24, 3 }
 0x4d7   : > { %v5943_v62 = vsub.f32 %v3114_v3, %v3554_v60  ;;  %v5945_v26 = vsub.f32 %v3218_v0, %v3554_v60  ;;  %v5947_v32 = vsub.f32 %v3322_v5, %v3554_v60  ;;  %v5949_v23 = vsub.f32 %v3442_v4, %v3554_v60 }
 0x4d8   : > { %v5953_v14 = vsub.f32 %v3546_v28, %v3554_v60  ;;  %v3429_v0 = vsel %vm1390_vm11, %v3428_v35, %v3427_v20  ;;  %v3528_v28 = vrot.slane %v5931_v1, 4  ;;  %v3532_v60 = vrot.slane %v5939_v47, 2 }
 0x4d9   : > { %v3558_v6 = vmul.f32 1.442695, %v5943_v62  ;;  %v3564_v8 = vmul.f32 1.442695, %v5945_v26  ;;  %v3572_v3 = vmul.f32 1.442695, %v5947_v32  ;;  %v3433_v15 = vadd.f32 %v3429_v0, %v3371_v53 }
 0x4da   : > { %v3580_v5 = vmul.f32 1.442695, %v5949_v23  ;;  %v3588_v7 = vmul.f32 1.442695, %v5953_v14 }
 0x4db   : > { %4067 = vpow2.f32 %v3558_v6 }
 0x4dc   : > { %4069 = vpow2.f32 %v3564_v8  ;;  %v3491_v8 = vpop.trf.xlu1 }
 0x4dd   : > { %4071 = vpow2.f32 %v3572_v3 }
 0x4de   : > { %v3440_v61 = vpop.permute.xlu0 %3439  ;;  %4073 = vpow2.f32 %v3580_v5 }
 0x4df   : > { %v5962_v50 = vadd.f32 %v3440_v61, %v3433_v15  ;;  %4075 = vpow2.f32 %v3588_v7 }
 0x4e1   : > { %v4068_v16 = vpop.eup %4067  ;;  %v3553_v27 = vmax.f32 %v5925_v25, %v5962_v50 }
 0x4e2   : > { %v4070_v44 = vpop.eup %4069 }
 0x4e3   : > { %v3568_v56 = vadd.f32 %v4070_v44, %v4068_v16  ;;  %v4072_v30 = vpop.eup %4071 }
 0x4e4   : > { %v4074_v57 = vpop.eup %4073 }
 0x4e5   : > { %v3576_v38 = vadd.f32 %v4072_v30, %v3568_v56  ;;  %v4076_v42 = vpop.eup %4075 }
 0x4e7   : > { %v3584_v53 = vadd.f32 %v4074_v57, %v3576_v38  ;;  %v1908_v63 = vpop.permute.xlu0 %1907 }
 0x4e8   : > { %v1914_v21 = vadd.f32 %v1908_v63, %v1904_v40 }
 0x4e9   : > { %v3592_v4 = vadd.f32 %v4076_v42, %v3584_v53 }
 0x4ea   : > { %v1922_v39 = vmax.f32 %v1920_v31, %v1914_v21  ;;  %v1901_v31 = vsel %vm1390_vm11, %v1900_v22, %v6192_v46 }
 0x4eb   : > { %4077 = vlog2.f32 %v3592_v4  ;;  %v1905_v1 = vadd.f32 %v1901_v31, %v5905_v41 }
 0x4ec   : > { %v5976_v54 = vsub.f32 %v5696_v59, %v1922_v39  ;;  %v5979_v29 = vsub.f32 %v5693_v45, %v1922_v39  ;;  %v5982_v37 = vsub.f32 %v5732_v33, %v1922_v39  ;;  %v5985_v51 = vsub.f32 %v5758_v11, %v1922_v39 }
 0x4ed   : > { %v5989_v18 = vsub.f32 %v1914_v21, %v1922_v39  ;;  %v3527_v59 = vsel %vm1381_vm8, %v3526_v10, %v5815_v12 }
 0x4ee   : > { %v1926_v24 = vmul.f32 1.442695, %v5976_v54  ;;  %v1932_v45 = vmul.f32 1.442695, %v5979_v29  ;;  %v3529_v33 = vsel %vm1384_vm9, %v3528_v28, %v3527_v59  ;;  %v1940_v11 = vmul.f32 1.442695, %v5982_v37 }
 0x4ef   : > { %v1912_v55 = vpop.permute.xlu0 %1911  ;;  %v3531_v2 = vsel %vm1387_vm10, %v3530_v17, %v3529_v33  ;;  %v1948_v12 = vmul.f32 1.442695, %v5985_v51  ;;  %v1956_v3 = vmul.f32 1.442695, %v5989_v18 }
 0x4f0   : > { %4079 = vpow2.f32 %v1926_v24  ;;  %v1915_v35 = vadd.f32 %v1912_v55, %v1905_v1  ;;  %v3533_v47 = vsel %vm1390_vm11, %v3532_v60, %v3531_v2 }
 0x4f1   : > { %v4078_v41 = vpop.eup %4077  ;;  %4081 = vpow2.f32 %v1932_v45  ;;  %v3537_v44 = vadd.f32 %v3533_v47, %v3491_v8 }
 0x4f2   : > { %v3595_v20 = vmul.f32 0.6931472, %v4078_v41  ;;  %v1923_v6 = vmax.f32 %v1921_v52, %v1915_v35  ;;  %4083 = vpow2.f32 %v1940_v11 }
 0x4f3   : > { %4085 = vpow2.f32 %v1948_v12 }
 0x4f4   : > { %v3598_v0 = vsub.f32 %v5943_v62, %v3595_v20  ;;  %v3603_v5 = vsub.f32 %v5945_v26, %v3595_v20  ;;  %v3608_v15 = vsub.f32 %v5947_v32, %v3595_v20  ;;  %v3613_v7 = vsub.f32 %v5949_v23, %v3595_v20 }
 0x4f5   : > { %v3618_v61 = vsub.f32 %v5953_v14, %v3595_v20  ;;  %v6013_v36 = vsub.f32 %v5706_v48, %v1923_v6  ;;  %v6016_v52 = vsub.f32 %v5703_v58, %v1923_v6  ;;  %v6023_v62 = vsub.f32 %v5748_v49, %v1923_v6 }
 0x4f6   : > { %v4080_v16 = vpop.eup %4079  ;;  %3949 = vst.msk [vmem:[%s6018_s0 + $0x50] sm:$0xff] %vm1968_vm12, %v3598_v0  ;;  %v6026_v48 = vsub.f32 %v5780_v9, %v1923_v6  ;;  %v6028_v26 = vsub.f32 %v1915_v35, %v1923_v6  ;;  %4087 = vpow2.f32 %v1956_v3 }
 0x4f7   : > { %v4082_v58 = vpop.eup %4081  ;;  %3951 = vst.msk [vmem:[%s6018_s0 + $0x60] sm:$0xff] %vm1968_vm12, %v3603_v5  ;;  %v1928_v32 = vmul.f32 1.442695, %v6013_v36  ;;  %v1934_v23 = vmul.f32 1.442695, %v6016_v52  ;;  %v3544_v14 = vpop.permute.xlu0 %3543 }
 0x4f8   : > { %3953 = vst.msk [vmem:[%s6018_s0 + $0x70] sm:$0xff] %vm1968_vm12, %v3608_v15  ;;  %v1936_v56 = vadd.f32 %v4082_v58, %v4080_v16  ;;  %v1942_v49 = vmul.f32 1.442695, %v6023_v62  ;;  %v3547_v30 = vadd.f32 %v3544_v14, %v3537_v44  ;;  %v4084_v38 = vpop.eup %4083  ;;  %v1950_v57 = vmul.f32 1.442695, %v6026_v48 }
 0x4f9   : > { %3955 = vst.msk [vmem:[%s6018_s0 + $0x80] sm:$0xff] %vm1968_vm12, %v3613_v7  ;;  %4089 = vpow2.f32 %v1928_v32  ;;  %v4086_v40 = vpop.eup %4085  ;;  %v1958_v53 = vmul.f32 1.442695, %v6028_v26 }
 0x4fa   : > { %3957 = vst.msk [vmem:[%s6018_s0 + $0x90] sm:$0xff] %vm1968_vm12, %v3618_v61  ;;  %v1944_v9 = vadd.f32 %v4084_v38, %v1936_v56  ;;  %4091 = vpow2.f32 %v1934_v23  ;;  %v3555_v43 = vmax.f32 %v3553_v27, %v3547_v30 }
 0x4fb   : > { %4093 = vpow2.f32 %v1942_v49 }
 0x4fc   : > { %v1952_v63 = vadd.f32 %v4086_v40, %v1944_v9  ;;  %v6047_v42 = vsub.f32 %v5917_v13, %v3555_v43  ;;  %v6050_v21 = vsub.f32 %v5914_v19, %v3555_v43  ;;  %v4088_v22 = vpop.eup %4087  ;;  %v6053_v4 = vsub.f32 %v5920_v34, %v3555_v43 }
 0x4fd   : > { %v6056_v10 = vsub.f32 %v5962_v50, %v3555_v43  ;;  %v6058_v25 = vsub.f32 %v3547_v30, %v3555_v43  ;;  %4095 = vpow2.f32 %v1950_v57 }
 0x4fe   : > { %v1960_v27 = vadd.f32 %v4088_v22, %v1952_v63  ;;  %v3560_v39 = vmul.f32 1.442695, %v6047_v42  ;;  %v3566_v28 = vmul.f32 1.442695, %v6050_v21  ;;  %4097 = vpow2.f32 %v1958_v53 }
 0x4ff   : > { %v4090_v13 = vpop.eup %4089  ;;  %v3574_v34 = vmul.f32 1.442695, %v6053_v4  ;;  %v3582_v31 = vmul.f32 1.442695, %v6056_v10  ;;  %v3590_v59 = vmul.f32 1.442695, %v6058_v25 }
 0x500   : > { %v4092_v17 = vpop.eup %4091  ;;  %4099 = vlog2.f32 %v1960_v27 }
 0x501   : > { %v1937_v19 = vadd.f32 %v4092_v17, %v4090_v13  ;;  %4101 = vpow2.f32 %v3560_v39  ;;  %v4094_v46 = vpop.eup %4093 }
 0x502   : > { %4103 = vpow2.f32 %v3566_v28 }
 0x503   : > { %v1945_v50 = vadd.f32 %v4094_v46, %v1937_v19  ;;  %v4096_v1 = vpop.eup %4095  ;;  %4105 = vpow2.f32 %v3574_v34 }
 0x504   : > { %v4098_v24 = vpop.eup %4097  ;;  %4107 = vpow2.f32 %v3582_v31 }
 0x505   : > { %v1953_v45 = vadd.f32 %v4096_v1, %v1945_v50  ;;  %4109 = vpow2.f32 %v3590_v59 }
 0x506   : > { %v4100_v33 = vpop.eup %4099 }
 0x507   : > { %v4102_v60 = vpop.eup %4101  ;;  %v1963_v11 = vmul.f32 0.6931472, %v4100_v33  ;;  %v1961_v55 = vadd.f32 %v4098_v24, %v1953_v45 }
 0x508   : > { %v4104_v2 = vpop.eup %4103 }
 0x509   : > { %v1966_v35 = vsub.f32 %v5976_v54, %v1963_v11  ;;  %v1971_v41 = vsub.f32 %v5979_v29, %v1963_v11  ;;  %v1976_v12 = vsub.f32 %v5982_v37, %v1963_v11  ;;  %v1981_v20 = vsub.f32 %v5985_v51, %v1963_v11  ;;  %v4106_v47 = vpop.eup %4105 }
 0x50a   : > { %v1986_v6 = vsub.f32 %v5989_v18, %v1963_v11  ;;  %4111 = vlog2.f32 %v1961_v55  ;;  %v3569_v8 = vadd.f32 %v4104_v2, %v4102_v60  ;;  %v4108_v0 = vpop.eup %4107 }
 0x50b   : > { %1969 = vst.msk [vmem:[%s6018_s0] sm:$0xff] %vm1968_vm12, %v1966_v35  ;;  %v4110_v54 = vpop.eup %4109 }
 0x50c   : > { %3834 = vst.msk [vmem:[%s6018_s0 + $0x10] sm:$0xff] %vm1968_vm12, %v1971_v41  ;;  %v3577_v3 = vadd.f32 %v4106_v47, %v3569_v8 }
 0x50d   : > { %3836 = vst.msk [vmem:[%s6018_s0 + $0x20] sm:$0xff] %vm1968_vm12, %v1976_v12 }
 0x50e   : > { %3838 = vst.msk [vmem:[%s6018_s0 + $0x30] sm:$0xff] %vm1968_vm12, %v1981_v20  ;;  %v3585_v29 = vadd.f32 %v4108_v0, %v3577_v3 }
 0x50f   : > { %3840 = vst.msk [vmem:[%s6018_s0 + $0x40] sm:$0xff] %vm1968_vm12, %v1986_v6 }
 0x510   : > { %v4112_v37 = vpop.eup %4111  ;;  %v3593_v51 = vadd.f32 %v4110_v54, %v3585_v29 }
 0x511   : > { %v1965_v18 = vmul.f32 0.6931472, %v4112_v37 }
 0x512   : > { %4113 = vlog2.f32 %v3593_v51 }
 0x513   : > { %v1967_v5 = vsub.f32 %v6013_v36, %v1965_v18  ;;  %v1972_v15 = vsub.f32 %v6016_v52, %v1965_v18  ;;  %v1977_v7 = vsub.f32 %v6023_v62, %v1965_v18  ;;  %v1982_v61 = vsub.f32 %v6026_v48, %v1965_v18 }
 0x514   : > { %v1987_v16 = vsub.f32 %v6028_v26, %v1965_v18 }
 0x515   : > { %1970 = vst.msk [vmem:[%s6018_s0 + $0x8] sm:$0xff] %vm1968_vm12, %v1967_v5 }
 0x516   : > { %3835 = vst.msk [vmem:[%s6018_s0 + $0x18] sm:$0xff] %vm1968_vm12, %v1972_v15 }
 0x517   : > { %3837 = vst.msk [vmem:[%s6018_s0 + $0x28] sm:$0xff] %vm1968_vm12, %v1977_v7 }
 0x518   : > { %v4114_v36 = vpop.eup %4113  ;;  %3839 = vst.msk [vmem:[%s6018_s0 + $0x38] sm:$0xff] %vm1968_vm12, %v1982_v61 }
 0x519   : > { %3841 = vst.msk [vmem:[%s6018_s0 + $0x48] sm:$0xff] %vm1968_vm12, %v1987_v16  ;;  %v3597_v52 = vmul.f32 0.6931472, %v4114_v36 }
 0x51b   : > { %v3599_v44 = vsub.f32 %v6047_v42, %v3597_v52  ;;  %v3604_v62 = vsub.f32 %v6050_v21, %v3597_v52  ;;  %v3609_v48 = vsub.f32 %v6053_v4, %v3597_v52  ;;  %v3614_v26 = vsub.f32 %v6056_v10, %v3597_v52 }
 0x51c   : > { %v3619_v58 = vsub.f32 %v6058_v25, %v3597_v52 }
 0x51d   : > { %3950 = vst.msk [vmem:[%s6018_s0 + $0x58] sm:$0xff] %vm1968_vm12, %v3599_v44 }
 0x51e   : > { %3952 = vst.msk [vmem:[%s6018_s0 + $0x68] sm:$0xff] %vm1968_vm12, %v3604_v62 }
 0x51f   : > { %3954 = vst.msk [vmem:[%s6018_s0 + $0x78] sm:$0xff] %vm1968_vm12, %v3609_v48 }
 0x520   : > { %3956 = vst.msk [vmem:[%s6018_s0 + $0x88] sm:$0xff] %vm1968_vm12, %v3614_v26 }
 0x521   : > { %3958 = vst.msk [vmem:[%s6018_s0 + $0x98] sm:$0xff] %vm1968_vm12, %v3619_v58 }
 0x522   : > { %4232 = shalt.err (!%p4229_p9)
}
 0x523   : > { %s4294_s7 = smov 128   ;;  %s4295_s30 = smov 8  }
 0x524   : > { %3982 = dma.vmem_to_hbm [thread:$0]  (%p4393_p7), %s3638_s22, 2560, %s3640_s16, %s3624_s24, %s4294_s7, %s4294_s7, %s4295_s30  }
 0x525 PF: > { %s3654_s9 = sand.u32 1, %s4267_s18   ;;  %p6193_p12 = scmp.ge.s32.totalorder %s4279_s21, 2 }
 0x526   : > { %s3655_s20 = scalar_lea.sflag [#allocation5], %s3654_s9 }
 0x527   : > { %p3996_p13 = pnand %p6193_p12, %p4361_p6 }
 0x529   : > { %p3997_p0 = pneg %p3996_p13 }
 0x52b   : > { %4262 = dma.done.wait (%p3997_p0), %s3655_s20, 2560  }
 0x52c   : > { %4264 = vsyncadd (%p3997_p0), %s3655_s20, 4294964736  ;;  %s6194_s21 = sld [smem:[#allocation15_spill]]  ;;  %s6197_s18 = smov %s4271_s19 }
 0x52d   : > { %s6195_s12 = sld [smem:[#allocation14_spill]] }
 0x52e   : > { %s6196_s20 = sld [smem:[#allocation16_spill]] }
 0x532   : > { %p21_p3 = scmp.ge.s32.totalorder %s6194_s21, 4  }
 0x533   : > { %s6198_s19 = smov %s6195_s12 }
 0x534   :  { %23 = sbr.rel (!%p21_p3) target bundleno = 10 (0xa), region = 113 }
 0x539   :  { %3661 = vsyncpa [#allocation4], 1 }
 0x53a   :  { %3663 = vsyncpa [#allocation4 + $0x1], 1 }
 0x53b   :  { %3664 = vsyncpa [#allocation7], 1 }
 0x53c   :  { %3666 = vsyncpa [#allocation7 + $0x1], 1 }
 0x53d   :  { %3667 = vsyncpa [#allocation5], 1 }
 0x53e   :  { %3669 = vsyncpa [#allocation5 + $0x1], 1 }

</bundles_post_ra>
